<compile_context>
chip_gen: v5e
topology: v5e:2x2
jax: 0.10.0
libtpu: 0.0.40
codegen_flags: <defaults>
</compile_context>

<pallas_src>
import functools
import math

import jax
import jax.numpy as jnp
from jax.experimental import pallas as pl
from jax.experimental.pallas import tpu as pltpu


# ----------------------------------------------------------------------------
# Fused ResBlock kernel (one grid step == one image, flattened to (H*W, C))
# ----------------------------------------------------------------------------
def _resblock_kernel(x_ref, w1_ref, b1_ref, w2_ref, b2_ref, w3_ref, b3_ref,
                     o_ref, *, W):
    HW = x_ref.shape[1]
    C2 = w1_ref.shape[1]
    f32 = jnp.float32

    def shift_rows(a, s):
        # out[r] = a[r - s] for 0 <= r - s < HW, zero fill otherwise.
        if s == 0:
            return a
        if s > 0:
            return jnp.concatenate([jnp.zeros((s, C2), f32), a[:HW - s, :]],
                                   axis=0)
        return jnp.concatenate([a[-s:, :], jnp.zeros((-s, C2), f32)], axis=0)

    # ---- conv1 (1x1) + ReLU : stays in VMEM --------------------------------
    r1 = jnp.dot(x_ref[0], w1_ref[...], preferred_element_type=f32) + b1_ref[...]
    r1 = jnp.maximum(r1, 0.0)

    # ---- conv2 (3x3, pad=1) as 9 MXU matmuls over shifted taps -------------
    # dj (= column) shifts: the only sub-tile (+/-1 row) shifts; built once and
    # reused for all three di taps.  Column-edge masking via a sublane iota.
    wcol = jax.lax.broadcasted_iota(jnp.int32, (HW, 1), 0) % W
    r1_djs = (
        jnp.where(wcol > 0, shift_rows(r1, 1), 0.0),        # reads (h, w-1)
        r1,                                                  # reads (h, w)
        jnp.where(wcol < W - 1, shift_rows(r1, -1), 0.0),    # reads (h, w+1)
    )
    # di (= row) shifts are by +/-W flat rows: W % 8 == 0, so these are
    # sublane-tile aligned (no relayout); zero fill provides the H padding.
    prods = [
        jnp.dot(shift_rows(r1_djs[dj], (1 - di) * W), w2_ref[3 * di + dj],
                preferred_element_type=f32)
        for di in range(3) for dj in range(3)
    ]
    while len(prods) > 1:                         # pairwise tree sum
        nxt = [prods[i] + prods[i + 1] for i in range(0, len(prods) - 1, 2)]
        if len(prods) % 2:
            nxt.append(prods[-1])
        prods = nxt
    r2 = jnp.maximum(prods[0] + b2_ref[...], 0.0)

    # ---- conv3 (1x1) + bias + residual; x re-read here, single writeback ---
    y = (jnp.dot(r2, w3_ref[...], preferred_element_type=f32)
         + b3_ref[...] + x_ref[0])
    o_ref[0] = y.astype(o_ref.dtype)


# ----------------------------------------------------------------------------
# Wrappers
# ----------------------------------------------------------------------------
def res_block_fwd_nhwc(x_nhwc, params):
    """ResBlock forward on NHWC input (preferred, no layout transposes)."""
    B, H, W, C = x_nhwc.shape
    C2 = params["w1"].shape[1]
    HW = H * W
    # f32 sublane alignment for the tile-aligned +/-W row shifts; for bf16
    # inputs this would need W % 16 == 0.
    assert W % 8 == 0, "fused ResBlock kernel requires W % 8 == 0 (f32)"

    x2 = x_nhwc.reshape(B, HW, C)                 # free (contiguous) reshape
    w2 = params["w2"].reshape(9, C2, C2)          # (3,3,C2,C2) -> (9,C2,C2)

    flops = 2 * B * HW * (C * C2 + 9 * C2 * C2 + C2 * C)
    bytes_accessed = 4 * (2 * B * HW * C
                          + C * C2 + 9 * C2 * C2 + C2 * C + 2 * C2 + C)

    out = pl.pallas_call(
        functools.partial(_resblock_kernel, W=W),
        out_shape=jax.ShapeDtypeStruct((B, HW, C), x_nhwc.dtype),
        grid_spec=pltpu.PrefetchScalarGridSpec(
            num_scalar_prefetch=0,
            grid=(B,),
            in_specs=[
                pl.BlockSpec((1, HW, C), lambda b: (b, 0, 0)),    # x
                pl.BlockSpec((C, C2), lambda b: (0, 0)),          # w1
                pl.BlockSpec((1, C2), lambda b: (0, 0)),          # b1
                pl.BlockSpec((9, C2, C2), lambda b: (0, 0, 0)),   # w2
                pl.BlockSpec((1, C2), lambda b: (0, 0)),          # b2
                pl.BlockSpec((C2, C), lambda b: (0, 0)),          # w3
                pl.BlockSpec((1, C), lambda b: (0, 0)),           # b3
            ],
            out_specs=pl.BlockSpec((1, HW, C), lambda b: (b, 0, 0))),
        compiler_params=pltpu.CompilerParams(
            dimension_semantics=("parallel",),     # shards batch over TCs
            vmem_limit_bytes=32 * 1024 * 1024),    # well below v7x 64 MiB phys
        cost_estimate=pl.CostEstimate(flops=flops, transcendentals=0,
                                      bytes_accessed=bytes_accessed),
    )(x2, params["w1"], params["b1"].reshape(1, C2), w2,
      params["b2"].reshape(1, C2), params["w3"], params["b3"].reshape(1, C))

    return out.reshape(B, H, W, C)


def res_block_fwd(x_nchw, params):
    """PyTorch-parity entry point (NCHW).  The two transposes are HBM-bound
    XLA ops; an NHWC pipeline should call res_block_fwd_nhwc directly."""
    x = jnp.transpose(x_nchw, (0, 2, 3, 1))
    out = res_block_fwd_nhwc(x, params)
    return jnp.transpose(out, (0, 3, 1, 2))


# ----------------------------------------------------------------------------
# Plain-JAX reference (correctness check only)
# ----------------------------------------------------------------------------
def _res_block_ref(x_nchw, params):
    hi = jax.lax.Precision.HIGHEST
    x = jnp.transpose(x_nchw, (0, 2, 3, 1))
    B, H, W, C = x.shape
    C2 = params["w1"].shape[1]
    r = jnp.maximum(
        jnp.einsum("bhwc,cd->bhwd", x, params["w1"], precision=hi)
        + params["b1"], 0.0)
    rp = jnp.pad(r, ((0, 0), (1, 1), (1, 1), (0, 0)))
    acc = jnp.zeros((B, H, W, C2), jnp.float32)
    for di in range(3):
        for dj in range(3):
            acc = acc + jnp.einsum("bhwc,cd->bhwd",
                                   rp[:, di:di + H, dj:dj + W, :],
                                   params["w2"][di, dj], precision=hi)
    r = jnp.maximum(acc + params["b2"], 0.0)
    y = jnp.einsum("bhwc,cd->bhwd", r, params["w3"], precision=hi) \
        + params["b3"] + x
    return jnp.transpose(y, (0, 3, 1, 2))


# ----------------------------------------------------------------------------
# Deterministic parameter init (mimics PyTorch Conv2d default init)
# ----------------------------------------------------------------------------
def init_res_block(key, nf):
    def conv_init(k, cin, cout, ksize):
        kw, kb = jax.random.split(k)
        bound = 1.0 / math.sqrt(cin * ksize * ksize)
        shape = (cin, cout) if ksize == 1 else (ksize, ksize, cin, cout)
        w = jax.random.uniform(kw, shape, jnp.float32, -bound, bound)
        b = jax.random.uniform(kb, (cout,), jnp.float32, -bound, bound)
        return w, b

    k1, k2, k3 = jax.random.split(key, 3)
    w1, b1 = conv_init(k1, nf, nf // 2, 1)
    w2, b2 = conv_init(k2, nf // 2, nf // 2, 3)
    w3, b3 = conv_init(k3, nf // 2, nf, 1)
    return {"w1": w1, "b1": b1, "w2": w2, "b2": b2, "w3": w3, "b3": b3}


if __name__ == "__main__":
    num_filters, B, H, W = 128, 2, 16, 16          # module default nf=128
    root = jax.random.PRNGKey(0)
    kp, kx = jax.random.split(root)

    params = init_res_block(kp, num_filters)
    x = jax.random.normal(kx, (B, num_filters, H, W), jnp.float32)   # NCHW

    out = jax.jit(res_block_fwd)(x, params)
    out = jax.block_until_ready(out)

    ref = _res_block_ref(x, params)
    err = float(jnp.max(jnp.abs(out - ref)))
    assert out.shape == x.shape and out.dtype == jnp.float32
    assert err < 1e-3, f"max abs error vs reference: {err}"
    print("KERNEL_OK")
</pallas_src>

<mosaic_0001>
module attributes {stable_mosaic.version = 11 : i64} {
  func.func @_resblock_kernel(%arg0: i32, %arg1: memref<1x256x128xf32, #tpu.memory_space<vmem>>, %arg2: memref<128x64xf32, #tpu.memory_space<vmem>>, %arg3: memref<1x64xf32, #tpu.memory_space<vmem>>, %arg4: memref<9x64x64xf32, #tpu.memory_space<vmem>>, %arg5: memref<1x64xf32, #tpu.memory_space<vmem>>, %arg6: memref<64x128xf32, #tpu.memory_space<vmem>>, %arg7: memref<1x128xf32, #tpu.memory_space<vmem>>, %arg8: memref<1x256x128xf32, #tpu.memory_space<vmem>>) attributes {dimension_semantics = [#tpu.dimension_semantics<parallel>], iteration_bounds = array<i64: 2>, scalar_prefetch = 0 : i64, scratch_operands = 0 : i64, tpu.core_type = #tpu.core_type<tc>, window_params = [{transform_indices = @transform_0, window_bounds = array<i64: 1, 256, 128>}, {pipeline_mode = #tpu.pipeline_mode<synchronous>, transform_indices = @transform_1, window_bounds = array<i64: 128, 64>}, {pipeline_mode = #tpu.pipeline_mode<synchronous>, transform_indices = @transform_2, window_bounds = array<i64: 1, 64>}, {pipeline_mode = #tpu.pipeline_mode<synchronous>, transform_indices = @transform_3, window_bounds = array<i64: 9, 64, 64>}, {pipeline_mode = #tpu.pipeline_mode<synchronous>, transform_indices = @transform_4, window_bounds = array<i64: 1, 64>}, {pipeline_mode = #tpu.pipeline_mode<synchronous>, transform_indices = @transform_5, window_bounds = array<i64: 64, 128>}, {pipeline_mode = #tpu.pipeline_mode<synchronous>, transform_indices = @transform_6, window_bounds = array<i64: 1, 128>}, {transform_indices = @transform_7, window_bounds = array<i64: 1, 256, 128>}]} {
    %c0 = arith.constant 0 : index
    %c0_0 = arith.constant 0 : index
    %c0_1 = arith.constant 0 : index
    %0 = vector.load %arg1[%c0, %c0_0, %c0_1] : memref<1x256x128xf32, #tpu.memory_space<vmem>>, vector<1x256x128xf32>
    %1 = vector.shape_cast %0 : vector<1x256x128xf32> to vector<256x128xf32>
    %c0_2 = arith.constant 0 : index
    %c0_3 = arith.constant 0 : index
    %2 = vector.load %arg2[%c0_2, %c0_3] : memref<128x64xf32, #tpu.memory_space<vmem>>, vector<128x64xf32>
    %cst = arith.constant dense<0.000000e+00> : vector<256x64xf32>
    %3 = tpu.matmul %1, %2, %cst {dimension_numbers = #tpu.dot_dimension_numbers<[1], [0], [0], [1], [0, 0, 1, 1], [], []>} : vector<256x128xf32>, vector<128x64xf32>, vector<256x64xf32> -> vector<256x64xf32>
    %c0_4 = arith.constant 0 : index
    %c0_5 = arith.constant 0 : index
    %4 = vector.load %arg3[%c0_4, %c0_5] : memref<1x64xf32, #tpu.memory_space<vmem>>, vector<1x64xf32>
    %5 = vector.broadcast %4 : vector<1x64xf32> to vector<256x64xf32>
    %6 = arith.addf %3, %5 : vector<256x64xf32>
    %cst_6 = arith.constant 0.000000e+00 : f32
    %7 = vector.broadcast %cst_6 : f32 to vector<256x64xf32>
    %8 = arith.maximumf %6, %7 : vector<256x64xf32>
    %9 = tpu.iota {dimensions = array<i32: 0>} : vector<256x1xi32>
    %c16_i32 = arith.constant 16 : i32
    %c0_i32 = arith.constant 0 : i32
    %10 = arith.cmpi eq, %c16_i32, %c0_i32 : i32
    %c1_i32 = arith.constant 1 : i32
    %11 = arith.select %10, %c1_i32, %c16_i32 : i32
    %12 = vector.broadcast %11 : i32 to vector<256x1xi32>
    %13 = arith.remsi %9, %12 : vector<256x1xi32>
    %c0_i32_7 = arith.constant 0 : i32
    %14 = vector.broadcast %c0_i32_7 : i32 to vector<256x1xi32>
    %15 = arith.cmpi ne, %13, %14 : vector<256x1xi32>
    %c0_i32_8 = arith.constant 0 : i32
    %16 = vector.broadcast %c0_i32_8 : i32 to vector<256x1xi32>
    %17 = arith.cmpi slt, %13, %16 : vector<256x1xi32>
    %c0_i32_9 = arith.constant 0 : i32
    %18 = arith.cmpi slt, %11, %c0_i32_9 : i32
    %19 = vector.broadcast %18 : i1 to vector<256x1xi1>
    %20 = vector.broadcast %19 : vector<256x1xi1> to vector<256x1xi1>
    %21 = arith.xori %17, %20 : vector<256x1xi1>
    %22 = arith.andi %21, %15 : vector<256x1xi1>
    %23 = vector.broadcast %11 : i32 to vector<256x1xi32>
    %24 = arith.addi %13, %23 : vector<256x1xi32>
    %25 = arith.select %22, %24, %13 : vector<256x1xi1>, vector<256x1xi32>
    %c0_i32_10 = arith.constant 0 : i32
    %26 = vector.broadcast %c0_i32_10 : i32 to vector<256x1xi32>
    %27 = arith.cmpi sgt, %25, %26 : vector<256x1xi32>
    %cst_11 = arith.constant 0.000000e+00 : f32
    %28 = vector.broadcast %cst_11 : f32 to vector<1x64xf32>
    %29 = vector.extract_strided_slice %8 {offsets = [0, 0], sizes = [255, 64], strides = [1, 1]} : vector<256x64xf32> to vector<255x64xf32>
    %30 = tpu.concatenate %28, %29 in 0 : vector<1x64xf32>, vector<255x64xf32> -> vector<256x64xf32>
    %cst_12 = arith.constant 0.000000e+00 : f32
    %31 = vector.shape_cast %27 : vector<256x1xi1> to vector<256x1xi1>
    %32 = vector.broadcast %31 : vector<256x1xi1> to vector<256x64xi1>
    %33 = vector.broadcast %cst_12 : f32 to vector<256x64xf32>
    %34 = arith.select %32, %30, %33 : vector<256x64xi1>, vector<256x64xf32>
    %c15_i32 = arith.constant 15 : i32
    %35 = vector.broadcast %c15_i32 : i32 to vector<256x1xi32>
    %36 = arith.cmpi slt, %25, %35 : vector<256x1xi32>
    %37 = vector.extract_strided_slice %8 {offsets = [1, 0], sizes = [255, 64], strides = [1, 1]} : vector<256x64xf32> to vector<255x64xf32>
    %cst_13 = arith.constant 0.000000e+00 : f32
    %38 = vector.broadcast %cst_13 : f32 to vector<1x64xf32>
    %39 = tpu.concatenate %37, %38 in 0 : vector<255x64xf32>, vector<1x64xf32> -> vector<256x64xf32>
    %cst_14 = arith.constant 0.000000e+00 : f32
    %40 = vector.shape_cast %36 : vector<256x1xi1> to vector<256x1xi1>
    %41 = vector.broadcast %40 : vector<256x1xi1> to vector<256x64xi1>
    %42 = vector.broadcast %cst_14 : f32 to vector<256x64xf32>
    %43 = arith.select %41, %39, %42 : vector<256x64xi1>, vector<256x64xf32>
    %cst_15 = arith.constant 0.000000e+00 : f32
    %44 = vector.broadcast %cst_15 : f32 to vector<16x64xf32>
    %45 = vector.extract_strided_slice %34 {offsets = [0, 0], sizes = [240, 64], strides = [1, 1]} : vector<256x64xf32> to vector<240x64xf32>
    %46 = tpu.concatenate %44, %45 in 0 : vector<16x64xf32>, vector<240x64xf32> -> vector<256x64xf32>
    %c0_16 = arith.constant 0 : index
    %c0_17 = arith.constant 0 : index
    %c0_18 = arith.constant 0 : index
    %47 = vector.load %arg4[%c0_16, %c0_17, %c0_18] : memref<9x64x64xf32, #tpu.memory_space<vmem>>, vector<1x64x64xf32>
    %48 = vector.shape_cast %47 : vector<1x64x64xf32> to vector<64x64xf32>
    %cst_19 = arith.constant dense<0.000000e+00> : vector<256x64xf32>
    %49 = tpu.matmul %46, %48, %cst_19 {dimension_numbers = #tpu.dot_dimension_numbers<[1], [0], [0], [1], [0, 0, 1, 1], [], []>} : vector<256x64xf32>, vector<64x64xf32>, vector<256x64xf32> -> vector<256x64xf32>
    %cst_20 = arith.constant 0.000000e+00 : f32
    %50 = vector.broadcast %cst_20 : f32 to vector<16x64xf32>
    %51 = vector.extract_strided_slice %8 {offsets = [0, 0], sizes = [240, 64], strides = [1, 1]} : vector<256x64xf32> to vector<240x64xf32>
    %52 = tpu.concatenate %50, %51 in 0 : vector<16x64xf32>, vector<240x64xf32> -> vector<256x64xf32>
    %c1 = arith.constant 1 : index
    %c0_21 = arith.constant 0 : index
    %c0_22 = arith.constant 0 : index
    %53 = vector.load %arg4[%c1, %c0_21, %c0_22] : memref<9x64x64xf32, #tpu.memory_space<vmem>>, vector<1x64x64xf32>
    %54 = vector.shape_cast %53 : vector<1x64x64xf32> to vector<64x64xf32>
    %cst_23 = arith.constant dense<0.000000e+00> : vector<256x64xf32>
    %55 = tpu.matmul %52, %54, %cst_23 {dimension_numbers = #tpu.dot_dimension_numbers<[1], [0], [0], [1], [0, 0, 1, 1], [], []>} : vector<256x64xf32>, vector<64x64xf32>, vector<256x64xf32> -> vector<256x64xf32>
    %cst_24 = arith.constant 0.000000e+00 : f32
    %56 = vector.broadcast %cst_24 : f32 to vector<16x64xf32>
    %57 = vector.extract_strided_slice %43 {offsets = [0, 0], sizes = [240, 64], strides = [1, 1]} : vector<256x64xf32> to vector<240x64xf32>
    %58 = tpu.concatenate %56, %57 in 0 : vector<16x64xf32>, vector<240x64xf32> -> vector<256x64xf32>
    %c2 = arith.constant 2 : index
    %c0_25 = arith.constant 0 : index
    %c0_26 = arith.constant 0 : index
    %59 = vector.load %arg4[%c2, %c0_25, %c0_26] : memref<9x64x64xf32, #tpu.memory_space<vmem>>, vector<1x64x64xf32>
    %60 = vector.shape_cast %59 : vector<1x64x64xf32> to vector<64x64xf32>
    %cst_27 = arith.constant dense<0.000000e+00> : vector<256x64xf32>
    %61 = tpu.matmul %58, %60, %cst_27 {dimension_numbers = #tpu.dot_dimension_numbers<[1], [0], [0], [1], [0, 0, 1, 1], [], []>} : vector<256x64xf32>, vector<64x64xf32>, vector<256x64xf32> -> vector<256x64xf32>
    %c3 = arith.constant 3 : index
    %c0_28 = arith.constant 0 : index
    %c0_29 = arith.constant 0 : index
    %62 = vector.load %arg4[%c3, %c0_28, %c0_29] : memref<9x64x64xf32, #tpu.memory_space<vmem>>, vector<1x64x64xf32>
    %63 = vector.shape_cast %62 : vector<1x64x64xf32> to vector<64x64xf32>
    %cst_30 = arith.constant dense<0.000000e+00> : vector<256x64xf32>
    %64 = tpu.matmul %34, %63, %cst_30 {dimension_numbers = #tpu.dot_dimension_numbers<[1], [0], [0], [1], [0, 0, 1, 1], [], []>} : vector<256x64xf32>, vector<64x64xf32>, vector<256x64xf32> -> vector<256x64xf32>
    %c4 = arith.constant 4 : index
    %c0_31 = arith.constant 0 : index
    %c0_32 = arith.constant 0 : index
    %65 = vector.load %arg4[%c4, %c0_31, %c0_32] : memref<9x64x64xf32, #tpu.memory_space<vmem>>, vector<1x64x64xf32>
    %66 = vector.shape_cast %65 : vector<1x64x64xf32> to vector<64x64xf32>
    %cst_33 = arith.constant dense<0.000000e+00> : vector<256x64xf32>
    %67 = tpu.matmul %8, %66, %cst_33 {dimension_numbers = #tpu.dot_dimension_numbers<[1], [0], [0], [1], [0, 0, 1, 1], [], []>} : vector<256x64xf32>, vector<64x64xf32>, vector<256x64xf32> -> vector<256x64xf32>
    %c5 = arith.constant 5 : index
    %c0_34 = arith.constant 0 : index
    %c0_35 = arith.constant 0 : index
    %68 = vector.load %arg4[%c5, %c0_34, %c0_35] : memref<9x64x64xf32, #tpu.memory_space<vmem>>, vector<1x64x64xf32>
    %69 = vector.shape_cast %68 : vector<1x64x64xf32> to vector<64x64xf32>
    %cst_36 = arith.constant dense<0.000000e+00> : vector<256x64xf32>
    %70 = tpu.matmul %43, %69, %cst_36 {dimension_numbers = #tpu.dot_dimension_numbers<[1], [0], [0], [1], [0, 0, 1, 1], [], []>} : vector<256x64xf32>, vector<64x64xf32>, vector<256x64xf32> -> vector<256x64xf32>
    %71 = vector.extract_strided_slice %34 {offsets = [16, 0], sizes = [240, 64], strides = [1, 1]} : vector<256x64xf32> to vector<240x64xf32>
    %cst_37 = arith.constant 0.000000e+00 : f32
    %72 = vector.broadcast %cst_37 : f32 to vector<16x64xf32>
    %73 = tpu.concatenate %71, %72 in 0 : vector<240x64xf32>, vector<16x64xf32> -> vector<256x64xf32>
    %c6 = arith.constant 6 : index
    %c0_38 = arith.constant 0 : index
    %c0_39 = arith.constant 0 : index
    %74 = vector.load %arg4[%c6, %c0_38, %c0_39] : memref<9x64x64xf32, #tpu.memory_space<vmem>>, vector<1x64x64xf32>
    %75 = vector.shape_cast %74 : vector<1x64x64xf32> to vector<64x64xf32>
    %cst_40 = arith.constant dense<0.000000e+00> : vector<256x64xf32>
    %76 = tpu.matmul %73, %75, %cst_40 {dimension_numbers = #tpu.dot_dimension_numbers<[1], [0], [0], [1], [0, 0, 1, 1], [], []>} : vector<256x64xf32>, vector<64x64xf32>, vector<256x64xf32> -> vector<256x64xf32>
    %77 = vector.extract_strided_slice %8 {offsets = [16, 0], sizes = [240, 64], strides = [1, 1]} : vector<256x64xf32> to vector<240x64xf32>
    %cst_41 = arith.constant 0.000000e+00 : f32
    %78 = vector.broadcast %cst_41 : f32 to vector<16x64xf32>
    %79 = tpu.concatenate %77, %78 in 0 : vector<240x64xf32>, vector<16x64xf32> -> vector<256x64xf32>
    %c7 = arith.constant 7 : index
    %c0_42 = arith.constant 0 : index
    %c0_43 = arith.constant 0 : index
    %80 = vector.load %arg4[%c7, %c0_42, %c0_43] : memref<9x64x64xf32, #tpu.memory_space<vmem>>, vector<1x64x64xf32>
    %81 = vector.shape_cast %80 : vector<1x64x64xf32> to vector<64x64xf32>
    %cst_44 = arith.constant dense<0.000000e+00> : vector<256x64xf32>
    %82 = tpu.matmul %79, %81, %cst_44 {dimension_numbers = #tpu.dot_dimension_numbers<[1], [0], [0], [1], [0, 0, 1, 1], [], []>} : vector<256x64xf32>, vector<64x64xf32>, vector<256x64xf32> -> vector<256x64xf32>
    %83 = vector.extract_strided_slice %43 {offsets = [16, 0], sizes = [240, 64], strides = [1, 1]} : vector<256x64xf32> to vector<240x64xf32>
    %cst_45 = arith.constant 0.000000e+00 : f32
    %84 = vector.broadcast %cst_45 : f32 to vector<16x64xf32>
    %85 = tpu.concatenate %83, %84 in 0 : vector<240x64xf32>, vector<16x64xf32> -> vector<256x64xf32>
    %c8 = arith.constant 8 : index
    %c0_46 = arith.constant 0 : index
    %c0_47 = arith.constant 0 : index
    %86 = vector.load %arg4[%c8, %c0_46, %c0_47] : memref<9x64x64xf32, #tpu.memory_space<vmem>>, vector<1x64x64xf32>
    %87 = vector.shape_cast %86 : vector<1x64x64xf32> to vector<64x64xf32>
    %cst_48 = arith.constant dense<0.000000e+00> : vector<256x64xf32>
    %88 = tpu.matmul %85, %87, %cst_48 {dimension_numbers = #tpu.dot_dimension_numbers<[1], [0], [0], [1], [0, 0, 1, 1], [], []>} : vector<256x64xf32>, vector<64x64xf32>, vector<256x64xf32> -> vector<256x64xf32>
    %89 = arith.addf %49, %55 : vector<256x64xf32>
    %90 = arith.addf %61, %64 : vector<256x64xf32>
    %91 = arith.addf %67, %70 : vector<256x64xf32>
    %92 = arith.addf %76, %82 : vector<256x64xf32>
    %93 = arith.addf %89, %90 : vector<256x64xf32>
    %94 = arith.addf %91, %92 : vector<256x64xf32>
    %95 = arith.addf %93, %94 : vector<256x64xf32>
    %96 = arith.addf %95, %88 : vector<256x64xf32>
    %c0_49 = arith.constant 0 : index
    %c0_50 = arith.constant 0 : index
    %97 = vector.load %arg5[%c0_49, %c0_50] : memref<1x64xf32, #tpu.memory_space<vmem>>, vector<1x64xf32>
    %98 = vector.broadcast %97 : vector<1x64xf32> to vector<256x64xf32>
    %99 = arith.addf %96, %98 : vector<256x64xf32>
    %cst_51 = arith.constant 0.000000e+00 : f32
    %100 = vector.broadcast %cst_51 : f32 to vector<256x64xf32>
    %101 = arith.maximumf %99, %100 : vector<256x64xf32>
    %c0_52 = arith.constant 0 : index
    %c0_53 = arith.constant 0 : index
    %102 = vector.load %arg6[%c0_52, %c0_53] : memref<64x128xf32, #tpu.memory_space<vmem>>, vector<64x128xf32>
    %cst_54 = arith.constant dense<0.000000e+00> : vector<256x128xf32>
    %103 = tpu.matmul %101, %102, %cst_54 {dimension_numbers = #tpu.dot_dimension_numbers<[1], [0], [0], [1], [0, 0, 1, 1], [], []>} : vector<256x64xf32>, vector<64x128xf32>, vector<256x128xf32> -> vector<256x128xf32>
    %c0_55 = arith.constant 0 : index
    %c0_56 = arith.constant 0 : index
    %104 = vector.load %arg7[%c0_55, %c0_56] : memref<1x128xf32, #tpu.memory_space<vmem>>, vector<1x128xf32>
    %105 = vector.broadcast %104 : vector<1x128xf32> to vector<256x128xf32>
    %106 = arith.addf %103, %105 : vector<256x128xf32>
    %c0_57 = arith.constant 0 : index
    %c0_58 = arith.constant 0 : index
    %c0_59 = arith.constant 0 : index
    %107 = vector.load %arg1[%c0_57, %c0_58, %c0_59] : memref<1x256x128xf32, #tpu.memory_space<vmem>>, vector<1x256x128xf32>
    %108 = vector.shape_cast %107 : vector<1x256x128xf32> to vector<256x128xf32>
    %109 = arith.addf %106, %108 : vector<256x128xf32>
    %c0_60 = arith.constant 0 : index
    %c0_61 = arith.constant 0 : index
    %c0_62 = arith.constant 0 : index
    %110 = vector.load %arg8[%c0_60, %c0_61, %c0_62] : memref<1x256x128xf32, #tpu.memory_space<vmem>>, vector<1x256x128xf32>
    %111 = vector.shape_cast %110 : vector<1x256x128xf32> to vector<256x128xf32>
    %112 = vector.shape_cast %109 : vector<256x128xf32> to vector<1x256x128xf32>
    tpu.vector_store %arg8[%c0_60, %c0_61, %c0_62], %112 {strides = array<i32>} : memref<1x256x128xf32, #tpu.memory_space<vmem>>, vector<1x256x128xf32>,
    return
  }
  func.func @transform_0(%arg0: i32) -> (i32, i32, i32) {
    %c0_i32 = arith.constant 0 : i32
    %c0_i32_0 = arith.constant 0 : i32
    %c0_i32_1 = arith.constant 0 : i32
    return %arg0, %c0_i32, %c0_i32_0 : i32, i32, i32
  }
  func.func @transform_1(%arg0: i32) -> (i32, i32) {
    %c0_i32 = arith.constant 0 : i32
    %c0_i32_0 = arith.constant 0 : i32
    %c0_i32_1 = arith.constant 0 : i32
    return %c0_i32, %c0_i32_0 : i32, i32
  }
  func.func @transform_2(%arg0: i32) -> (i32, i32) {
    %c0_i32 = arith.constant 0 : i32
    %c0_i32_0 = arith.constant 0 : i32
    %c0_i32_1 = arith.constant 0 : i32
    return %c0_i32, %c0_i32_0 : i32, i32
  }
  func.func @transform_3(%arg0: i32) -> (i32, i32, i32) {
    %c0_i32 = arith.constant 0 : i32
    %c0_i32_0 = arith.constant 0 : i32
    %c0_i32_1 = arith.constant 0 : i32
    %c0_i32_2 = arith.constant 0 : i32
    return %c0_i32, %c0_i32_0, %c0_i32_1 : i32, i32, i32
  }
  func.func @transform_4(%arg0: i32) -> (i32, i32) {
    %c0_i32 = arith.constant 0 : i32
    %c0_i32_0 = arith.constant 0 : i32
    %c0_i32_1 = arith.constant 0 : i32
    return %c0_i32, %c0_i32_0 : i32, i32
  }
  func.func @transform_5(%arg0: i32) -> (i32, i32) {
    %c0_i32 = arith.constant 0 : i32
    %c0_i32_0 = arith.constant 0 : i32
    %c0_i32_1 = arith.constant 0 : i32
    return %c0_i32, %c0_i32_0 : i32, i32
  }
  func.func @transform_6(%arg0: i32) -> (i32, i32) {
    %c0_i32 = arith.constant 0 : i32
    %c0_i32_0 = arith.constant 0 : i32
    %c0_i32_1 = arith.constant 0 : i32
    return %c0_i32, %c0_i32_0 : i32, i32
  }
  func.func @transform_7(%arg0: i32) -> (i32, i32, i32) {
    %c0_i32 = arith.constant 0 : i32
    %c0_i32_0 = arith.constant 0 : i32
    %c0_i32_1 = arith.constant 0 : i32
    return %arg0, %c0_i32, %c0_i32_0 : i32, i32, i32
  }
}

</mosaic_0001>

<bundles_post_ra>
// kernel: res_block_fwd.1
= control target key start
LH: loop header
LB: loop body
LE: loop exit
PB: predicated region body
PF: predicated region fallthrough
CT: control target
= control target key end

     0   :  { %s6043_s0 = inlined_call_operand.hbm [shape: f32[2,256,128], index: 0, kind: input, shape index: {}]   ;;  %s6044_s1 = inlined_call_operand.vmem [shape: f32[128,64], index: 1, kind: input, shape index: {}]   ;;  %s6045_s2 = inlined_call_operand.vmem [shape: f32[1,64], index: 2, kind: input, shape index: {}]   ;;  %s6046_s3 = inlined_call_operand.hbm [shape: f32[9,64,64], index: 3, kind: input, shape index: {}]   ;;  %s6047_s4 = inlined_call_operand.vmem [shape: f32[1,64], index: 4, kind: input, shape index: {}]   ;;  %s6048_s5 = inlined_call_operand.vmem [shape: f32[64,128], index: 5, kind: input, shape index: {}]   ;;  %s6049_s6 = inlined_call_operand.vmem [shape: f32[1,128], index: 6, kind: input, shape index: {}]   ;;  %s6050_s7 = inlined_call_operand.hbm [shape: f32[2,256,128], index: 7, kind: output, shape index: {}]  }
   0x1   :  { %6138 = sst [smem:[#allocation175_spill]] %s6046_s3 }
   0x2   :  { %12 = vsyncpa [#allocation3], 0 }
   0x3   :  { %14 = vsyncpa [#allocation3 + $0x1], 0 }
   0x4   :  { %15 = vsyncpa [#allocation6], 0 }
   0x5   :  { %16 = vsyncpa [#allocation4], 0 }
   0x6   :  { %18 = vsyncpa [#allocation4 + $0x1], 0  ;;  %s3976_s24 = smov 0   ;;  %s3978_s25 = smov 0  }
   0x7   :  { %s3980_s26 = smov 0   ;;  %s3982_s27 = smov 0  }
   0x8 LB: > { %s3997_s28 = sadd.s32 4294967295, %s3928_s27   ;;  %s3349_s29 = sadd.s32 4294967294, %s3928_s27   ;;  %s3928_s27 = sphi %s3982_s27, %s6546_s27   ;;  %s3924_s26 = sphi %s3980_s26, %s6545_s26   ;;  %s3920_s25 = sphi %s3978_s25, %s6544_s25   ;;  %s3916_s24 = sphi %s3976_s24, %s6543_s24  }
   0x9   : > { %p44_p0 = scmp.ne.s32.totalorder %s3920_s25, %s3916_s24  ;;  %p45_p1 = scmp.eq.s32.totalorder %s3997_s28, 0 }
   0xa   : > { %p194_p2 = scmp.eq.s32.totalorder %s3997_s28, 1  ;;  %p200_p3 = scmp.eq.s32.totalorder %s3349_s29, 1 }
   0xb   : > { %p4006_p4 = por %p45_p1, %p44_p0  ;;  %p3350_p5 = scmp.ge.s32.totalorder %s3928_s27, 1 }
   0xc   : > { %p4011_p6 = por %p200_p3, %p44_p0  ;;  %p207_p7 = scmp.lt.s32.totalorder %s3928_s27, 3 }
   0xd   : > { %s6141_s3 = sld [smem:[#allocation175_spill]]  ;;  %s3930_s13 = smov [#allocation5]  }
   0xe   : > { %p4019_p8 = pnand %p3350_p5, %p207_p7  ;;  %s226_s14 = sshll.u32 %s3930_s13, 4  ;;  %s227_s14 = int_to_ptr.vmem [resolvable:$true] %s226_s14 }
   0xf   : > { %s4029_s15 = sadd.s32 1, %s3928_s27   ;;  %s6051_s16 = smov 128  }
  0x10   : > { %p3707_p9 = pneg %p4019_p8  ;;  %s6052_s17 = smov 8  }
  0x11   : > { %s28_s18 = ssub.s32 %s3928_s27, %s4029_s15  ;;  %s31_s19 = sadd.s32 1, %s3924_s26 }
  0x12   : > { %p3708_p10 = pnand %p3707_p9, %p45_p1  ;;  %p29_p12 = scmp.eq.s32.totalorder %s28_s18, 0 }
  0x13   : > { %s224_s11 = sshll.u32 %s6141_s3, 4  ;;  %p38_p13 = scmp.ne.s32.totalorder %s3924_s26, %s3920_s25  ;;  %s225_s11 = int_to_ptr.hbm [resolvable:$true] %s224_s11 }
  0x14   : > { %3710 = dma.hbm_to_vmem [thread:$0]  (!%p3708_p10), %s225_s11, 9216, %s227_s14, [#allocation6], %s6051_s16, %s6051_s16, %s6052_s17  }
  0x15   : > { %p39_p0 = scmp.eq.s32.totalorder %s3928_s27, 0  ;;  %p4045_p3 = por %p194_p2, %p38_p13 }
  0x16   : > { %s4041_s20 = scalar_select %p29_p12, %s3924_s26, %s31_s19  }
  0x17   : > { %p3720_p5 = scmp.lt.s32.totalorder %s3928_s27, 2  ;;  %s249_s22 = sand.u32 1, %s3924_s26  }
  0x18   : > { %s3673_s23 = sshll.u32 %s3928_s27, 8  ;;  %p40_p7 = por %p39_p0, %p38_p13 }
  0x19   : > { %s3353_s29 = sshll.u32 %s249_s22, 8  ;;  %s258_s11 = scalar_lea.hbm %s6043_s0, %s3673_s23 }
  0x1a   : > { %s259_s13 = sshll.u32 %s258_s11, 4  ;;  %s253_s14 = scalar_lea.vmem [#allocation2], %s3353_s29  ;;  %s260_s13 = int_to_ptr.hbm [resolvable:$true] %s259_s13 }
  0x1b   : > { %s261_s18 = sshll.u32 %s253_s14, 4  ;;  %p4055_p9 = pnand %p3720_p5, %p40_p7  ;;  %s262_s18 = int_to_ptr.vmem [resolvable:$true] %s261_s18 }
  0x1c   : > { %s250_s16 = scalar_lea.sflag [#allocation3], %s249_s22  ;;  %s3828_s17 = sshra.s32 %s260_s13, 4  ;;  %s3829_s17 = int_to_ptr.hbm [resolvable:$true] %s3828_s17 }
  0x1d   : > { %s3830_s3 = scalar_lea.hbm %s3829_s17, 256  ;;  %p3832_p10 = pneg %p4055_p9 }
  0x1e   : > { %p3831_p2 = scmp.ne.s32.totalorder %s3829_s17, %s3830_s3  ;;  %s3835_s29 = scalar_lea.hbm %s6043_s0, 512 }
  0x1f   : > { %p3836_p0 = scmp.lt.s32.totalorder %s3829_s17, %s6043_s0  ;;  %p3837_p5 = scmp.lt.s32.totalorder %s3835_s29, %s3830_s3 }
  0x20   : > { %p3833_p12 = pnand %p3832_p10, %p3831_p2 }
  0x21   : > { %p3838_p7 = por %p3837_p5, %p3836_p0 }
  0x22   : > { %p3834_p13 = pneg %p3833_p12 }
  0x24   : > { %p3839_p11 = pnand %p3838_p7, %p3834_p13 }
  0x26   : > { %3842 = shalt.err (!%p3839_p11)
}
  0x27   : > { %s6145_s22 = smov 8   ;;  %s6146_s14 = smov 128  }
  0x28   : > { %3714 = dma.hbm_to_vmem [thread:$0]  (!%p4055_p9), %s260_s13, 4096, %s262_s18, %s250_s16, %s6146_s14, %s6146_s14, %s6145_s22  }
  0x29   : > { %273 = sbr.rel (%p4019_p8) target bundleno = 1262 (0x4ee), region = 48 }
  0x2e   : > { %s4075_s23 = sand.u32 1, %s3920_s25  }
  0x2f   : > { %s3357_s3 = sshll.u32 %s4075_s23, 8  ;;  %s276_s17 = scalar_lea.sflag [#allocation3], %s4075_s23 }
  0x30   : > { %s4081_s9 = scalar_lea.vmem [#allocation2], %s3357_s3 }
  0x31   : > { %3903 = dma.done.wait (%p4006_p4), %s276_s17, 4096  }
  0x32   : > { %3905 = vsyncadd (%p4006_p4), %s276_s17, 4294963200 }
  0x33   : > { %3907 = dma.done.wait (%p45_p1), [#allocation6], 9216  }
  0x34   : > { %3909 = vsyncadd (%p45_p1), [#allocation6], 4294958080  ;;  %v363_v0 = vld [vmem:[%s6044_s1 + $0x78] sm:$0xff]  ;;  %v362_v1 = vld [vmem:[%s6044_s1 + $0x70] sm:$0xff]  ;;  %vm1429_vm0 = vcmask 523264   ;;  %vm994_vm1 = vcmask 1040384  }
  0x35   : > { %368 = vmatpush.msra.mxu0 %v363_v0  ;;  %v361_v2 = vld [vmem:[%s6044_s1 + $0x68] sm:$0xff]  ;;  %v360_v3 = vld [vmem:[%s6044_s1 + $0x60] sm:$0xff]  ;;  %v359_v4 = vld [vmem:[%s6044_s1 + $0x58] sm:$0xff]  ;;  %vm1219_vm4 = vcmask 1046528   ;;  %s5804_s11 = scalar_lea.vmem [#allocation7], %s3357_s3  ;;  %s3674_s14 = sshll.u32 %s3997_s28, 8 }
  0x36   : > { %v358_v5 = vld [vmem:[%s6044_s1 + $0x50] sm:$0xff]  ;;  %v357_v6 = vld [vmem:[%s6044_s1 + $0x48] sm:$0xff]  ;;  %v356_v7 = vld [vmem:[%s6044_s1 + $0x40] sm:$0xff]  ;;  %s3262_s16 = scalar_lea.hbm %s6050_s7, %s3674_s14  ;;  %s3263_s13 = sshll.u32 %s5804_s11, 4  ;;  %s3264_s13 = int_to_ptr.vmem [resolvable:$true] %s3263_s13 }
  0x37   : > { %369 = vmatpush.msra.mxu0 %v362_v1  ;;  %v355_v8 = vld [vmem:[%s6044_s1 + $0x38] sm:$0xff]  ;;  %v354_v9 = vld [vmem:[%s6044_s1 + $0x30] sm:$0xff]  ;;  %v353_v10 = vld [vmem:[%s6044_s1 + $0x28] sm:$0xff]  ;;  %s3265_s18 = sshll.u32 %s3262_s16, 4  ;;  %s3251_s19 = scalar_lea.sflag [#allocation4], %s4075_s23  ;;  %s3266_s18 = int_to_ptr.hbm [resolvable:$true] %s3265_s18 }
  0x38   : > { %v352_v11 = vld [vmem:[%s6044_s1 + $0x20] sm:$0xff]  ;;  %v351_v12 = vld [vmem:[%s6044_s1 + $0x18] sm:$0xff]  ;;  %v350_v13 = vld [vmem:[%s6044_s1 + $0x10] sm:$0xff]  ;;  %s3872_s28 = sshra.s32 %s3266_s18, 4  ;;  %s3878_s3 = scalar_lea.hbm %s6050_s7, 512  ;;  %s3873_s28 = int_to_ptr.hbm [resolvable:$true] %s3872_s28 }
  0x39   : > { %370 = vmatpush.msra.mxu0 %v361_v2  ;;  %v349_v14 = vld [vmem:[%s6044_s1 + $0x8] sm:$0xff]  ;;  %v348_v15 = vld [vmem:[%s6044_s1] sm:$0xff]  ;;  %v318_v18 = vld [vmem:[%s4081_s9 + $0x10] sm:$0xff]  ;;  %s3874_s29 = scalar_lea.hbm %s3873_s28, 256  ;;  %p3879_p11 = scmp.lt.s32.totalorder %s3873_s28, %s6050_s7 }
  0x3a   : > { %v316_v16 = vld [vmem:[%s4081_s9] sm:$0xff]  ;;  %v317_v17 = vld [vmem:[%s4081_s9 + $0x8] sm:$0xff]  ;;  %v319_v19 = vld [vmem:[%s4081_s9 + $0x18] sm:$0xff]  ;;  %p3875_p1 = scmp.ne.s32.totalorder %s3873_s28, %s3874_s29  ;;  %p3880_p9 = scmp.lt.s32.totalorder %s3878_s3, %s3874_s29 }
  0x3b   : > { %371 = vmatpush.msra.mxu0 %v360_v3  ;;  %v320_v20 = vld [vmem:[%s4081_s9 + $0x20] sm:$0xff]  ;;  %v321_v21 = vld [vmem:[%s4081_s9 + $0x28] sm:$0xff]  ;;  %v322_v22 = vld [vmem:[%s4081_s9 + $0x30] sm:$0xff] }
  0x3c   : > { %v323_v23 = vld [vmem:[%s4081_s9 + $0x38] sm:$0xff]  ;;  %v324_v24 = vld [vmem:[%s4081_s9 + $0x40] sm:$0xff]  ;;  %v325_v25 = vld [vmem:[%s4081_s9 + $0x48] sm:$0xff]  ;;  %p3876_p4 = pnand %p3875_p1, %p4045_p3  ;;  %p3881_p2 = por %p3880_p9, %p3879_p11 }
  0x3d   : > { %372 = vmatpush.msra.mxu0 %v359_v4  ;;  %v326_v26 = vld [vmem:[%s4081_s9 + $0x50] sm:$0xff]  ;;  %v327_v27 = vld [vmem:[%s4081_s9 + $0x58] sm:$0xff]  ;;  %v328_v28 = vld [vmem:[%s4081_s9 + $0x60] sm:$0xff] }
  0x3e   : > { %v329_v29 = vld [vmem:[%s4081_s9 + $0x68] sm:$0xff]  ;;  %v330_v30 = vld [vmem:[%s4081_s9 + $0x70] sm:$0xff]  ;;  %v331_v31 = vld [vmem:[%s4081_s9 + $0x78] sm:$0xff]  ;;  %p3877_p8 = pneg %p3876_p4 }
  0x3f   : > { %373 = vmatpush.msra.mxu0 %v358_v5  ;;  %v1428_v32 = vld [vmem:[#allocation5 + $0x78] sm:$0xff]  ;;  %v1427_v33 = vld [vmem:[#allocation5 + $0x70] sm:$0xff]  ;;  %v332_v35 = vld [vmem:[%s4081_s9 + $0x80] sm:$0xff] }
  0x40   : > { %3675 = vmatpush.msra.mxu1 %v1428_v32  ;;  %v1426_v36 = vld [vmem:[#allocation5 + $0x68] sm:$0xff]  ;;  %v1425_v37 = vld [vmem:[#allocation5 + $0x60] sm:$0xff]  ;;  %v1424_v38 = vld [vmem:[#allocation5 + $0x58] sm:$0xff]  ;;  %p3882_p10 = pnand %p3881_p2, %p3877_p8 }
  0x41   : > { %374 = vmatpush.msra.mxu0 %v357_v6  ;;  %v1423_v39 = vld [vmem:[#allocation5 + $0x50] sm:$0xff]  ;;  %v333_v41 = vld [vmem:[%s4081_s9 + $0x88] sm:$0xff]  ;;  %v1421_v43 = vld [vmem:[#allocation5 + $0x40] sm:$0xff] }
  0x42   : > { %3676 = vmatpush.msra.mxu1 %v1427_v33  ;;  %v1422_v42 = vld [vmem:[#allocation5 + $0x48] sm:$0xff]  ;;  %v334_v45 = vld [vmem:[%s4081_s9 + $0x90] sm:$0xff]  ;;  %v1623_v46 = vld [vmem:[#allocation5 + $0xf8] sm:$0xff] }
  0x43   : > { %375 = vmatpush.msra.mxu0 %v356_v7  ;;  %3683 = vmatpush.msra.mxu2 %v1623_v46  ;;  %v1622_v47 = vld [vmem:[#allocation5 + $0xf0] sm:$0xff]  ;;  %v1621_v48 = vld [vmem:[#allocation5 + $0xe8] sm:$0xff]  ;;  %v1620_v49 = vld [vmem:[#allocation5 + $0xe0] sm:$0xff] }
  0x44   : > { %3677 = vmatpush.msra.mxu1 %v1426_v36  ;;  %v335_v51 = vld [vmem:[%s4081_s9 + $0x98] sm:$0xff]  ;;  %v1618_v54 = vld [vmem:[#allocation5 + $0xd0] sm:$0xff]  ;;  %v1617_v56 = vld [vmem:[#allocation5 + $0xc8] sm:$0xff] }
  0x45   : > { %376 = vmatpush.msra.mxu0 %v355_v8  ;;  %3684 = vmatpush.msra.mxu2 %v1622_v47  ;;  %v1619_v52 = vld [vmem:[#allocation5 + $0xd8] sm:$0xff]  ;;  %v4170_v55 = vld [vmem:[#allocation5 + $0x170] sm:$0xff]  ;;  %v4173_v57 = vld [vmem:[#allocation5 + $0x168] sm:$0xff] }
  0x46   : > { %3678 = vmatpush.msra.mxu1 %v1425_v37  ;;  %v4167_v53 = vld [vmem:[#allocation5 + $0x178] sm:$0xff]  ;;  %v1616_v58 = vld [vmem:[#allocation5 + $0xc0] sm:$0xff]  ;;  %v4185_v0 = vld [vmem:[#allocation5 + $0x150] sm:$0xff] }
  0x47   : > { %377 = vmatpush.msra.mxu0 %v354_v9  ;;  %3685 = vmatpush.msra.mxu2 %v1621_v48  ;;  %v4176_v59 = vld [vmem:[#allocation5 + $0x160] sm:$0xff]  ;;  %v4182_v62 = vld [vmem:[#allocation5 + $0x158] sm:$0xff]  ;;  %v4188_v1 = vld [vmem:[#allocation5 + $0x148] sm:$0xff] }
  0x48   : > { %3679 = vmatpush.msra.mxu1 %v1424_v38  ;;  %3691 = vmatpush.msra.mxu3 %v4167_v53  ;;  %v336_v61 = vld [vmem:[%s4081_s9 + $0xa0] sm:$0xff]  ;;  %v2203_v63 = vld [vmem:[#allocation5 + $0x238] sm:$0xff]  ;;  %v337_v6 = vld [vmem:[%s4081_s9 + $0xa8] sm:$0xff] }
  0x49   : > { %378 = vmatpush.msra.mxu0 %v353_v10  ;;  %3686 = vmatpush.msra.mxu2 %v1620_v49  ;;  %v2077_v2 = vld [vmem:[#allocation5 + $0x1f8] sm:$0xff]  ;;  %v4194_v3 = vld [vmem:[%s6045_s2] ss:$0 sm:$0xff]  ;;  %v338_v10 = vld [vmem:[%s4081_s9 + $0xb0] sm:$0xff] }
  0x4a   : > { %3680 = vmatpush.msra.mxu1 %v1423_v39  ;;  %3692 = vmatpush.msra.mxu3 %v4170_v55  ;;  %v4196_v4 = vld [vmem:[#allocation5 + $0x140] sm:$0xff] }
  0x4b   : > { %379 = vmatpush.msra.mxu0 %v352_v11  ;;  %3687 = vmatpush.msra.mxu2 %v1619_v52 }
  0x4c   : > { %3681 = vmatpush.msra.mxu1 %v1422_v42  ;;  %3693 = vmatpush.msra.mxu3 %v4173_v57 }
  0x4d   : > { %380 = vmatpush.msra.mxu0 %v351_v12  ;;  %3688 = vmatpush.msra.mxu2 %v1618_v54 }
  0x4e   : > { %3682 = vmatpush.msra.mxu1 %v1421_v43  ;;  %3694 = vmatpush.msra.mxu3 %v4176_v59 }
  0x4f   : > { %381 = vmatpush.msra.mxu0 %v350_v13  ;;  %3689 = vmatpush.msra.mxu2 %v1617_v56  ;;  %v513_v13 = vlaneseq }
  0x50   : > { %3695 = vmatpush.msra.mxu3 %v4182_v62  ;;  %2090 = vmatpush.msrb.mxu1 %v2077_v2 }
  0x51   : > { %382 = vmatpush.msra.mxu0 %v349_v14  ;;  %3690 = vmatpush.msra.mxu2 %v1616_v58 }
  0x52   : > { %3696 = vmatpush.msra.mxu3 %v4185_v0 }
  0x53   : > { %383 = vmatpush.msra.mxu0 %v348_v15  ;;  %2212 = vmatpush.msrb.mxu2 %v2203_v63  ;;  %v339_v15 = vld [vmem:[%s4081_s9 + $0xb8] sm:$0xff] }
  0x54   : > { %384 = vmatmul.f32.vlgmr.msra.gmra.mxu0 %v316_v16  ;;  %3697 = vmatpush.msra.mxu3 %v4188_v1 }
  0x55   : > { %1501 = vmatpush.msrb.mxu0 %v1428_v32 }
  0x56   : > { %3698 = vmatpush.msra.mxu3 %v4196_v4 }
  0x57   : > { %1502 = vmatpush.msrb.mxu0 %v1427_v33 }
  0x59   : > { %1503 = vmatpush.msrb.mxu0 %v1426_v36 }
  0x5b   : > { %1504 = vmatpush.msrb.mxu0 %v1425_v37 }
  0x5c   : > { %387 = vmatmul.f32.gmra.mxu0 %v317_v17  ;;  %v4213_v17 = vshrl.u32 %v513_v13, 7 }
  0x5d   : > { %1505 = vmatpush.msrb.mxu0 %v1424_v38 }
  0x5f   : > { %1506 = vmatpush.msrb.mxu0 %v1423_v39 }
  0x61   : > { %1507 = vmatpush.msrb.mxu0 %v1422_v42  ;;  %v341_v42 = vld [vmem:[%s4081_s9 + $0xc8] sm:$0xff] }
  0x63   : > { %1508 = vmatpush.msrb.mxu0 %v1421_v43 }
  0x64   : > { %390 = vmatmul.f32.gmra.mxu0 %v318_v18 }
  0x65   : > { %1728 = vmatpush.msra.mxu0 %v1623_v46 }
  0x67   : > { %1729 = vmatpush.msra.mxu0 %v1622_v47 }
  0x69   : > { %1730 = vmatpush.msra.mxu0 %v1621_v48  ;;  %v524_v48 = vadd.s32 80, %v4213_v17 }
  0x6b   : > { %1731 = vmatpush.msra.mxu0 %v1620_v49  ;;  %v523_v49 = vadd.s32 72, %v4213_v17 }
  0x6c   : > { %393 = vmatmul.f32.gmra.mxu0 %v319_v19  ;;  %v2202_v19 = vld [vmem:[#allocation5 + $0x230] sm:$0xff] }
  0x6d   : > { %1732 = vmatpush.msra.mxu0 %v1619_v52  ;;  %2213 = vmatpush.msrb.mxu2 %v2202_v19  ;;  %v613_v63 = vand.u32 15, %v523_v49 }
  0x6f   : > { %1733 = vmatpush.msra.mxu0 %v1618_v54  ;;  %vm1196_vm6 = vcmp.lt.s32.totalorder %v613_v63, 15 }
  0x71   : > { %1734 = vmatpush.msra.mxu0 %v1617_v56  ;;  %v342_v56 = vld [vmem:[%s4081_s9 + $0xd0] sm:$0xff] }
  0x73   : > { %1735 = vmatpush.msra.mxu0 %v1616_v58 }
  0x74   : > { %396 = vmatmul.f32.gmra.mxu0 %v320_v20  ;;  %v522_v20 = vadd.s32 64, %v4213_v17 }
  0x7c   : > { %399 = vmatmul.f32.gmra.mxu0 %v321_v21 }
  0x84   : > { %402 = vmatmul.f32.gmra.mxu0 %v322_v22 }
  0x8c   : > { %405 = vmatmul.f32.gmra.mxu0 %v323_v23  ;;  %v521_v23 = vadd.s32 56, %v4213_v17 }
  0x94   : > { %408 = vmatmul.f32.gmra.mxu0 %v324_v24 }
  0x9c   : > { %411 = vmatmul.f32.gmra.mxu0 %v325_v25 }
  0xa4   : > { %414 = vmatmul.f32.gmra.mxu0 %v326_v26  ;;  %v340_v26 = vld [vmem:[%s4081_s9 + $0xc0] sm:$0xff] }
  0xac   : > { %417 = vmatmul.f32.gmra.mxu0 %v327_v27  ;;  %v606_v27 = vand.u32 15, %v522_v20  ;;  %v2075_v20 = vld [vmem:[#allocation5 + $0x1e8] sm:$0xff] }
  0xae   : > { %vm938_vm2 = vcmp.gt.s32.totalorder %v606_v27, 0 }
  0xb4   : > { %420 = vmatmul.f32.gmra.mxu0 %v328_v28 }
  0xbc   : > { %423 = vmatmul.f32.gmra.mxu0 %v329_v29  ;;  %v599_v29 = vand.u32 15, %v521_v23 }
  0xbe   : > { %vm1194_vm3 = vcmp.lt.s32.totalorder %v599_v29, 15 }
  0xc4   : > { %426 = vmatmul.f32.gmra.mxu0 %v330_v30 }
  0xcc   : > { %429 = vmatmul.f32.gmra.mxu0 %v331_v31  ;;  %v2076_v31 = vld [vmem:[#allocation5 + $0x1f0] sm:$0xff] }
  0xcd   : > { %2091 = vmatpush.msrb.mxu1 %v2076_v31  ;;  %v344_v31 = vld [vmem:[%s4081_s9 + $0xe0] sm:$0xff] }
  0xcf   : > { %2092 = vmatpush.msrb.mxu1 %v2075_v20 }
  0xd1   : > { %v4155_v34 = vpop.f32.mrf.mxu0 }
  0xd4   : > { %432 = vmatmul.f32.gmra.mxu0 %v332_v35 }
  0xd9   : > { %v4158_v40 = vpop.f32.mrf.mxu0 }
  0xdc   : > { %435 = vmatmul.f32.gmra.mxu0 %v333_v41 }
  0xe1   : > { %v4161_v44 = vpop.f32.mrf.mxu0 }
  0xe4   : > { %438 = vmatmul.f32.gmra.mxu0 %v334_v45 }
  0xe9   : > { %v4164_v50 = vpop.f32.mrf.mxu0 }
  0xec   : > { %441 = vmatmul.f32.gmra.mxu0 %v335_v51 }
  0xf1   : > { %v4178_v60 = vpop.f32.mrf.mxu0 }
  0xf4   : > { %444 = vmatmul.f32.gmra.mxu0 %v336_v61  ;;  %v620_v61 = vand.u32 15, %v524_v48 }
  0xf6   : > { %vm940_vm5 = vcmp.gt.s32.totalorder %v620_v61, 0  ;;  %v2200_v61 = vld [vmem:[#allocation5 + $0x220] sm:$0xff] }
  0xf9   : > { %v400_v5 = vpop.f32.mrf.mxu0 }
  0xfa   : > { %v401_v7 = vadd.f32 %v4194_v3, %v400_v5  ;;  %v2201_v5 = vld [vmem:[#allocation5 + $0x228] sm:$0xff] }
  0xfb   : > { %2214 = vmatpush.msrb.mxu2 %v2201_v5 }
  0xfc   : > { %v4201_v8 = vmax.f32 %v401_v7, 0.0  ;;  %447 = vmatmul.f32.gmra.mxu0 %v337_v6 }
  0xfd   : > { %2215 = vmatpush.msrb.mxu2 %v2200_v61  ;;  %v529_v61 = vadd.s32 120, %v4213_v17 }
  0xfe   : > { %3365 = vmatmul.msk.f32.vlgmr.msra.gmra.mxu1 %vm1429_vm0, %v4201_v8 }
 0x101   : > { %v403_v9 = vpop.f32.mrf.mxu0 }
 0x102   : > { %v404_v11 = vadd.f32 %v4194_v3, %v403_v9 }
 0x104   : > { %v4207_v12 = vmax.f32 %v404_v11, 0.0  ;;  %450 = vmatmul.f32.gmra.mxu0 %v338_v10 }
 0x106   : > { %3366 = vmatmul.msk.f32.gmra.mxu1 %vm1429_vm0, %v4207_v12  ;;  %v6056_v21 = vrot.slane %v4207_v12, 7 }
 0x109   : > { %v406_v14 = vpop.f32.mrf.mxu0 }
 0x10a   : > { %v407_v16 = vadd.f32 %v4194_v3, %v406_v14 }
 0x10c   : > { %v4215_v18 = vmax.f32 %v407_v16, 0.0  ;;  %453 = vmatmul.f32.gmra.mxu0 %v339_v15  ;;  %v343_v15 = vld [vmem:[%s4081_s9 + $0xd8] sm:$0xff] }
 0x10e   : > { %3367 = vmatmul.msk.f32.gmra.mxu1 %vm1429_vm0, %v4215_v18  ;;  %v1008_v22 = vrot.slane %v4215_v18, 7  ;;  %v6053_v33 = vrot.slane %v4215_v18, 1 }
 0x110   : > { %v4226_v24 = vsel %vm994_vm1, %v6056_v21, %v1008_v22 }
 0x111   : > { %v409_v25 = vpop.f32.mrf.mxu0  ;;  %3397 = vmatmul.msk.f32.vlgmr.msra.gmra.mxu2 %vm1429_vm0, %v4226_v24 }
 0x112   : > { %v410_v28 = vadd.f32 %v4194_v3, %v409_v25  ;;  %v526_v25 = vadd.s32 96, %v4213_v17 }
 0x114   : > { %v4232_v30 = vmax.f32 %v410_v28, 0.0  ;;  %456 = vmatmul.f32.gmra.mxu0 %v340_v26  ;;  %v525_v26 = vadd.s32 88, %v4213_v17 }
 0x116   : > { %3368 = vmatmul.msk.f32.gmra.mxu1 %vm1429_vm0, %v4232_v30  ;;  %v1010_v32 = vrot.slane %v4232_v30, 7  ;;  %v1235_v35 = vrot.slane %v4232_v30, 1 }
 0x118   : > { %v1011_v36 = vsel %vm994_vm1, %v1008_v22, %v1010_v32  ;;  %v1236_v37 = vsel %vm1219_vm4, %v6053_v33, %v1235_v35 }
 0x119   : > { %v412_v38 = vpop.f32.mrf.mxu0  ;;  %v4243_v39 = vsel %vm938_vm2, %v1011_v36, 0.0  ;;  %v4245_v41 = vsel %vm1194_vm3, %v1236_v37, 0.0  ;;  %v627_v36 = vand.u32 15, %v525_v26 }
 0x11a   : > { %v413_v43 = vadd.f32 %v4194_v3, %v412_v38  ;;  %3398 = vmatmul.msk.f32.gmra.mxu2 %vm1429_vm0, %v4243_v39  ;;  %3429 = vmatmul.msk.f32.vlgmr.msra.gmra.mxu3 %vm1429_vm0, %v4245_v41 }
 0x11b   : > { %vm1198_vm8 = vcmp.lt.s32.totalorder %v627_v36, 15 }
 0x11c   : > { %v4253_v45 = vmax.f32 %v413_v43, 0.0  ;;  %459 = vmatmul.f32.gmra.mxu0 %v341_v42 }
 0x11e   : > { %3369 = vmatmul.msk.f32.gmra.mxu1 %vm1429_vm0, %v4253_v45  ;;  %v1012_v46 = vrot.slane %v4253_v45, 7  ;;  %v1237_v47 = vrot.slane %v4253_v45, 1 }
 0x120   : > { %v4262_v51 = vsel %vm994_vm1, %v1010_v32, %v1012_v46  ;;  %v4265_v52 = vsel %vm1219_vm4, %v1235_v35, %v1237_v47  ;;  %v634_v35 = vand.u32 15, %v526_v25  ;;  %v2074_v25 = vld [vmem:[#allocation5 + $0x1e0] sm:$0xff] }
 0x121   : > { %v415_v54 = vpop.f32.mrf.mxu0  ;;  %2093 = vmatpush.msrb.mxu1 %v2074_v25 }
 0x122   : > { %v416_v58 = vadd.f32 %v4194_v3, %v415_v54  ;;  %3399 = vmatmul.msk.f32.gmra.mxu2 %vm1429_vm0, %v4262_v51  ;;  %3430 = vmatmul.msk.f32.gmra.mxu3 %vm1429_vm0, %v4265_v52  ;;  %vm942_vm7 = vcmp.gt.s32.totalorder %v634_v35, 0  ;;  %v345_v54 = vld [vmem:[%s4081_s9 + $0xe8] sm:$0xff] }
 0x124   : > { %v4273_v2 = vmax.f32 %v416_v58, 0.0  ;;  %462 = vmatmul.f32.gmra.mxu0 %v342_v56 }
 0x126   : > { %3370 = vmatmul.msk.f32.gmra.mxu1 %vm1429_vm0, %v4273_v2  ;;  %v1014_v6 = vrot.slane %v4273_v2, 7  ;;  %v1239_v7 = vrot.slane %v4273_v2, 1 }
 0x128   : > { %v1015_v9 = vsel %vm994_vm1, %v1012_v46, %v1014_v6  ;;  %v1240_v10 = vsel %vm1219_vm4, %v1237_v47, %v1239_v7 }
 0x129   : > { %v418_v11 = vpop.f32.mrf.mxu0  ;;  %v4281_v13 = vsel %vm940_vm5, %v1015_v9, 0.0  ;;  %v4283_v14 = vsel %vm1196_vm6, %v1240_v10, 0.0 }
 0x12a   : > { %v419_v16 = vadd.f32 %v4194_v3, %v418_v11  ;;  %3400 = vmatmul.msk.f32.gmra.mxu2 %vm1429_vm0, %v4281_v13  ;;  %3431 = vmatmul.msk.f32.gmra.mxu3 %vm1429_vm0, %v4283_v14 }
 0x12c   : > { %v4291_v19 = vmax.f32 %v419_v16, 0.0  ;;  %465 = vmatmul.f32.gmra.mxu0 %v343_v15  ;;  %v346_v15 = vld [vmem:[%s4081_s9 + $0xf0] sm:$0xff] }
 0x12e   : > { %3371 = vmatmul.msk.f32.gmra.mxu1 %vm1429_vm0, %v4291_v19  ;;  %v1016_v22 = vrot.slane %v4291_v19, 7  ;;  %v1241_v23 = vrot.slane %v4291_v19, 1 }
 0x130   : > { %v4300_v27 = vsel %vm994_vm1, %v1014_v6, %v1016_v22  ;;  %v4303_v28 = vsel %vm1219_vm4, %v1239_v7, %v1241_v23  ;;  %v528_v6 = vadd.s32 112, %v4213_v17  ;;  %v527_v7 = vadd.s32 104, %v4213_v17 }
 0x131   : > { %v421_v29 = vpop.f32.mrf.mxu0 }
 0x132   : > { %v422_v32 = vadd.f32 %v4194_v3, %v421_v29  ;;  %3401 = vmatmul.msk.f32.gmra.mxu2 %vm1429_vm0, %v4300_v27  ;;  %3432 = vmatmul.msk.f32.gmra.mxu3 %vm1429_vm0, %v4303_v28  ;;  %v648_v20 = vand.u32 15, %v528_v6 }
 0x134   : > { %v4311_v37 = vmax.f32 %v422_v32, 0.0  ;;  %468 = vmatmul.f32.gmra.mxu0 %v344_v31  ;;  %vm944_vm9 = vcmp.gt.s32.totalorder %v648_v20, 0  ;;  %v6054_v20 = vmov 0.0  }
 0x136   : > { %3372 = vmatmul.msk.f32.gmra.mxu1 %vm1429_vm0, %v4311_v37  ;;  %v1018_v38 = vrot.slane %v4311_v37, 7  ;;  %v1243_v42 = vrot.slane %v4311_v37, 1 }
 0x138   : > { %v1019_v43 = vsel %vm994_vm1, %v1016_v22, %v1018_v38  ;;  %v1244_v46 = vsel %vm1219_vm4, %v1241_v23, %v1243_v42  ;;  %v641_v22 = vand.u32 15, %v527_v7 }
 0x139   : > { %v424_v47 = vpop.f32.mrf.mxu0  ;;  %v4319_v48 = vsel %vm942_vm7, %v1019_v43, 0.0  ;;  %v4321_v49 = vsel %vm1198_vm8, %v1244_v46, 0.0 }
 0x13a   : > { %v425_v56 = vadd.f32 %v4194_v3, %v424_v47  ;;  %3402 = vmatmul.msk.f32.gmra.mxu2 %vm1429_vm0, %v4319_v48  ;;  %3433 = vmatmul.msk.f32.gmra.mxu3 %vm1429_vm0, %v4321_v49  ;;  %vm1200_vm10 = vcmp.lt.s32.totalorder %v641_v22, 15 }
 0x13c   : > { %v4329_v58 = vmax.f32 %v425_v56, 0.0  ;;  %471 = vmatmul.f32.gmra.mxu0 %v345_v54  ;;  %v530_v56 = vadd.s32 128, %v4213_v17 }
 0x13e   : > { %3373 = vmatmul.msk.f32.gmra.mxu1 %vm1429_vm0, %v4329_v58  ;;  %v1020_v63 = vrot.slane %v4329_v58, 7  ;;  %v1245_v5 = vrot.slane %v4329_v58, 1 }
 0x140   : > { %v4338_v9 = vsel %vm994_vm1, %v1018_v38, %v1020_v63  ;;  %v4341_v10 = vsel %vm1219_vm4, %v1243_v42, %v1245_v5  ;;  %v347_v42 = vld [vmem:[%s4081_s9 + $0xf8] sm:$0xff] }
 0x141   : > { %6147 = vst [vmem:[#allocation11_spill] sm:$0xff] %v4338_v9  ;;  %v427_v11 = vpop.f32.mrf.mxu0 }
 0x142   : > { %v428_v16 = vadd.f32 %v4194_v3, %v427_v11  ;;  %3403 = vmatmul.msk.f32.gmra.mxu2 %vm1429_vm0, %v4338_v9  ;;  %3434 = vmatmul.msk.f32.gmra.mxu3 %vm1429_vm0, %v4341_v10  ;;  %v662_v11 = vand.u32 15, %v530_v56  ;;  %v531_v56 = vadd.s32 136, %v4213_v17 }
 0x144   : > { %v4349_v23 = vmax.f32 %v428_v16, 0.0  ;;  %474 = vmatmul.f32.gmra.mxu0 %v346_v15  ;;  %v655_v15 = vand.u32 15, %v529_v61  ;;  %vm946_vm11 = vcmp.gt.s32.totalorder %v662_v11, 0  ;;  %v669_v11 = vand.u32 15, %v531_v56 }
 0x145   : > { %v533_v56 = vadd.s32 152, %v4213_v17 }
 0x146   : > { %3374 = vmatmul.msk.f32.gmra.mxu1 %vm1429_vm0, %v4349_v23  ;;  %v1022_v26 = vrot.slane %v4349_v23, 7  ;;  %v1247_v29 = vrot.slane %v4349_v23, 1  ;;  %vm1202_vm12 = vcmp.lt.s32.totalorder %v655_v15, 15  ;;  %vm1204_vm14 = vcmp.lt.s32.totalorder %v669_v11, 15 }
 0x148   : > { %v1023_v31 = vsel %vm994_vm1, %v1020_v63, %v1022_v26  ;;  %v1248_v32 = vsel %vm1219_vm4, %v1245_v5, %v1247_v29 }
 0x149   : > { %v430_v35 = vpop.f32.mrf.mxu0  ;;  %v4357_v36 = vsel %vm944_vm9, %v1023_v31, 0.0  ;;  %v4359_v38 = vsel %vm1200_vm10, %v1248_v32, 0.0 }
 0x14a   : > { %6148 = vst [vmem:[#allocation12_spill] sm:$0xff] %v4357_v36  ;;  %v431_v43 = vadd.f32 %v4194_v3, %v430_v35  ;;  %3404 = vmatmul.msk.f32.gmra.mxu2 %vm1429_vm0, %v4357_v36  ;;  %3435 = vmatmul.msk.f32.gmra.mxu3 %vm1429_vm0, %v4359_v38 }
 0x14c   : > { %v4367_v46 = vmax.f32 %v431_v43, 0.0  ;;  %477 = vmatmul.f32.gmra.mxu0 %v347_v42  ;;  %v2073_v43 = vld [vmem:[#allocation5 + $0x1d8] sm:$0xff] }
 0x14d   : > { %2094 = vmatpush.msrb.mxu1 %v2073_v43 }
 0x14e   : > { %3375 = vmatmul.msk.f32.gmra.mxu1 %vm1429_vm0, %v4367_v46  ;;  %v1024_v47 = vrot.slane %v4367_v46, 7  ;;  %v1249_v54 = vrot.slane %v4367_v46, 1 }
 0x150   : > { %v4376_v63 = vsel %vm994_vm1, %v1022_v26, %v1024_v47  ;;  %v4379_v5 = vsel %vm1219_vm4, %v1247_v29, %v1249_v54  ;;  %v2199_v26 = vld [vmem:[#allocation5 + $0x218] sm:$0xff] }
 0x151   : > { %6149 = vst [vmem:[#allocation13_spill] sm:$0xff] %v4376_v63  ;;  %v433_v6 = vpop.f32.mrf.mxu0  ;;  %2216 = vmatpush.msrb.mxu2 %v2199_v26 }
 0x152   : > { %v434_v7 = vadd.f32 %v4194_v3, %v433_v6  ;;  %3405 = vmatmul.msk.f32.gmra.mxu2 %vm1429_vm0, %v4376_v63  ;;  %3436 = vmatmul.msk.f32.gmra.mxu3 %vm1429_vm0, %v4379_v5 }
 0x154   : > { %v4386_v16 = vmax.f32 %v434_v7, 0.0  ;;  %1509 = vmatmul.f32.vlgmr.msrb.gmra.mxu0 %v6054_v20 }
 0x155   : > { %1955 = vmatpush.msrb.mxu0 %v4167_v53 }
 0x156   : > { %3376 = vmatmul.msk.f32.gmra.mxu1 %vm1429_vm0, %v4386_v16  ;;  %v1026_v22 = vrot.slane %v4386_v16, 7  ;;  %v1251_v25 = vrot.slane %v4386_v16, 1 }
 0x157   : > { %1956 = vmatpush.msrb.mxu0 %v4170_v55 }
 0x158   : > { %v1027_v29 = vsel %vm994_vm1, %v1024_v47, %v1026_v22  ;;  %v1252_v31 = vsel %vm1219_vm4, %v1249_v54, %v1251_v25  ;;  %v386_v47 = vadd.f32 %v4194_v3, %v4155_v34 }
 0x159   : > { %v436_v32 = vpop.f32.mrf.mxu0  ;;  %v4397_v35 = vsel %vm946_vm11, %v1027_v29, 0.0  ;;  %v4399_v53 = vsel %vm1202_vm12, %v1252_v31, 0.0  ;;  %1957 = vmatpush.msrb.mxu0 %v4173_v57 }
 0x15a   : > { %6150 = vst [vmem:[#allocation14_spill] sm:$0xff] %v4397_v35  ;;  %v437_v42 = vadd.f32 %v4194_v3, %v436_v32  ;;  %3406 = vmatmul.msk.f32.gmra.mxu2 %vm1429_vm0, %v4397_v35  ;;  %3437 = vmatmul.msk.f32.gmra.mxu3 %vm1429_vm0, %v4399_v53  ;;  %v4428_v6 = vmax.f32 %v386_v47, 0.0  ;;  %v392_v47 = vadd.f32 %v4194_v3, %v4161_v44 }
 0x15b   : > { %1958 = vmatpush.msrb.mxu0 %v4176_v59  ;;  %v532_v59 = vadd.s32 144, %v4213_v17 }
 0x15c   : > { %v4408_v55 = vmax.f32 %v437_v42, 0.0  ;;  %1512 = vmatmul.f32.gmra.mxu0 %v6054_v20  ;;  %v4477_v11 = vmax.f32 %v392_v47, 0.0 }
 0x15d   : > { %1959 = vmatpush.msrb.mxu0 %v4182_v62 }
 0x15e   : > { %3377 = vmatmul.msk.f32.gmra.mxu1 %vm1429_vm0, %v4408_v55  ;;  %v1028_v57 = vrot.slane %v4408_v55, 7  ;;  %v1253_v54 = vrot.slane %v4408_v55, 1  ;;  %6156 = vst [vmem:[#allocation20_spill] sm:$0xff] %v4477_v11 }
 0x15f   : > { %1960 = vmatpush.msrb.mxu0 %v4185_v0  ;;  %v676_v0 = vand.u32 15, %v532_v59  ;;  %v534_v59 = vadd.s32 160, %v4213_v17 }
 0x160   : > { %v4422_v61 = vsel %vm994_vm1, %v1026_v22, %v1028_v57  ;;  %v4425_v34 = vsel %vm1219_vm4, %v1251_v25, %v1253_v54 }
 0x161   : > { %6151 = vst [vmem:[#allocation15_spill] sm:$0xff] %v4422_v61  ;;  %v439_v62 = vpop.f32.mrf.mxu0  ;;  %1961 = vmatpush.msrb.mxu0 %v4188_v1  ;;  %v389_v1 = vadd.f32 %v4194_v3, %v4158_v40  ;;  %vm948_vm13 = vcmp.gt.s32.totalorder %v676_v0, 0 }
 0x162   : > { %v440_v7 = vadd.f32 %v4194_v3, %v439_v62  ;;  %3407 = vmatmul.msk.f32.gmra.mxu2 %vm1429_vm0, %v4422_v61  ;;  %3438 = vmatmul.msk.f32.gmra.mxu3 %vm1429_vm0, %v4425_v34  ;;  %v2198_v62 = vld [vmem:[#allocation5 + $0x210] sm:$0xff] }
 0x163   : > { %1962 = vmatpush.msrb.mxu0 %v4196_v4  ;;  %v4452_v42 = vmax.f32 %v389_v1, 0.0  ;;  %2217 = vmatpush.msrb.mxu2 %v2198_v62 }
 0x164   : > { %v4436_v15 = vmax.f32 %v440_v7, 0.0  ;;  %3360 = vmatmul.msk.f32.gmra.mxu0 %vm1429_vm0, %v4428_v6 }
 0x165   : > { %6153 = vst [vmem:[#allocation17_spill] sm:$0xff] %v4452_v42 }
 0x166   : > { %3378 = vmatmul.msk.f32.gmra.mxu1 %vm1429_vm0, %v4436_v15  ;;  %v1030_v22 = vrot.slane %v4436_v15, 7  ;;  %v1255_v25 = vrot.slane %v4436_v15, 1 }
 0x168   : > { %v1031_v26 = vsel %vm994_vm1, %v1028_v57, %v1030_v22  ;;  %v1256_v4 = vsel %vm1219_vm4, %v1253_v54, %v1255_v25 }
 0x169   : > { %v442_v29 = vpop.f32.mrf.mxu0  ;;  %v4448_v31 = vsel %vm948_vm13, %v1031_v26, 0.0  ;;  %v4450_v32 = vsel %vm1204_vm14, %v1256_v4, 0.0  ;;  %v690_v26 = vand.u32 15, %v534_v59  ;;  %v683_v4 = vand.u32 15, %v533_v56 }
 0x16a   : > { %6152 = vst [vmem:[#allocation16_spill] sm:$0xff] %v4448_v31  ;;  %v443_v40 = vadd.f32 %v4194_v3, %v442_v29  ;;  %3408 = vmatmul.msk.f32.gmra.mxu2 %vm1429_vm0, %v4448_v31  ;;  %3439 = vmatmul.msk.f32.gmra.mxu3 %vm1429_vm0, %v4450_v32 }
 0x16b   : > { %vm950_vm15 = vcmp.gt.s32.totalorder %v690_v26, 0  ;;  %vm1206_vm2 = vcmp.lt.s32.totalorder %v683_v4, 15 }
 0x16c   : > { %v4459_v43 = vmax.f32 %v443_v40, 0.0  ;;  %3361 = vmatmul.msk.f32.gmra.mxu0 %vm1429_vm0, %v4452_v42 }
 0x16e   : > { %3379 = vmatmul.msk.f32.gmra.mxu1 %vm1429_vm0, %v4459_v43  ;;  %v1032_v57 = vrot.slane %v4459_v43, 7  ;;  %v1257_v54 = vrot.slane %v4459_v43, 1 }
 0x170   : > { %v4472_v7 = vsel %vm994_vm1, %v1030_v22, %v1032_v57  ;;  %v4475_v0 = vsel %vm1219_vm4, %v1255_v25, %v1257_v54  ;;  %v2072_v22 = vld [vmem:[#allocation5 + $0x1d0] sm:$0xff]  ;;  %v395_v25 = vadd.f32 %v4194_v3, %v4164_v50 }
 0x171   : > { %6154 = vst [vmem:[#allocation18_spill] sm:$0xff] %v4472_v7  ;;  %v445_v44 = vpop.f32.mrf.mxu0  ;;  %2095 = vmatpush.msrb.mxu1 %v2072_v22 }
 0x172   : > { %6155 = vst [vmem:[#allocation19_spill] sm:$0xff] %v4475_v0  ;;  %v446_v1 = vadd.f32 %v4194_v3, %v445_v44  ;;  %3409 = vmatmul.msk.f32.gmra.mxu2 %vm1429_vm0, %v4472_v7  ;;  %3440 = vmatmul.msk.f32.gmra.mxu3 %vm1429_vm0, %v4475_v0  ;;  %v4500_v50 = vmax.f32 %v395_v25, 0.0 }
 0x174   : > { %v4484_v29 = vmax.f32 %v446_v1, 0.0  ;;  %3362 = vmatmul.msk.f32.gmra.mxu0 %vm1429_vm0, %v4477_v11  ;;  %6160 = vst [vmem:[#allocation24_spill] sm:$0xff] %v4500_v50 }
 0x176   : > { %6157 = vst [vmem:[#allocation21_spill] sm:$0xff] %v4484_v29  ;;  %3380 = vmatmul.msk.f32.gmra.mxu1 %vm1429_vm0, %v4484_v29  ;;  %v1034_v40 = vrot.slane %v4484_v29, 7  ;;  %v1259_v47 = vrot.slane %v4484_v29, 1 }
 0x178   : > { %v1035_v59 = vsel %vm994_vm1, %v1032_v57, %v1034_v40  ;;  %v1260_v56 = vsel %vm1219_vm4, %v1257_v54, %v1259_v47  ;;  %v398_v54 = vadd.f32 %v4194_v3, %v4178_v60 }
 0x179   : > { %v448_v62 = vpop.f32.mrf.mxu0  ;;  %v4496_v44 = vsel %vm950_vm15, %v1035_v59, 0.0  ;;  %v4498_v1 = vsel %vm1206_vm2, %v1260_v56, 0.0  ;;  %v536_v59 = vadd.s32 176, %v4213_v17  ;;  %v535_v56 = vadd.s32 168, %v4213_v17 }
 0x17a   : > { %6158 = vst [vmem:[#allocation22_spill] sm:$0xff] %v4496_v44  ;;  %v449_v22 = vadd.f32 %v4194_v3, %v448_v62  ;;  %3410 = vmatmul.msk.f32.gmra.mxu2 %vm1429_vm0, %v4496_v44  ;;  %3441 = vmatmul.msk.f32.gmra.mxu3 %vm1429_vm0, %v4498_v1  ;;  %v4527_v20 = vmax.f32 %v398_v54, 0.0 }
 0x17b   : > { %6159 = vst [vmem:[#allocation23_spill] sm:$0xff] %v4498_v1  ;;  %v4507_v26 = vpop.f32.mrf.mxu1  ;;  %v704_v21 = vand.u32 15, %v536_v59  ;;  %v2196_v1 = vld [vmem:[#allocation5 + $0x200] sm:$0xff] }
 0x17c   : > { %6161 = vst [vmem:[#allocation25_spill] sm:$0xff] %v4507_v26  ;;  %v4509_v57 = vmax.f32 %v449_v22, 0.0  ;;  %3363 = vmatmul.msk.f32.gmra.mxu0 %vm1429_vm0, %v4500_v50  ;;  %v697_v26 = vand.u32 15, %v535_v56  ;;  %v2197_v56 = vld [vmem:[#allocation5 + $0x208] sm:$0xff] }
 0x17d   : > { %vm952_vm3 = vcmp.gt.s32.totalorder %v704_v21, 0  ;;  %2218 = vmatpush.msrb.mxu2 %v2197_v56  ;;  %v537_v56 = vadd.s32 184, %v4213_v17 }
 0x17e   : > { %6162 = vst [vmem:[#allocation26_spill] sm:$0xff] %v4509_v57  ;;  %3381 = vmatmul.msk.f32.gmra.mxu1 %vm1429_vm0, %v4509_v57  ;;  %v1036_v4 = vrot.slane %v4509_v57, 7  ;;  %v1261_v25 = vrot.slane %v4509_v57, 1  ;;  %vm1208_vm5 = vcmp.lt.s32.totalorder %v697_v26, 15 }
 0x17f   : > { %v711_v63 = vand.u32 15, %v537_v56  ;;  %2219 = vmatpush.msrb.mxu2 %v2196_v1 }
 0x180   : > { %v4522_v62 = vsel %vm994_vm1, %v1034_v40, %v1036_v4  ;;  %v4525_v22 = vsel %vm1219_vm4, %v1259_v47, %v1261_v25  ;;  %v995_v40 = vrot.slane %v4428_v6, 7  ;;  %v550_v47 = vand.u32 15, %v4213_v17 }
 0x181   : > { %6163 = vst [vmem:[#allocation27_spill] sm:$0xff] %v4522_v62  ;;  %v451_v33 = vpop.f32.mrf.mxu0  ;;  %vm1210_vm8 = vcmp.lt.s32.totalorder %v711_v63, 15 }
 0x182   : > { %6164 = vst [vmem:[#allocation28_spill] sm:$0xff] %v4525_v22  ;;  %v452_v60 = vadd.f32 %v4194_v3, %v451_v33  ;;  %3411 = vmatmul.msk.f32.gmra.mxu2 %vm1429_vm0, %v4522_v62  ;;  %3442 = vmatmul.msk.f32.gmra.mxu3 %vm1429_vm0, %v4525_v22  ;;  %v1419_v33 = vld [vmem:[#allocation5 + $0x38] sm:$0xff]  ;;  %vm930_vm6 = vcmp.gt.s32.totalorder %v550_v47, 0  ;;  %v1090_v62 = vsel %vm994_vm1, 0.0, %v995_v40  ;;  %v538_v47 = vadd.s32 192, %v4213_v17 }
 0x183   : > { %v4534_v44 = vpop.f32.mrf.mxu1  ;;  %2325 = vmatpush.msrb.mxu3 %v1419_v33 }
 0x184   : > { %6165 = vst [vmem:[#allocation29_spill] sm:$0xff] %v4534_v44  ;;  %v4537_v7 = vmax.f32 %v452_v60, 0.0  ;;  %3364 = vmatmul.msk.f32.gmra.mxu0 %vm1429_vm0, %v4527_v20 }
 0x186   : > { %6166 = vst [vmem:[#allocation30_spill] sm:$0xff] %v4537_v7  ;;  %3382 = vmatmul.msk.f32.gmra.mxu1 %vm1429_vm0, %v4537_v7  ;;  %v1038_v54 = vrot.slane %v4537_v7, 7  ;;  %v1263_v59 = vrot.slane %v4537_v7, 1 }
 0x188   : > { %v1039_v60 = vsel %vm994_vm1, %v1036_v4, %v1038_v54  ;;  %v1264_v44 = vsel %vm1219_vm4, %v1261_v25, %v1263_v59  ;;  %v4560_v4 = vsel %vm930_vm6, %v1090_v62, 0.0  ;;  %v996_v62 = vrot.slane %v4452_v42, 7 }
 0x189   : > { %v454_v31 = vpop.f32.mrf.mxu0  ;;  %v4549_v33 = vsel %vm952_vm3, %v1039_v60, 0.0  ;;  %v4551_v61 = vsel %vm1208_vm5, %v1264_v44, 0.0  ;;  %v2071_v60 = vld [vmem:[#allocation5 + $0x1c8] sm:$0xff] }
 0x18a   : > { %6167 = vst [vmem:[#allocation31_spill] sm:$0xff] %v4549_v33  ;;  %v455_v21 = vadd.f32 %v4194_v3, %v454_v31  ;;  %3412 = vmatmul.msk.f32.gmra.mxu2 %vm1429_vm0, %v4549_v33  ;;  %3443 = vmatmul.msk.f32.gmra.mxu3 %vm1429_vm0, %v4551_v61  ;;  %v516_v33 = vadd.s32 16, %v4213_v17 }
 0x18b   : > { %6168 = vst [vmem:[#allocation32_spill] sm:$0xff] %v4551_v61  ;;  %v4558_v26 = vpop.f32.mrf.mxu1  ;;  %2096 = vmatpush.msrb.mxu1 %v2071_v60 }
 0x18c   : > { %6169 = vst [vmem:[#allocation33_spill] sm:$0xff] %v4558_v26  ;;  %v4562_v25 = vmax.f32 %v455_v21, 0.0  ;;  %3390 = vmatmul.msk.f32.vlgmr.msra.gmra.mxu0 %vm1429_vm0, %v4560_v4 }
 0x18e   : > { %6170 = vst [vmem:[#allocation34_spill] sm:$0xff] %v4562_v25  ;;  %3383 = vmatmul.msk.f32.gmra.mxu1 %vm1429_vm0, %v4562_v25  ;;  %v1040_v31 = vrot.slane %v4562_v25, 7  ;;  %v1265_v44 = vrot.slane %v4562_v25, 1  ;;  %v718_v25 = vand.u32 15, %v538_v47 }
 0x190   : > { %v4574_v21 = vsel %vm994_vm1, %v1038_v54, %v1040_v31  ;;  %v4577_v26 = vsel %vm1219_vm4, %v1263_v59, %v1265_v44  ;;  %v4588_v54 = vsel %vm994_vm1, %v995_v40, %v996_v62  ;;  %vm954_vm7 = vcmp.gt.s32.totalorder %v718_v25, 0 }
 0x191   : > { %6171 = vst [vmem:[#allocation35_spill] sm:$0xff] %v4574_v21  ;;  %v457_v35 = vpop.f32.mrf.mxu0 }
 0x192   : > { %6172 = vst [vmem:[#allocation36_spill] sm:$0xff] %v4577_v26  ;;  %v458_v61 = vadd.f32 %v4194_v3, %v457_v35  ;;  %3413 = vmatmul.msk.f32.gmra.mxu2 %vm1429_vm0, %v4574_v21  ;;  %3444 = vmatmul.msk.f32.gmra.mxu3 %vm1429_vm0, %v4577_v26  ;;  %v564_v35 = vand.u32 15, %v516_v33  ;;  %v998_v21 = vrot.slane %v4477_v11, 7 }
 0x193   : > { %v4585_v60 = vpop.f32.mrf.mxu1 }
 0x194   : > { %6173 = vst [vmem:[#allocation37_spill] sm:$0xff] %v4585_v60  ;;  %v4590_v59 = vmax.f32 %v458_v61, 0.0  ;;  %3391 = vmatmul.msk.f32.gmra.mxu0 %vm1429_vm0, %v4588_v54  ;;  %v4594_v22 = vpop.f32.mrf.mxu2  ;;  %vm932_vm9 = vcmp.gt.s32.totalorder %v564_v35, 0  ;;  %v999_v60 = vsel %vm994_vm1, %v996_v62, %v998_v21 }
 0x195   : > { %6175 = vst [vmem:[#allocation39_spill] sm:$0xff] %v4594_v22  ;;  %v4615_v25 = vsel %vm932_vm9, %v999_v60, 0.0  ;;  %v540_v60 = vadd.s32 208, %v4213_v17 }
 0x196   : > { %6174 = vst [vmem:[#allocation38_spill] sm:$0xff] %v4590_v59  ;;  %3384 = vmatmul.msk.f32.gmra.mxu1 %vm1429_vm0, %v4590_v59  ;;  %v1042_v47 = vrot.slane %v4590_v59, 7  ;;  %v1267_v40 = vrot.slane %v4590_v59, 1 }
 0x198   : > { %v1043_v61 = vsel %vm994_vm1, %v1040_v31, %v1042_v47  ;;  %v1268_v56 = vsel %vm1219_vm4, %v1265_v44, %v1267_v40  ;;  %v1418_v44 = vld [vmem:[#allocation5 + $0x30] sm:$0xff] }
 0x199   : > { %v460_v22 = vpop.f32.mrf.mxu0  ;;  %v4604_v33 = vsel %vm954_vm7, %v1043_v61, 0.0  ;;  %v4606_v26 = vsel %vm1210_vm8, %v1268_v56, 0.0  ;;  %2326 = vmatpush.msrb.mxu3 %v1418_v44  ;;  %v1000_v56 = vrot.slane %v4500_v50, 7  ;;  %v518_v44 = vadd.s32 32, %v4213_v17 }
 0x19a   : > { %6176 = vst [vmem:[#allocation40_spill] sm:$0xff] %v4604_v33  ;;  %v461_v7 = vadd.f32 %v4194_v3, %v460_v22  ;;  %3414 = vmatmul.msk.f32.gmra.mxu2 %vm1429_vm0, %v4604_v33  ;;  %3445 = vmatmul.msk.f32.gmra.mxu3 %vm1429_vm0, %v4606_v26 }
 0x19b   : > { %6177 = vst [vmem:[#allocation41_spill] sm:$0xff] %v4606_v26  ;;  %v4613_v63 = vpop.f32.mrf.mxu1  ;;  %v732_v26 = vand.u32 15, %v540_v60  ;;  %v578_v36 = vand.u32 15, %v518_v44 }
 0x19c   : > { %6178 = vst [vmem:[#allocation42_spill] sm:$0xff] %v4613_v63  ;;  %v4617_v31 = vmax.f32 %v461_v7, 0.0  ;;  %3392 = vmatmul.msk.f32.gmra.mxu0 %vm1429_vm0, %v4615_v25  ;;  %v539_v7 = vadd.s32 200, %v4213_v17 }
 0x19d   : > { %v4621_v62 = vpop.f32.mrf.mxu2  ;;  %v4623_v35 = vpop.f32.mrf.mxu3  ;;  %vm956_vm10 = vcmp.gt.s32.totalorder %v732_v26, 0  ;;  %vm934_vm12 = vcmp.gt.s32.totalorder %v578_v36, 0 }
 0x19e   : > { %6179 = vst [vmem:[#allocation43_spill] sm:$0xff] %v4617_v31  ;;  %3385 = vmatmul.msk.f32.gmra.mxu1 %vm1429_vm0, %v4617_v31  ;;  %v1044_v22 = vrot.slane %v4617_v31, 7  ;;  %v1269_v61 = vrot.slane %v4617_v31, 1  ;;  %v725_v31 = vand.u32 15, %v539_v7 }
 0x19f   : > { %6180 = vst [vmem:[#allocation44_spill] sm:$0xff] %v4621_v62 }
 0x1a0   : > { %6181 = vst [vmem:[#allocation45_spill] sm:$0xff] %v4623_v35  ;;  %v4633_v63 = vsel %vm994_vm1, %v1042_v47, %v1044_v22  ;;  %v4636_v62 = vsel %vm1219_vm4, %v1267_v40, %v1269_v61  ;;  %v4647_v47 = vsel %vm994_vm1, %v998_v21, %v1000_v56  ;;  %vm1212_vm11 = vcmp.lt.s32.totalorder %v725_v31, 15 }
 0x1a1   : > { %6182 = vst [vmem:[#allocation46_spill] sm:$0xff] %v4633_v63  ;;  %v463_v35 = vpop.f32.mrf.mxu0 }
 0x1a2   : > { %6183 = vst [vmem:[#allocation47_spill] sm:$0xff] %v4636_v62  ;;  %v464_v33 = vadd.f32 %v4194_v3, %v463_v35  ;;  %3415 = vmatmul.msk.f32.gmra.mxu2 %vm1429_vm0, %v4633_v63  ;;  %3446 = vmatmul.msk.f32.gmra.mxu3 %vm1429_vm0, %v4636_v62  ;;  %v1002_v35 = vrot.slane %v4527_v20, 7  ;;  %v2070_v63 = vld [vmem:[#allocation5 + $0x1c0] sm:$0xff] }
 0x1a3   : > { %v4644_v59 = vpop.f32.mrf.mxu1  ;;  %2097 = vmatpush.msrb.mxu1 %v2070_v63 }
 0x1a4   : > { %6184 = vst [vmem:[#allocation48_spill] sm:$0xff] %v4644_v59  ;;  %v4649_v40 = vmax.f32 %v464_v33, 0.0  ;;  %3393 = vmatmul.msk.f32.gmra.mxu0 %vm1429_vm0, %v4647_v47  ;;  %v1003_v44 = vsel %vm994_vm1, %v1000_v56, %v1002_v35 }
 0x1a5   : > { %v4654_v57 = vpop.f32.mrf.mxu2  ;;  %v4656_v62 = vpop.f32.mrf.mxu3  ;;  %v4676_v31 = vsel %vm934_vm12, %v1003_v44, 0.0  ;;  %v1004_v44 = vrot.slane %v4201_v8, 7 }
 0x1a6   : > { %6185 = vst [vmem:[#allocation49_spill] sm:$0xff] %v4649_v40  ;;  %3386 = vmatmul.msk.f32.gmra.mxu1 %vm1429_vm0, %v4649_v40  ;;  %v1046_v21 = vrot.slane %v4649_v40, 7  ;;  %v1271_v33 = vrot.slane %v4649_v40, 1 }
 0x1a7   : > { %6186 = vst [vmem:[#allocation50_spill] sm:$0xff] %v4654_v57 }
 0x1a8   : > { %6187 = vst [vmem:[#allocation51_spill] sm:$0xff] %v4656_v62  ;;  %v1047_v60 = vsel %vm994_vm1, %v1044_v22, %v1046_v21  ;;  %v1272_v7 = vsel %vm1219_vm4, %v1269_v61, %v1271_v33 }
 0x1a9   : > { %v466_v59 = vpop.f32.mrf.mxu0  ;;  %v4665_v57 = vsel %vm956_vm10, %v1047_v60, 0.0  ;;  %v4667_v1 = vsel %vm1212_vm11, %v1272_v7, 0.0  ;;  %v542_v60 = vadd.s32 224, %v4213_v17  ;;  %v541_v7 = vadd.s32 216, %v4213_v17 }
 0x1aa   : > { %6188 = vst [vmem:[#allocation52_spill] sm:$0xff] %v4665_v57  ;;  %v467_v63 = vadd.f32 %v4194_v3, %v466_v59  ;;  %3416 = vmatmul.msk.f32.gmra.mxu2 %vm1429_vm0, %v4665_v57  ;;  %3447 = vmatmul.msk.f32.gmra.mxu3 %vm1429_vm0, %v4667_v1 }
 0x1ab   : > { %6189 = vst [vmem:[#allocation53_spill] sm:$0xff] %v4667_v1  ;;  %v4674_v26 = vpop.f32.mrf.mxu1  ;;  %v746_v57 = vand.u32 15, %v542_v60  ;;  %v739_v1 = vand.u32 15, %v541_v7 }
 0x1ac   : > { %6190 = vst [vmem:[#allocation54_spill] sm:$0xff] %v4674_v26  ;;  %v4678_v36 = vmax.f32 %v467_v63, 0.0  ;;  %3394 = vmatmul.msk.f32.gmra.mxu0 %vm1429_vm0, %v4676_v31 }
 0x1ad   : > { %v4682_v22 = vpop.f32.mrf.mxu2  ;;  %v4684_v61 = vpop.f32.mrf.mxu3  ;;  %vm958_vm13 = vcmp.gt.s32.totalorder %v746_v57, 0  ;;  %vm1214_vm14 = vcmp.lt.s32.totalorder %v739_v1, 15 }
 0x1ae   : > { %6191 = vst [vmem:[#allocation55_spill] sm:$0xff] %v4678_v36  ;;  %3387 = vmatmul.msk.f32.gmra.mxu1 %vm1429_vm0, %v4678_v36  ;;  %v1048_v59 = vrot.slane %v4678_v36, 7  ;;  %v1273_v56 = vrot.slane %v4678_v36, 1 }
 0x1af   : > { %6192 = vst [vmem:[#allocation56_spill] sm:$0xff] %v4682_v22  ;;  %v520_v22 = vadd.s32 48, %v4213_v17 }
 0x1b0   : > { %6193 = vst [vmem:[#allocation57_spill] sm:$0xff] %v4684_v61  ;;  %v4694_v63 = vsel %vm994_vm1, %v1046_v21, %v1048_v59  ;;  %v4697_v26 = vsel %vm1219_vm4, %v1271_v33, %v1273_v56  ;;  %v4708_v21 = vsel %vm994_vm1, %v1002_v35, %v1004_v44 }
 0x1b1   : > { %6194 = vst [vmem:[#allocation58_spill] sm:$0xff] %v4694_v63  ;;  %v469_v61 = vpop.f32.mrf.mxu0  ;;  %v592_v40 = vand.u32 15, %v520_v22  ;;  %v6200_v22 = vrot.slane %v4207_v12, 7 }
 0x1b2   : > { %6195 = vst [vmem:[#allocation59_spill] sm:$0xff] %v4697_v26  ;;  %v470_v62 = vadd.f32 %v4194_v3, %v469_v61  ;;  %3417 = vmatmul.msk.f32.gmra.mxu2 %vm1429_vm0, %v4694_v63  ;;  %3448 = vmatmul.msk.f32.gmra.mxu3 %vm1429_vm0, %v4697_v26  ;;  %v1417_v61 = vld [vmem:[#allocation5 + $0x28] sm:$0xff] }
 0x1b3   : > { %v4705_v36 = vpop.f32.mrf.mxu1  ;;  %2327 = vmatpush.msrb.mxu3 %v1417_v61  ;;  %vm936_vm15 = vcmp.gt.s32.totalorder %v592_v40, 0  ;;  %v1007_v61 = vsel %vm994_vm1, %v1004_v44, %v6200_v22  ;;  %v2068_v40 = vld [vmem:[#allocation5 + $0x1b8] sm:$0xff] }
 0x1b4   : > { %6196 = vst [vmem:[#allocation60_spill] sm:$0xff] %v4705_v36  ;;  %v4710_v33 = vmax.f32 %v470_v62, 0.0  ;;  %3395 = vmatmul.msk.f32.gmra.mxu0 %vm1429_vm0, %v4708_v21  ;;  %v4738_v44 = vsel %vm936_vm15, %v1007_v61, 0.0  ;;  %2664 = vmatpush.msra.mxu2 %v2068_v40  ;;  %v544_v61 = vadd.s32 240, %v4213_v17  ;;  %v543_v40 = vadd.s32 232, %v4213_v17 }
 0x1b5   : > { %v4714_v9 = vpop.f32.mrf.mxu2  ;;  %v4720_v7 = vpop.f32.mrf.mxu3 }
 0x1b6   : > { %6197 = vst [vmem:[#allocation61_spill] sm:$0xff] %v4710_v33  ;;  %3388 = vmatmul.msk.f32.gmra.mxu1 %vm1429_vm0, %v4710_v33  ;;  %v1050_v60 = vrot.slane %v4710_v33, 7  ;;  %v1275_v35 = vrot.slane %v4710_v33, 1 }
 0x1b7   : > { %6198 = vst [vmem:[#allocation62_spill] sm:$0xff] %v4714_v9  ;;  %v1416_v9 = vld [vmem:[#allocation5 + $0x20] sm:$0xff] }
 0x1b8   : > { %6199 = vst [vmem:[#allocation63_spill] sm:$0xff] %v4720_v7  ;;  %v1051_v62 = vsel %vm994_vm1, %v1048_v59, %v1050_v60  ;;  %v1276_v36 = vsel %vm1219_vm4, %v1273_v56, %v1275_v35  ;;  %2328 = vmatpush.msrb.mxu3 %v1416_v9  ;;  %v1415_v59 = vld [vmem:[#allocation5 + $0x18] sm:$0xff]  ;;  %v1414_v9 = vld [vmem:[#allocation5 + $0x10] sm:$0xff]  ;;  %v515_v7 = vadd.s32 8, %v4213_v17 }
 0x1b9   : > { %v472_v63 = vpop.f32.mrf.mxu0  ;;  %v4727_v26 = vsel %vm958_vm13, %v1051_v62, 0.0  ;;  %v4729_v57 = vsel %vm1214_vm14, %v1276_v36, 0.0 }
 0x1ba   : > { %6201 = vst [vmem:[#allocation64_spill] sm:$0xff] %v4727_v26  ;;  %v473_v1 = vadd.f32 %v4194_v3, %v472_v63  ;;  %3418 = vmatmul.msk.f32.gmra.mxu2 %vm1429_vm0, %v4727_v26  ;;  %3449 = vmatmul.msk.f32.gmra.mxu3 %vm1429_vm0, %v4729_v57  ;;  %v1412_v26 = vld [vmem:[#allocation5] sm:$0xff] }
 0x1bb   : > { %6202 = vst [vmem:[#allocation65_spill] sm:$0xff] %v4729_v57  ;;  %v4736_v56 = vpop.f32.mrf.mxu1  ;;  %2329 = vmatpush.msrb.mxu3 %v1415_v59  ;;  %v1841_v59 = vld [vmem:[#allocation5 + $0x138] sm:$0xff]  ;;  %v1220_v57 = vrot.slane %v4428_v6, 1 }
 0x1bc   : > { %6203 = vst [vmem:[#allocation66_spill] sm:$0xff] %v4736_v56  ;;  %v4740_v62 = vmax.f32 %v473_v1, 0.0  ;;  %3396 = vmatmul.msk.f32.gmra.mxu0 %vm1429_vm0, %v4738_v44  ;;  %v1413_v1 = vld [vmem:[#allocation5 + $0x8] sm:$0xff]  ;;  %v1221_v56 = vrot.slane %v4452_v42, 1  ;;  %2551 = vmatpush.msra.mxu1 %v1841_v59 }
 0x1bd   : > { %v4744_v36 = vpop.f32.mrf.mxu2  ;;  %2330 = vmatpush.msrb.mxu3 %v1414_v9  ;;  %v4761_v33 = vpop.f32.mrf.mxu3 }
 0x1be   : > { %6204 = vst [vmem:[#allocation67_spill] sm:$0xff] %v4740_v62  ;;  %3389 = vmatmul.msk.f32.gmra.mxu1 %vm1429_vm0, %v4740_v62  ;;  %v1052_v63 = vrot.slane %v4740_v62, 7  ;;  %v1277_v22 = vrot.slane %v4740_v62, 1  ;;  %v4771_v59 = vsel %vm1219_vm4, %v1220_v57, %v1221_v56 }
 0x1bf   : > { %6205 = vst [vmem:[#allocation68_spill] sm:$0xff] %v4744_v36  ;;  %2331 = vmatpush.msrb.mxu3 %v1413_v1 }
 0x1c0   : > { %v4754_v36 = vsel %vm994_vm1, %v1050_v60, %v1052_v63  ;;  %v4757_v9 = vsel %vm1219_vm4, %v1275_v35, %v1277_v22  ;;  %6207 = vst [vmem:[#allocation70_spill] sm:$0xff] %v4761_v33  ;;  %v760_v60 = vand.u32 15, %v544_v61  ;;  %v753_v35 = vand.u32 15, %v543_v40 }
 0x1c1   : > { %6206 = vst [vmem:[#allocation69_spill] sm:$0xff] %v4754_v36  ;;  %v475_v62 = vpop.f32.mrf.mxu0  ;;  %2332 = vmatpush.msrb.mxu3 %v1412_v26  ;;  %v557_v26 = vand.u32 15, %v515_v7 }
 0x1c2   : > { %v476_v0 = vadd.f32 %v4194_v3, %v475_v62  ;;  %3419 = vmatmul.msk.f32.gmra.mxu2 %vm1429_vm0, %v4754_v36  ;;  %3450 = vmatmul.msk.f32.gmra.mxu3 %vm1429_vm0, %v4757_v9  ;;  %v1223_v3 = vrot.slane %v4477_v11, 1  ;;  %vm960_vm2 = vcmp.gt.s32.totalorder %v760_v60, 0  ;;  %vm1216_vm3 = vcmp.lt.s32.totalorder %v753_v35, 15  ;;  %v3764_v60 = vld [vmem:[%s6045_s2] ss:$0 sm:$0xff] }
 0x1c3   : > { %v4768_v1 = vpop.f32.mrf.mxu1  ;;  %vm1188_vm5 = vcmp.lt.s32.totalorder %v557_v26, 15  ;;  %v1614_v26 = vld [vmem:[#allocation5 + $0xb8] sm:$0xff] }
 0x1c4   : > { %6208 = vst [vmem:[#allocation71_spill] sm:$0xff] %v4768_v1  ;;  %v4773_v42 = vmax.f32 %v476_v0, 0.0  ;;  %3422 = vmatmul.msk.f32.vlgmr.msrb.gmra.mxu0 %vm1429_vm0, %v4771_v59  ;;  %v1224_v7 = vsel %vm1219_vm4, %v1221_v56, %v1223_v3 }
 0x1c5   : > { %v4778_v62 = vpop.f32.mrf.mxu2  ;;  %v4802_v56 = vpop.f32.mrf.mxu3  ;;  %2438 = vmatpush.msra.mxu0 %v1614_v26  ;;  %v517_v26 = vadd.s32 24, %v4213_v17 }
 0x1c6   : > { %6209 = vst [vmem:[#allocation72_spill] sm:$0xff] %v4773_v42  ;;  %3454 = vmatmul.msk.f32.vlgmr.msrb.gmra.mxu1 %vm1429_vm0, %v4477_v11  ;;  %v1054_v61 = vrot.slane %v4773_v42, 7  ;;  %v1279_v57 = vrot.slane %v4773_v42, 1  ;;  %v1611_v11 = vld [vmem:[#allocation5 + $0xa0] sm:$0xff] }
 0x1c7   : > { %6210 = vst [vmem:[#allocation73_spill] sm:$0xff] %v4778_v62 }
 0x1c8   : > { %v1055_v0 = vsel %vm994_vm1, %v1052_v63, %v1054_v61  ;;  %v1280_v40 = vsel %vm1219_vm4, %v1277_v22, %v1279_v57  ;;  %v4800_v22 = vsel %vm1188_vm5, %v1224_v7, 0.0  ;;  %6213 = vst [vmem:[#allocation76_spill] sm:$0xff] %v4802_v56  ;;  %v545_v7 = vadd.s32 248, %v4213_v17 }
 0x1c9   : > { %v478_v1 = vpop.f32.mrf.mxu0  ;;  %v4787_v33 = vsel %vm960_vm2, %v1055_v0, 0.0  ;;  %v4789_v62 = vsel %vm1216_vm3, %v1280_v40, 0.0 }
 0x1ca   : > { %6211 = vst [vmem:[#allocation74_spill] sm:$0xff] %v4787_v33  ;;  %v479_v36 = vadd.f32 %v3764_v60, %v478_v1  ;;  %3420 = vmatmul.msk.f32.gmra.mxu2 %vm1429_vm0, %v4787_v33  ;;  %3451 = vmatmul.msk.f32.gmra.mxu3 %vm1429_vm0, %v4789_v62  ;;  %v1613_v60 = vld [vmem:[#allocation5 + $0xb0] sm:$0xff]  ;;  %v767_v33 = vand.u32 15, %v545_v7 }
 0x1cb   : > { %v4798_v63 = vpop.f32.mrf.mxu1  ;;  %2439 = vmatpush.msra.mxu0 %v1613_v60  ;;  %v1609_v7 = vld [vmem:[#allocation5 + $0x90] sm:$0xff] }
 0x1cc   : > { %6212 = vst [vmem:[#allocation75_spill] sm:$0xff] %v4798_v63  ;;  %v4804_v35 = vmax.f32 %v479_v36, 0.0  ;;  %3423 = vmatmul.msk.f32.gmra.mxu0 %vm1429_vm0, %v4800_v22  ;;  %v1225_v36 = vrot.slane %v4500_v50, 1 }
 0x1cd   : > { %v4808_v0 = vpop.f32.mrf.mxu2 }
 0x1ce   : > { %6214 = vst [vmem:[#allocation77_spill] sm:$0xff] %v4804_v35  ;;  %3455 = vmatmul.msk.f32.gmra.mxu1 %vm1429_vm0, %v4500_v50  ;;  %v1056_v1 = vrot.slane %v4804_v35, 7  ;;  %v1281_v40 = vrot.slane %v4804_v35, 1 }
 0x1cf   : > { %6215 = vst [vmem:[#allocation78_spill] sm:$0xff] %v4808_v0  ;;  %v1612_v0 = vld [vmem:[#allocation5 + $0xa8] sm:$0xff] }
 0x1d0   : > { %v4817_v63 = vsel %vm994_vm1, %v1054_v61, %v1056_v1  ;;  %v4820_v56 = vsel %vm1219_vm4, %v1279_v57, %v1281_v40  ;;  %2440 = vmatpush.msra.mxu0 %v1612_v0  ;;  %v4830_v61 = vsel %vm1219_vm4, %v1223_v3, %v1225_v36  ;;  %v571_v57 = vand.u32 15, %v517_v26  ;;  %v1610_v1 = vld [vmem:[#allocation5 + $0x98] sm:$0xff]  ;;  %v1608_v26 = vld [vmem:[#allocation5 + $0x88] sm:$0xff] }
 0x1d1   : > { %6216 = vst [vmem:[#allocation79_spill] sm:$0xff] %v4817_v63  ;;  %v1227_v0 = vrot.slane %v4527_v20, 1  ;;  %vm1218_vm1 = vcmp.lt.s32.totalorder %v767_v33, 15  ;;  %v1315_v3 = vsel %vm1219_vm4, %v1281_v40, 0.0 }
 0x1d2   : > { %3421 = vmatmul.msk.f32.gmra.mxu2 %vm1429_vm0, %v4817_v63  ;;  %3452 = vmatmul.msk.f32.gmra.mxu3 %vm1429_vm0, %v4820_v56  ;;  %v4837_v63 = vpop.f32.mrf.mxu3  ;;  %vm1190_vm6 = vcmp.lt.s32.totalorder %v571_v57, 15  ;;  %v4853_v57 = vpop.f32.mrf.mxu0 }
 0x1d3   : > { %v4827_v50 = vpop.f32.mrf.mxu1  ;;  %2441 = vmatpush.msra.mxu0 %v1611_v11  ;;  %6219 = vst [vmem:[#allocation82_spill] sm:$0xff] %v4837_v63  ;;  %v1228_v11 = vsel %vm1219_vm4, %v1225_v36, %v1227_v0 }
 0x1d4   : > { %6217 = vst [vmem:[#allocation80_spill] sm:$0xff] %v4827_v50  ;;  %3424 = vmatmul.msk.f32.gmra.mxu0 %vm1429_vm0, %v4830_v61  ;;  %v4843_v50 = vsel %vm1218_vm1, %v1315_v3, 0.0  ;;  %v4851_v40 = vsel %vm1190_vm6, %v1228_v11, 0.0  ;;  %v1840_v3 = vld [vmem:[#allocation5 + $0x130] sm:$0xff]  ;;  %v519_v11 = vadd.s32 40, %v4213_v17 }
 0x1d5   : > { %v4835_v60 = vpop.f32.mrf.mxu2  ;;  %2442 = vmatpush.msra.mxu0 %v1610_v1  ;;  %v2067_v1 = vld [vmem:[#allocation5 + $0x1b0] sm:$0xff]  ;;  %2552 = vmatpush.msra.mxu1 %v1840_v3  ;;  %v1231_v3 = vrot.slane %v4207_v12, 1 }
 0x1d6   : > { %6218 = vst [vmem:[#allocation81_spill] sm:$0xff] %v4835_v60  ;;  %3456 = vmatmul.msk.f32.gmra.mxu1 %vm1429_vm0, %v4527_v20  ;;  %v1607_v60 = vld [vmem:[#allocation5 + $0x80] sm:$0xff]  ;;  %2665 = vmatpush.msra.mxu2 %v2067_v1 }
 0x1d7   : > { %2443 = vmatpush.msra.mxu0 %v1609_v7  ;;  %v1229_v7 = vrot.slane %v4201_v8, 1 }
 0x1d9   : > { %2444 = vmatpush.msra.mxu0 %v1608_v26  ;;  %v1232_v17 = vsel %vm1219_vm4, %v1229_v7, %v1231_v3 }
 0x1da   : > { %3453 = vmatmul.msk.f32.gmra.mxu3 %vm1429_vm0, %v4843_v50  ;;  %3484 = vmatmul.msk.f32.vlgmr.msrb.gmra.mxu2 %vm1429_vm0, %v4830_v61  ;;  %v4862_v26 = vpop.f32.mrf.mxu3 }
 0x1db   : > { %v4849_v33 = vpop.f32.mrf.mxu1  ;;  %2445 = vmatpush.msra.mxu0 %v1607_v60  ;;  %6222 = vst [vmem:[#allocation85_spill] sm:$0xff] %v4862_v26  ;;  %v6223_v60 = vmov 0.0   ;;  %v4878_v26 = vpop.f32.mrf.mxu0 }
 0x1dc   : > { %6220 = vst [vmem:[#allocation83_spill] sm:$0xff] %v4849_v33  ;;  %3425 = vmatmul.msk.f32.gmra.mxu0 %vm1429_vm0, %v4851_v40  ;;  %v4871_v33 = vsel %vm1219_vm4, %v1227_v0, %v1229_v7 }
 0x1dd   : > { %v4857_v36 = vpop.f32.mrf.mxu2  ;;  %6226 = vst [vmem:[#allocation88_spill] sm:$0xff] %v4878_v26  ;;  %v6333_v26 = vld [vmem:[#allocation65_spill] sm:$0xff] }
 0x1de   : > { %6221 = vst [vmem:[#allocation84_spill] sm:$0xff] %v4857_v36  ;;  %3457 = vmatmul.msk.f32.gmra.mxu1 %vm1429_vm0, %v4201_v8  ;;  %v585_v36 = vand.u32 15, %v519_v11 }
 0x1e0   : > { %vm1192_vm7 = vcmp.lt.s32.totalorder %v585_v36, 15 }
 0x1e1   : > { %v4890_v11 = vsel %vm1192_vm7, %v1232_v17, 0.0  ;;  %v6232_v17 = vrot.slane %v4215_v18, 1 }
 0x1e2   : > { %3485 = vmatmul.msk.f32.gmra.mxu2 %vm1429_vm0, %v4851_v40  ;;  %2333 = vmatmul.f32.vlgmr.msrb.gmra.mxu3 %v6223_v60 }
 0x1e3   : > { %v4868_v1 = vpop.f32.mrf.mxu1  ;;  %v4898_v36 = vpop.f32.mrf.mxu0 }
 0x1e4   : > { %6224 = vst [vmem:[#allocation86_spill] sm:$0xff] %v4868_v1  ;;  %3426 = vmatmul.msk.f32.gmra.mxu0 %vm1429_vm0, %v4871_v33  ;;  %v4883_v1 = vpop.f32.mrf.mxu3 }
 0x1e5   : > { %v4876_v63 = vpop.f32.mrf.mxu2  ;;  %6227 = vst [vmem:[#allocation89_spill] sm:$0xff] %v4883_v1 }
 0x1e6   : > { %6225 = vst [vmem:[#allocation87_spill] sm:$0xff] %v4876_v63  ;;  %3458 = vmatmul.msk.f32.gmra.mxu1 %vm1429_vm0, %v4207_v12 }
 0x1e7   : > { %6230 = vst [vmem:[#allocation92_spill] sm:$0xff] %v4898_v36 }
 0x1ea   : > { %3486 = vmatmul.msk.f32.gmra.mxu2 %vm1429_vm0, %v4871_v33  ;;  %2336 = vmatmul.f32.gmra.mxu3 %v6223_v60 }
 0x1eb   : > { %v4888_v0 = vpop.f32.mrf.mxu1  ;;  %v4919_v36 = vpop.f32.mrf.mxu0 }
 0x1ec   : > { %6228 = vst [vmem:[#allocation90_spill] sm:$0xff] %v4888_v0  ;;  %3427 = vmatmul.msk.f32.gmra.mxu0 %vm1429_vm0, %v4890_v11  ;;  %v4909_v0 = vsel %vm1219_vm4, %v1231_v3, %v6232_v17  ;;  %v4911_v1 = vpop.f32.mrf.mxu3 }
 0x1ed   : > { %v4894_v63 = vpop.f32.mrf.mxu2  ;;  %6233 = vst [vmem:[#allocation94_spill] sm:$0xff] %v4911_v1 }
 0x1ee   : > { %6229 = vst [vmem:[#allocation91_spill] sm:$0xff] %v4894_v63  ;;  %3459 = vmatmul.msk.f32.gmra.mxu1 %vm1429_vm0, %v4215_v18 }
 0x1ef   : > { %6235 = vst [vmem:[#allocation96_spill] sm:$0xff] %v4919_v36 }
 0x1f2   : > { %3487 = vmatmul.msk.f32.gmra.mxu2 %vm1429_vm0, %v4890_v11  ;;  %3514 = vmatmul.msk.f32.gmra.mxu3 %vm1429_vm0, %v4560_v4  ;;  %v2066_v4 = vld [vmem:[#allocation5 + $0x1a8] sm:$0xff] }
 0x1f3   : > { %v4904_v7 = vpop.f32.mrf.mxu1  ;;  %2666 = vmatpush.msra.mxu2 %v2066_v4  ;;  %v4940_v4 = vpop.f32.mrf.mxu0 }
 0x1f4   : > { %6231 = vst [vmem:[#allocation93_spill] sm:$0xff] %v4904_v7  ;;  %3428 = vmatmul.msk.f32.gmra.mxu0 %vm1429_vm0, %v4909_v0  ;;  %v4930_v7 = vpop.f32.mrf.mxu3 }
 0x1f5   : > { %v4915_v63 = vpop.f32.mrf.mxu2  ;;  %6238 = vst [vmem:[#allocation99_spill] sm:$0xff] %v4930_v7 }
 0x1f6   : > { %6234 = vst [vmem:[#allocation95_spill] sm:$0xff] %v4915_v63  ;;  %3460 = vmatmul.msk.f32.gmra.mxu1 %vm1429_vm0, %v4232_v30  ;;  %v1839_v63 = vld [vmem:[#allocation5 + $0x128] sm:$0xff] }
 0x1f7   : > { %2553 = vmatpush.msra.mxu1 %v1839_v63  ;;  %6240 = vst [vmem:[#allocation101_spill] sm:$0xff] %v4940_v4 }
 0x1fa   : > { %3488 = vmatmul.msk.f32.gmra.mxu2 %vm1429_vm0, %v4909_v0  ;;  %3515 = vmatmul.msk.f32.gmra.mxu3 %vm1429_vm0, %v4588_v54 }
 0x1fb   : > { %v4925_v3 = vpop.f32.mrf.mxu1  ;;  %v4959_v7 = vpop.f32.mrf.mxu0 }
 0x1fc   : > { %6236 = vst [vmem:[#allocation97_spill] sm:$0xff] %v4925_v3  ;;  %2446 = vmatmul.f32.vlgmr.msra.gmra.mxu0 %v6223_v60 }
 0x1fd   : > { %v4928_v17 = vpop.f32.mrf.mxu2  ;;  %6245 = vst [vmem:[#allocation106_spill] sm:$0xff] %v4959_v7  ;;  %v2063_v7 = vld [vmem:[#allocation5 + $0x190] sm:$0xff] }
 0x1fe   : > { %6237 = vst [vmem:[#allocation98_spill] sm:$0xff] %v4928_v17  ;;  %3461 = vmatmul.msk.f32.gmra.mxu1 %vm1429_vm0, %v4253_v45  ;;  %v4947_v17 = vpop.f32.mrf.mxu3 }
 0x1ff   : > { %6242 = vst [vmem:[#allocation103_spill] sm:$0xff] %v4947_v17 }
 0x202   : > { %3489 = vmatmul.msk.f32.gmra.mxu2 %vm1429_vm0, %v4245_v41  ;;  %3516 = vmatmul.msk.f32.gmra.mxu3 %vm1429_vm0, %v4615_v25 }
 0x203   : > { %v4938_v54 = vpop.f32.mrf.mxu1 }
 0x204   : > { %6239 = vst [vmem:[#allocation100_spill] sm:$0xff] %v4938_v54  ;;  %2449 = vmatmul.f32.gmra.mxu0 %v6223_v60 }
 0x205   : > { %v4943_v3 = vpop.f32.mrf.mxu2 }
 0x206   : > { %6241 = vst [vmem:[#allocation102_spill] sm:$0xff] %v4943_v3  ;;  %3462 = vmatmul.msk.f32.gmra.mxu1 %vm1429_vm0, %v4273_v2  ;;  %v4963_v3 = vpop.f32.mrf.mxu3 }
 0x207   : > { %6246 = vst [vmem:[#allocation107_spill] sm:$0xff] %v4963_v3 }
 0x20a   : > { %3490 = vmatmul.msk.f32.gmra.mxu2 %vm1429_vm0, %v4265_v52  ;;  %3517 = vmatmul.msk.f32.gmra.mxu3 %vm1429_vm0, %v4647_v47 }
 0x20b   : > { %v4953_v63 = vpop.f32.mrf.mxu1 }
 0x20c   : > { %6243 = vst [vmem:[#allocation104_spill] sm:$0xff] %v4953_v63  ;;  %3544 = vmatmul.msk.f32.gmra.mxu0 %vm1429_vm0, %v4771_v59  ;;  %v4977_v63 = vpop.f32.mrf.mxu0 }
 0x20d   : > { %v4957_v54 = vpop.f32.mrf.mxu2  ;;  %6249 = vst [vmem:[#allocation110_spill] sm:$0xff] %v4977_v63 }
 0x20e   : > { %6244 = vst [vmem:[#allocation105_spill] sm:$0xff] %v4957_v54  ;;  %3463 = vmatmul.msk.f32.gmra.mxu1 %vm1429_vm0, %v4291_v19  ;;  %v2065_v54 = vld [vmem:[#allocation5 + $0x1a0] sm:$0xff] }
 0x20f   : > { %2667 = vmatpush.msra.mxu2 %v2065_v54 }
 0x212   : > { %3491 = vmatmul.msk.f32.gmra.mxu2 %vm1429_vm0, %v4283_v14  ;;  %3518 = vmatmul.msk.f32.gmra.mxu3 %vm1429_vm0, %v4676_v31 }
 0x213   : > { %v4969_v17 = vpop.f32.mrf.mxu1 }
 0x214   : > { %6247 = vst [vmem:[#allocation108_spill] sm:$0xff] %v4969_v17  ;;  %3545 = vmatmul.msk.f32.gmra.mxu0 %vm1429_vm0, %v4800_v22  ;;  %v4985_v17 = vpop.f32.mrf.mxu3  ;;  %v4993_v1 = vpop.f32.mrf.mxu0 }
 0x215   : > { %v4973_v59 = vpop.f32.mrf.mxu2  ;;  %6251 = vst [vmem:[#allocation112_spill] sm:$0xff] %v4985_v17 }
 0x216   : > { %6248 = vst [vmem:[#allocation109_spill] sm:$0xff] %v4973_v59  ;;  %3464 = vmatmul.msk.f32.gmra.mxu1 %vm1429_vm0, %v4311_v37  ;;  %v1838_v59 = vld [vmem:[#allocation5 + $0x120] sm:$0xff] }
 0x217   : > { %2554 = vmatpush.msra.mxu1 %v1838_v59 }
 0x21a   : > { %3492 = vmatmul.msk.f32.gmra.mxu2 %vm1429_vm0, %v4303_v28  ;;  %3519 = vmatmul.msk.f32.gmra.mxu3 %vm1429_vm0, %v4708_v21 }
 0x21b   : > { %v4983_v3 = vpop.f32.mrf.mxu1 }
 0x21c   : > { %6250 = vst [vmem:[#allocation111_spill] sm:$0xff] %v4983_v3  ;;  %3546 = vmatmul.msk.f32.gmra.mxu0 %vm1429_vm0, %v4830_v61  ;;  %v5005_v3 = vpop.f32.mrf.mxu3 }
 0x21d   : > { %v4989_v22 = vpop.f32.mrf.mxu2  ;;  %6255 = vst [vmem:[#allocation116_spill] sm:$0xff] %v5005_v3 }
 0x21e   : > { %6252 = vst [vmem:[#allocation113_spill] sm:$0xff] %v4989_v22  ;;  %3465 = vmatmul.msk.f32.gmra.mxu1 %vm1429_vm0, %v4329_v58  ;;  %v5015_v22 = vpop.f32.mrf.mxu0 }
 0x21f   : > { %6257 = vst [vmem:[#allocation118_spill] sm:$0xff] %v5015_v22  ;;  %v6329_v22 = vld [vmem:[#allocation27_spill] sm:$0xff] }
 0x222   : > { %3493 = vmatmul.msk.f32.gmra.mxu2 %vm1429_vm0, %v4321_v49  ;;  %3520 = vmatmul.msk.f32.gmra.mxu3 %vm1429_vm0, %v4738_v44 }
 0x223   : > { %v4999_v54 = vpop.f32.mrf.mxu1 }
 0x224   : > { %6253 = vst [vmem:[#allocation114_spill] sm:$0xff] %v4999_v54  ;;  %3547 = vmatmul.msk.f32.gmra.mxu0 %vm1429_vm0, %v4851_v40  ;;  %v5023_v54 = vpop.f32.mrf.mxu3 }
 0x225   : > { %v5003_v61 = vpop.f32.mrf.mxu2  ;;  %6259 = vst [vmem:[#allocation120_spill] sm:$0xff] %v5023_v54  ;;  %v2064_v54 = vld [vmem:[#allocation5 + $0x198] sm:$0xff] }
 0x226   : > { %6254 = vst [vmem:[#allocation115_spill] sm:$0xff] %v5003_v61  ;;  %3466 = vmatmul.msk.f32.gmra.mxu1 %vm1429_vm0, %v4349_v23  ;;  %2668 = vmatpush.msra.mxu2 %v2064_v54 }
 0x228   : > { %2669 = vmatpush.msra.mxu2 %v2063_v7 }
 0x22a   : > { %3494 = vmatmul.msk.f32.gmra.mxu2 %vm1429_vm0, %v4341_v10  ;;  %3521 = vmatmul.msk.f32.gmra.mxu3 %vm1429_vm0, %v4226_v24 }
 0x22b   : > { %v5013_v59 = vpop.f32.mrf.mxu1 }
 0x22c   : > { %6256 = vst [vmem:[#allocation117_spill] sm:$0xff] %v5013_v59  ;;  %3548 = vmatmul.msk.f32.gmra.mxu0 %vm1429_vm0, %v4871_v33  ;;  %v5035_v33 = vpop.f32.mrf.mxu0 }
 0x22d   : > { %v5019_v40 = vpop.f32.mrf.mxu2  ;;  %6262 = vst [vmem:[#allocation123_spill] sm:$0xff] %v5035_v33  ;;  %v6303_v33 = vld [vmem:[#allocation15_spill] sm:$0xff] }
 0x22e   : > { %6258 = vst [vmem:[#allocation119_spill] sm:$0xff] %v5019_v40  ;;  %3467 = vmatmul.msk.f32.gmra.mxu1 %vm1429_vm0, %v4367_v46  ;;  %v5039_v40 = vpop.f32.mrf.mxu3 }
 0x22f   : > { %6263 = vst [vmem:[#allocation124_spill] sm:$0xff] %v5039_v40 }
 0x232   : > { %3495 = vmatmul.msk.f32.gmra.mxu2 %vm1429_vm0, %v4359_v38  ;;  %3522 = vmatmul.msk.f32.gmra.mxu3 %vm1429_vm0, %v4243_v39 }
 0x233   : > { %v5029_v61 = vpop.f32.mrf.mxu1 }
 0x234   : > { %6260 = vst [vmem:[#allocation121_spill] sm:$0xff] %v5029_v61  ;;  %3549 = vmatmul.msk.f32.gmra.mxu0 %vm1429_vm0, %v4890_v11  ;;  %v5053_v40 = vpop.f32.mrf.mxu0 }
 0x235   : > { %v5033_v59 = vpop.f32.mrf.mxu2  ;;  %6266 = vst [vmem:[#allocation127_spill] sm:$0xff] %v5053_v40 }
 0x236   : > { %6261 = vst [vmem:[#allocation122_spill] sm:$0xff] %v5033_v59  ;;  %3468 = vmatmul.msk.f32.gmra.mxu1 %vm1429_vm0, %v4386_v16  ;;  %v1837_v59 = vld [vmem:[#allocation5 + $0x118] sm:$0xff]  ;;  %v5061_v54 = vpop.f32.mrf.mxu3 }
 0x237   : > { %2555 = vmatpush.msra.mxu1 %v1837_v59  ;;  %6267 = vst [vmem:[#allocation128_spill] sm:$0xff] %v5061_v54 }
 0x23a   : > { %3496 = vmatmul.msk.f32.gmra.mxu2 %vm1429_vm0, %v4379_v5  ;;  %3523 = vmatmul.msk.f32.gmra.mxu3 %vm1429_vm0, %v4262_v51 }
 0x23b   : > { %v5045_v61 = vpop.f32.mrf.mxu1 }
 0x23c   : > { %6264 = vst [vmem:[#allocation125_spill] sm:$0xff] %v5045_v61  ;;  %3550 = vmatmul.msk.f32.gmra.mxu0 %vm1429_vm0, %v4909_v0  ;;  %v5069_v59 = vpop.f32.mrf.mxu0 }
 0x23d   : > { %v5049_v11 = vpop.f32.mrf.mxu2  ;;  %6269 = vst [vmem:[#allocation130_spill] sm:$0xff] %v5069_v59  ;;  %v6284_v59 = vld [vmem:[#allocation23_spill] sm:$0xff] }
 0x23e   : > { %6265 = vst [vmem:[#allocation126_spill] sm:$0xff] %v5049_v11  ;;  %3469 = vmatmul.msk.f32.gmra.mxu1 %vm1429_vm0, %v4408_v55  ;;  %v2972_v11 = vld [vmem:[%s6048_s5 + $0x38] sm:$0xff] }
 0x23f   : > { %3081 = vmatpush.msra.mxu3 %v2972_v11 }
 0x242   : > { %3497 = vmatmul.msk.f32.gmra.mxu2 %vm1429_vm0, %v4399_v53  ;;  %3524 = vmatmul.msk.f32.gmra.mxu3 %vm1429_vm0, %v4281_v13 }
 0x243   : > { %v5059_v61 = vpop.f32.mrf.mxu1 }
 0x244   : > { %3551 = vmatmul.msk.f32.gmra.mxu0 %vm1429_vm0, %v4245_v41  ;;  %v5094_v17 = vpop.f32.mrf.mxu0 }
 0x245   : > { %v5065_v0 = vpop.f32.mrf.mxu2  ;;  %6274 = vst [vmem:[#allocation135_spill] sm:$0xff] %v5094_v17  ;;  %v6282_v17 = vld [vmem:[#allocation26_spill] sm:$0xff] }
 0x246   : > { %6268 = vst [vmem:[#allocation129_spill] sm:$0xff] %v5065_v0  ;;  %3470 = vmatmul.msk.f32.gmra.mxu1 %vm1429_vm0, %v4436_v15  ;;  %v5084_v0 = vpop.f32.mrf.mxu3 }
 0x247   : > { %6272 = vst [vmem:[#allocation133_spill] sm:$0xff] %v5084_v0  ;;  %v6278_v0 = vld [vmem:[#allocation11_spill] sm:$0xff] }
 0x24a   : > { %3498 = vmatmul.msk.f32.gmra.mxu2 %vm1429_vm0, %v4425_v34  ;;  %3525 = vmatmul.msk.f32.gmra.mxu3 %vm1429_vm0, %v4300_v27 }
 0x24b   : > { %v5078_v54 = vpop.f32.mrf.mxu1 }
 0x24c   : > { %6270 = vst [vmem:[#allocation131_spill] sm:$0xff] %v5078_v54  ;;  %3552 = vmatmul.msk.f32.gmra.mxu0 %vm1429_vm0, %v4265_v52 }
 0x24d   : > { %v5082_v41 = vpop.f32.mrf.mxu2 }
 0x24e   : > { %6271 = vst [vmem:[#allocation132_spill] sm:$0xff] %v5082_v41  ;;  %3471 = vmatmul.msk.f32.gmra.mxu1 %vm1429_vm0, %v4459_v43  ;;  %v5102_v11 = vpop.f32.mrf.mxu3  ;;  %v6277_v41 = vld [vmem:[#allocation19_spill] sm:$0xff] }
 0x24f   : > { %6276 = vst [vmem:[#allocation137_spill] sm:$0xff] %v5102_v11  ;;  %v1836_v11 = vld [vmem:[#allocation5 + $0x110] sm:$0xff] }
 0x250   : > { %2556 = vmatpush.msra.mxu1 %v1836_v11  ;;  %v6289_v11 = vld [vmem:[#allocation28_spill] sm:$0xff] }
 0x252   : > { %3499 = vmatmul.msk.f32.gmra.mxu2 %vm1429_vm0, %v4450_v32  ;;  %3526 = vmatmul.msk.f32.gmra.mxu3 %vm1429_vm0, %v4319_v48 }
 0x253   : > { %v5092_v3 = vpop.f32.mrf.mxu1 }
 0x254   : > { %6273 = vst [vmem:[#allocation134_spill] sm:$0xff] %v5092_v3  ;;  %3553 = vmatmul.msk.f32.gmra.mxu0 %vm1429_vm0, %v4283_v14 }
 0x255   : > { %v5098_v52 = vpop.f32.mrf.mxu2 }
 0x256   : > { %6275 = vst [vmem:[#allocation136_spill] sm:$0xff] %v5098_v52  ;;  %3472 = vmatmul.msk.f32.gmra.mxu1 %vm1429_vm0, %v4484_v29  ;;  %v5114_v52 = vpop.f32.mrf.mxu0  ;;  %v5118_v4 = vpop.f32.mrf.mxu3 }
 0x257   : > { %6281 = vst [vmem:[#allocation138_spill] sm:$0xff] %v5114_v52  ;;  %v6288_v52 = vld [vmem:[#allocation30_spill] sm:$0xff] }
 0x258   : > { %6283 = vst [vmem:[#allocation139_spill] sm:$0xff] %v5118_v4  ;;  %v6290_v4 = vld [vmem:[#allocation13_spill] sm:$0xff] }
 0x25a   : > { %3500 = vmatmul.msk.f32.gmra.mxu2 %vm1429_vm0, %v6277_v41  ;;  %3527 = vmatmul.msk.f32.gmra.mxu3 %vm1429_vm0, %v6278_v0 }
 0x25b   : > { %v5108_v63 = vpop.f32.mrf.mxu1 }
 0x25c   : > { %6279 = vst [vmem:[#allocation19_spill] sm:$0xff] %v5108_v63  ;;  %3554 = vmatmul.msk.f32.gmra.mxu0 %vm1429_vm0, %v4303_v28  ;;  %v6285_v63 = vld [vmem:[#allocation12_spill] sm:$0xff] }
 0x25d   : > { %v5112_v14 = vpop.f32.mrf.mxu2 }
 0x25e   : > { %6280 = vst [vmem:[#allocation11_spill] sm:$0xff] %v5112_v14  ;;  %3473 = vmatmul.msk.f32.gmra.mxu1 %vm1429_vm0, %v6282_v17  ;;  %v5132_v36 = vpop.f32.mrf.mxu0  ;;  %v5140_v17 = vpop.f32.mrf.mxu3 }
 0x25f   : > { %6292 = vst [vmem:[#allocation13_spill] sm:$0xff] %v5140_v17 }
 0x262   : > { %3501 = vmatmul.msk.f32.gmra.mxu2 %vm1429_vm0, %v6284_v59  ;;  %3528 = vmatmul.msk.f32.gmra.mxu3 %vm1429_vm0, %v6285_v63 }
 0x263   : > { %v5124_v28 = vpop.f32.mrf.mxu1 }
 0x264   : > { %6286 = vst [vmem:[#allocation23_spill] sm:$0xff] %v5124_v28  ;;  %3555 = vmatmul.msk.f32.gmra.mxu0 %vm1429_vm0, %v4321_v49  ;;  %v2971_v49 = vld [vmem:[%s6048_s5 + $0x30] sm:$0xff] }
 0x265   : > { %v5128_v7 = vpop.f32.mrf.mxu2  ;;  %3082 = vmatpush.msra.mxu3 %v2971_v49  ;;  %v6301_v49 = vld [vmem:[#allocation38_spill] sm:$0xff] }
 0x266   : > { %6287 = vst [vmem:[#allocation12_spill] sm:$0xff] %v5128_v7  ;;  %3474 = vmatmul.msk.f32.gmra.mxu1 %vm1429_vm0, %v6288_v52  ;;  %v6294_v52 = vld [vmem:[#allocation34_spill] sm:$0xff]  ;;  %v5151_v3 = vpop.f32.mrf.mxu0  ;;  %v6296_v7 = vld [vmem:[#allocation32_spill] sm:$0xff] }
 0x267   : > { %6295 = vst [vmem:[#allocation141_spill] sm:$0xff] %v5151_v3  ;;  %v6309_v3 = vld [vmem:[#allocation41_spill] sm:$0xff] }
 0x26a   : > { %3502 = vmatmul.msk.f32.gmra.mxu2 %vm1429_vm0, %v6289_v11  ;;  %3529 = vmatmul.msk.f32.gmra.mxu3 %vm1429_vm0, %v6290_v4 }
 0x26b   : > { %v5138_v40 = vpop.f32.mrf.mxu1 }
 0x26c   : > { %6291 = vst [vmem:[#allocation28_spill] sm:$0xff] %v5138_v40  ;;  %3556 = vmatmul.msk.f32.gmra.mxu0 %vm1429_vm0, %v4341_v10  ;;  %v6297_v40 = vld [vmem:[#allocation14_spill] sm:$0xff] }
 0x26d   : > { %v5147_v28 = vpop.f32.mrf.mxu2 }
 0x26e   : > { %6293 = vst [vmem:[#allocation140_spill] sm:$0xff] %v5147_v28  ;;  %3475 = vmatmul.msk.f32.gmra.mxu1 %vm1429_vm0, %v6294_v52  ;;  %v5163_v28 = vpop.f32.mrf.mxu3  ;;  %v6302_v52 = vld [vmem:[#allocation36_spill] sm:$0xff]  ;;  %v5173_v54 = vpop.f32.mrf.mxu0 }
 0x26f   : > { %6300 = vst [vmem:[#allocation142_spill] sm:$0xff] %v5163_v28  ;;  %v6307_v28 = vld [vmem:[#allocation43_spill] sm:$0xff] }
 0x270   : > { %6305 = vst [vmem:[#allocation15_spill] sm:$0xff] %v5173_v54 }
 0x272   : > { %3503 = vmatmul.msk.f32.gmra.mxu2 %vm1429_vm0, %v6296_v7  ;;  %3530 = vmatmul.msk.f32.gmra.mxu3 %vm1429_vm0, %v6297_v40 }
 0x273   : > { %v5157_v17 = vpop.f32.mrf.mxu1 }
 0x274   : > { %6298 = vst [vmem:[#allocation32_spill] sm:$0xff] %v5157_v17  ;;  %3557 = vmatmul.msk.f32.gmra.mxu0 %vm1429_vm0, %v4359_v38  ;;  %v2062_v38 = vld [vmem:[#allocation5 + $0x188] sm:$0xff] }
 0x275   : > { %v5161_v10 = vpop.f32.mrf.mxu2  ;;  %2670 = vmatpush.msra.mxu2 %v2062_v38 }
 0x276   : > { %6299 = vst [vmem:[#allocation14_spill] sm:$0xff] %v5161_v10  ;;  %3476 = vmatmul.msk.f32.gmra.mxu1 %vm1429_vm0, %v6301_v49  ;;  %v1835_v49 = vld [vmem:[#allocation5 + $0x108] sm:$0xff]  ;;  %v5181_v10 = vpop.f32.mrf.mxu3  ;;  %v5193_v38 = vpop.f32.mrf.mxu0 }
 0x277   : > { %2557 = vmatpush.msra.mxu1 %v1835_v49  ;;  %6308 = vst [vmem:[#allocation144_spill] sm:$0xff] %v5181_v10  ;;  %v6316_v10 = vld [vmem:[#allocation47_spill] sm:$0xff] }
 0x278   : > { %6313 = vst [vmem:[#allocation145_spill] sm:$0xff] %v5193_v38  ;;  %v6323_v38 = vld [vmem:[#allocation22_spill] sm:$0xff] }
 0x27a   : > { %3504 = vmatmul.msk.f32.gmra.mxu2 %vm1429_vm0, %v6302_v52  ;;  %3531 = vmatmul.msk.f32.gmra.mxu3 %vm1429_vm0, %v6303_v33 }
 0x27b   : > { %v5171_v29 = vpop.f32.mrf.mxu1 }
 0x27c   : > { %6304 = vst [vmem:[#allocation36_spill] sm:$0xff] %v5171_v29  ;;  %3558 = vmatmul.msk.f32.gmra.mxu0 %vm1429_vm0, %v4379_v5  ;;  %v6310_v29 = vld [vmem:[#allocation16_spill] sm:$0xff] }
 0x27d   : > { %v5177_v17 = vpop.f32.mrf.mxu2 }
 0x27e   : > { %6306 = vst [vmem:[#allocation143_spill] sm:$0xff] %v5177_v17  ;;  %3477 = vmatmul.msk.f32.gmra.mxu1 %vm1429_vm0, %v6307_v28  ;;  %v6314_v28 = vld [vmem:[#allocation49_spill] sm:$0xff]  ;;  %v5197_v49 = vpop.f32.mrf.mxu3  ;;  %v6317_v17 = vld [vmem:[#allocation18_spill] sm:$0xff] }
 0x27f   : > { %6315 = vst [vmem:[#allocation146_spill] sm:$0xff] %v5197_v49  ;;  %v5214_v49 = vpop.f32.mrf.mxu0 }
 0x280   : > { %6321 = vst [vmem:[#allocation147_spill] sm:$0xff] %v5214_v49  ;;  %v6328_v49 = vld [vmem:[#allocation59_spill] sm:$0xff] }
 0x282   : > { %3505 = vmatmul.msk.f32.gmra.mxu2 %vm1429_vm0, %v6309_v3  ;;  %3532 = vmatmul.msk.f32.gmra.mxu3 %vm1429_vm0, %v6310_v29 }
 0x283   : > { %v5187_v54 = vpop.f32.mrf.mxu1 }
 0x284   : > { %6311 = vst [vmem:[#allocation41_spill] sm:$0xff] %v5187_v54  ;;  %3559 = vmatmul.msk.f32.gmra.mxu0 %vm1429_vm0, %v4399_v53  ;;  %v2970_v53 = vld [vmem:[%s6048_s5 + $0x28] sm:$0xff] }
 0x285   : > { %v5191_v5 = vpop.f32.mrf.mxu2  ;;  %3083 = vmatpush.msra.mxu3 %v2970_v53  ;;  %v6326_v53 = vld [vmem:[#allocation61_spill] sm:$0xff] }
 0x286   : > { %6312 = vst [vmem:[#allocation16_spill] sm:$0xff] %v5191_v5  ;;  %3478 = vmatmul.msk.f32.gmra.mxu1 %vm1429_vm0, %v6314_v28  ;;  %v6320_v28 = vld [vmem:[#allocation55_spill] sm:$0xff]  ;;  %v6322_v5 = vld [vmem:[#allocation53_spill] sm:$0xff] }
 0x28a   : > { %3506 = vmatmul.msk.f32.gmra.mxu2 %vm1429_vm0, %v6316_v10  ;;  %3533 = vmatmul.msk.f32.gmra.mxu3 %vm1429_vm0, %v6317_v17 }
 0x28b   : > { %v5203_v14 = vpop.f32.mrf.mxu1 }
 0x28c   : > { %6318 = vst [vmem:[#allocation47_spill] sm:$0xff] %v5203_v14  ;;  %3560 = vmatmul.msk.f32.gmra.mxu0 %vm1429_vm0, %v4425_v34  ;;  %v5222_v34 = vpop.f32.mrf.mxu3 }
 0x28d   : > { %v5210_v54 = vpop.f32.mrf.mxu2 }
 0x28e   : > { %6319 = vst [vmem:[#allocation18_spill] sm:$0xff] %v5210_v54  ;;  %3479 = vmatmul.msk.f32.gmra.mxu1 %vm1429_vm0, %v6320_v28  ;;  %v5230_v28 = vpop.f32.mrf.mxu0 }
 0x28f   : > { %6327 = vst [vmem:[#allocation149_spill] sm:$0xff] %v5230_v28  ;;  %v1834_v28 = vld [vmem:[#allocation5 + $0x100] sm:$0xff] }
 0x290   : > { %2558 = vmatpush.msra.mxu1 %v1834_v28  ;;  %v6338_v28 = vld [vmem:[#allocation35_spill] sm:$0xff] }
 0x292   : > { %3507 = vmatmul.msk.f32.gmra.mxu2 %vm1429_vm0, %v6322_v5  ;;  %3534 = vmatmul.msk.f32.gmra.mxu3 %vm1429_vm0, %v6323_v38 }
 0x293   : > { %v5220_v14 = vpop.f32.mrf.mxu1 }
 0x294   : > { %6324 = vst [vmem:[#allocation53_spill] sm:$0xff] %v5220_v14  ;;  %3561 = vmatmul.msk.f32.gmra.mxu0 %vm1429_vm0, %v4450_v32  ;;  %v2061_v14 = vld [vmem:[#allocation5 + $0x180] sm:$0xff] }
 0x295   : > { %v5226_v54 = vpop.f32.mrf.mxu2  ;;  %2671 = vmatpush.msra.mxu2 %v2061_v14 }
 0x296   : > { %6325 = vst [vmem:[#allocation148_spill] sm:$0xff] %v5226_v54  ;;  %3480 = vmatmul.msk.f32.gmra.mxu1 %vm1429_vm0, %v6326_v53  ;;  %v5242_v54 = vpop.f32.mrf.mxu3  ;;  %v6332_v53 = vld [vmem:[#allocation67_spill] sm:$0xff] }
 0x29a   : > { %3508 = vmatmul.msk.f32.gmra.mxu2 %vm1429_vm0, %v6328_v49  ;;  %3535 = vmatmul.msk.f32.gmra.mxu3 %vm1429_vm0, %v6329_v22  ;;  %v6334_v22 = vld [vmem:[#allocation31_spill] sm:$0xff] }
 0x29b   : > { %v5236_v38 = vpop.f32.mrf.mxu1 }
 0x29c   : > { %6330 = vst [vmem:[#allocation59_spill] sm:$0xff] %v5236_v38  ;;  %3562 = vmatmul.msk.f32.gmra.mxu0 %vm1429_vm0, %v6277_v41  ;;  %v5252_v41 = vpop.f32.mrf.mxu0 }
 0x29d   : > { %v5240_v32 = vpop.f32.mrf.mxu2  ;;  %6336 = vst [vmem:[#allocation31_spill] sm:$0xff] %v5252_v41 }
 0x29e   : > { %6331 = vst [vmem:[#allocation150_spill] sm:$0xff] %v5240_v32  ;;  %3481 = vmatmul.msk.f32.gmra.mxu1 %vm1429_vm0, %v6332_v53  ;;  %v5260_v53 = vpop.f32.mrf.mxu3 }
 0x2a2   : > { %3509 = vmatmul.msk.f32.gmra.mxu2 %vm1429_vm0, %v6333_v26  ;;  %3536 = vmatmul.msk.f32.gmra.mxu3 %vm1429_vm0, %v6334_v22 }
 0x2a3   : > { %v5250_v38 = vpop.f32.mrf.mxu1 }
 0x2a4   : > { %6335 = vst [vmem:[#allocation65_spill] sm:$0xff] %v5250_v38  ;;  %3563 = vmatmul.msk.f32.gmra.mxu0 %vm1429_vm0, %v6284_v59  ;;  %v2969_v59 = vld [vmem:[%s6048_s5 + $0x20] sm:$0xff] }
 0x2a5   : > { %v5256_v14 = vpop.f32.mrf.mxu2  ;;  %3084 = vmatpush.msra.mxu3 %v2969_v59 }
 0x2a6   : > { %6337 = vst [vmem:[#allocation151_spill] sm:$0xff] %v5256_v14  ;;  %3482 = vmatmul.msk.f32.gmra.mxu1 %vm1429_vm0, %v4773_v42  ;;  %v5275_v42 = vpop.f32.mrf.mxu0  ;;  %v5279_v14 = vpop.f32.mrf.mxu3 }
 0x2aa   : > { %3510 = vmatmul.msk.f32.gmra.mxu2 %vm1429_vm0, %v4757_v9  ;;  %3537 = vmatmul.msk.f32.gmra.mxu3 %vm1429_vm0, %v6338_v28 }
 0x2ab   : > { %v5266_v32 = vpop.f32.mrf.mxu1 }
 0x2ac   : > { %6339 = vst [vmem:[#allocation35_spill] sm:$0xff] %v5266_v32  ;;  %3564 = vmatmul.msk.f32.gmra.mxu0 %vm1429_vm0, %v6289_v11  ;;  %v6341_v32 = vld [vmem:[#allocation40_spill] sm:$0xff] }
 0x2ad   : > { %v5273_v38 = vpop.f32.mrf.mxu2 }
 0x2ae   : > { %6340 = vst [vmem:[#allocation152_spill] sm:$0xff] %v5273_v38  ;;  %3483 = vmatmul.msk.f32.gmra.mxu1 %vm1429_vm0, %v4804_v35  ;;  %v5292_v59 = vpop.f32.mrf.mxu0  ;;  %v6344_v35 = vld [vmem:[#allocation46_spill] sm:$0xff] }
 0x2b2   : > { %3511 = vmatmul.msk.f32.gmra.mxu2 %vm1429_vm0, %v4789_v62  ;;  %3538 = vmatmul.msk.f32.gmra.mxu3 %vm1429_vm0, %v6341_v32  ;;  %v5300_v32 = vpop.f32.mrf.mxu3 }
 0x2b3   : > { %v5285_v11 = vpop.f32.mrf.mxu1 }
 0x2b4   : > { %6342 = vst [vmem:[#allocation153_spill] sm:$0xff] %v5285_v11  ;;  %3565 = vmatmul.msk.f32.gmra.mxu0 %vm1429_vm0, %v6296_v7 }
 0x2b5   : > { %v5289_v38 = vpop.f32.mrf.mxu2 }
 0x2b6   : > { %6343 = vst [vmem:[#allocation154_spill] sm:$0xff] %v5289_v38  ;;  %2188 = vmatmul.f32.gmra.mxu1 %v6223_v60  ;;  %v5307_v11 = vpop.f32.mrf.mxu0 }
 0x2ba   : > { %3512 = vmatmul.msk.f32.gmra.mxu2 %vm1429_vm0, %v4820_v56  ;;  %3539 = vmatmul.msk.f32.gmra.mxu3 %vm1429_vm0, %v6344_v35  ;;  %v6347_v56 = vld [vmem:[#allocation52_spill] sm:$0xff] }
 0x2bb   : > { %v5298_v41 = vpop.f32.mrf.mxu1 }
 0x2bc   : > { %6345 = vst [vmem:[#allocation155_spill] sm:$0xff] %v5298_v41  ;;  %3566 = vmatmul.msk.f32.gmra.mxu0 %vm1429_vm0, %v6302_v52  ;;  %v5319_v52 = vpop.f32.mrf.mxu3 }
 0x2bd   : > { %v5304_v7 = vpop.f32.mrf.mxu2 }
 0x2be   : > { %6346 = vst [vmem:[#allocation156_spill] sm:$0xff] %v5304_v7  ;;  %2191 = vmatmul.f32.gmra.mxu1 %v6223_v60  ;;  %v6350_v7 = vld [vmem:[#allocation58_spill] sm:$0xff] }
 0x2c2   : > { %3513 = vmatmul.msk.f32.gmra.mxu2 %vm1429_vm0, %v4843_v50  ;;  %3540 = vmatmul.msk.f32.gmra.mxu3 %vm1429_vm0, %v6347_v56  ;;  %v5328_v56 = vpop.f32.mrf.mxu0 }
 0x2c3   : > { %v5313_v38 = vpop.f32.mrf.mxu1 }
 0x2c4   : > { %6348 = vst [vmem:[#allocation157_spill] sm:$0xff] %v5313_v38  ;;  %3567 = vmatmul.msk.f32.gmra.mxu0 %vm1429_vm0, %v6309_v3  ;;  %v2968_v3 = vld [vmem:[%s6048_s5 + $0x18] sm:$0xff] }
 0x2c5   : > { %v5317_v41 = vpop.f32.mrf.mxu2  ;;  %3085 = vmatpush.msra.mxu3 %v2968_v3  ;;  %v6357_v3 = vld [vmem:[#allocation20_spill] sm:$0xff] }
 0x2c6   : > { %6349 = vst [vmem:[#allocation158_spill] sm:$0xff] %v5317_v41  ;;  %3574 = vmatmul.msk.f32.vlgmr.msra.gmra.mxu1 %vm1429_vm0, %v4428_v6  ;;  %v6353_v6 = vld [vmem:[#allocation17_spill] sm:$0xff]  ;;  %v5339_v41 = vpop.f32.mrf.mxu3 }
 0x2ca   : > { %2310 = vmatmul.f32.gmra.mxu2 %v6223_v60  ;;  %3541 = vmatmul.msk.f32.gmra.mxu3 %vm1429_vm0, %v6350_v7  ;;  %v5350_v35 = vpop.f32.mrf.mxu0 }
 0x2cb   : > { %v5326_v50 = vpop.f32.mrf.mxu1 }
 0x2cc   : > { %6351 = vst [vmem:[#allocation159_spill] sm:$0xff] %v5326_v50  ;;  %3568 = vmatmul.msk.f32.gmra.mxu0 %vm1429_vm0, %v6316_v10  ;;  %v6354_v50 = vld [vmem:[#allocation64_spill] sm:$0xff] }
 0x2cd   : > { %v5335_v38 = vpop.f32.mrf.mxu2 }
 0x2ce   : > { %6352 = vst [vmem:[#allocation160_spill] sm:$0xff] %v5335_v38  ;;  %3575 = vmatmul.msk.f32.gmra.mxu1 %vm1429_vm0, %v6353_v6  ;;  %v5354_v6 = vpop.f32.mrf.mxu3  ;;  %v6358_v38 = vld [vmem:[#allocation69_spill] sm:$0xff] }
 0x2d2   : > { %2313 = vmatmul.f32.gmra.mxu2 %v6223_v60  ;;  %3542 = vmatmul.msk.f32.gmra.mxu3 %vm1429_vm0, %v6354_v50 }
 0x2d3   : > { %v5344_v7 = vpop.f32.mrf.mxu1 }
 0x2d4   : > { %6355 = vst [vmem:[#allocation17_spill] sm:$0xff] %v5344_v7  ;;  %3569 = vmatmul.msk.f32.gmra.mxu0 %vm1429_vm0, %v6322_v5  ;;  %v6359_v7 = vld [vmem:[#allocation24_spill] sm:$0xff] }
 0x2d5   : > { %v5348_v10 = vpop.f32.mrf.mxu2 }
 0x2d6   : > { %6356 = vst [vmem:[#allocation64_spill] sm:$0xff] %v5348_v10  ;;  %3576 = vmatmul.msk.f32.gmra.mxu1 %vm1429_vm0, %v6357_v3  ;;  %v5368_v10 = vpop.f32.mrf.mxu0 }
 0x2da   : > { %3543 = vmatmul.msk.f32.gmra.mxu3 %vm1429_vm0, %v6358_v38  ;;  %3606 = vmatmul.msk.f32.vlgmr.msra.gmra.mxu2 %vm1429_vm0, %v4615_v25 }
 0x2db   : > { %v5360_v60 = vpop.f32.mrf.mxu1 }
 0x2dc   : > { %3570 = vmatmul.msk.f32.gmra.mxu0 %vm1429_vm0, %v6328_v49 }
 0x2dd   : > { %v5364_v5 = vpop.f32.mrf.mxu2 }
 0x2de   : > { %3577 = vmatmul.msk.f32.gmra.mxu1 %vm1429_vm0, %v6359_v7  ;;  %v5380_v49 = vpop.f32.mrf.mxu0 }
 0x2e2   : > { %3607 = vmatmul.msk.f32.gmra.mxu2 %vm1429_vm0, %v4647_v47  ;;  %v2967_v47 = vld [vmem:[%s6048_s5 + $0x10] sm:$0xff] }
 0x2e3   : > { %v5372_v3 = vpop.f32.mrf.mxu1  ;;  %3086 = vmatpush.msra.mxu3 %v2967_v47 }
 0x2e4   : > { %3571 = vmatmul.msk.f32.gmra.mxu0 %vm1429_vm0, %v6333_v26 }
 0x2e5   : > { %v5376_v25 = vpop.f32.mrf.mxu2 }
 0x2e6   : > { %3578 = vmatmul.msk.f32.gmra.mxu1 %vm1429_vm0, %v4527_v20 }
 0x2ea   : > { %3608 = vmatmul.msk.f32.gmra.mxu2 %vm1429_vm0, %v4676_v31  ;;  %v5399_v31 = vpop.f32.mrf.mxu0 }
 0x2eb   : > { %v5384_v7 = vpop.f32.mrf.mxu1 }
 0x2ec   : > { %3572 = vmatmul.msk.f32.gmra.mxu0 %vm1429_vm0, %v4757_v9 }
 0x2ed   : > { %v5391_v26 = vpop.f32.mrf.mxu2 }
 0x2ee   : > { %3579 = vmatmul.msk.f32.gmra.mxu1 %vm1429_vm0, %v4201_v8 }
 0x2f2   : > { %3609 = vmatmul.msk.f32.gmra.mxu2 %vm1429_vm0, %v4708_v21  ;;  %v5415_v21 = vpop.f32.mrf.mxu3 }
 0x2f3   : > { %v5397_v20 = vpop.f32.mrf.mxu1 }
 0x2f4   : > { %6360 = vst [vmem:[#allocation20_spill] sm:$0xff] %v5397_v20  ;;  %3573 = vmatmul.msk.f32.gmra.mxu0 %vm1429_vm0, %v4789_v62 }
 0x2f5   : > { %v5403_v9 = vpop.f32.mrf.mxu2 }
 0x2f6   : > { %3580 = vmatmul.msk.f32.gmra.mxu1 %vm1429_vm0, %v4207_v12 }
 0x2fa   : > { %3610 = vmatmul.msk.f32.gmra.mxu2 %vm1429_vm0, %v4738_v44  ;;  %v5425_v12 = vpop.f32.mrf.mxu3 }
 0x2fb   : > { %v5409_v47 = vpop.f32.mrf.mxu1 }
 0x2fc   : > { %6361 = vst [vmem:[#allocation69_spill] sm:$0xff] %v5409_v47 }
 0x2fd   : > { %v5411_v8 = vpop.f32.mrf.mxu2 }
 0x2fe   : > { %3581 = vmatmul.msk.f32.gmra.mxu1 %vm1429_vm0, %v4215_v18  ;;  %v2966_v18 = vld [vmem:[%s6048_s5 + $0x8] sm:$0xff] }
 0x2ff   : > { %3087 = vmatpush.msra.mxu3 %v2966_v18 }
 0x302   : > { %3611 = vmatmul.msk.f32.gmra.mxu2 %vm1429_vm0, %v4226_v24  ;;  %v5440_v24 = vpop.f32.mrf.mxu3 }
 0x303   : > { %v5419_v62 = vpop.f32.mrf.mxu1 }
 0x305   : > { %v5421_v20 = vpop.f32.mrf.mxu2 }
 0x306   : > { %3582 = vmatmul.msk.f32.gmra.mxu1 %vm1429_vm0, %v4232_v30 }
 0x30a   : > { %3612 = vmatmul.msk.f32.gmra.mxu2 %vm1429_vm0, %v4243_v39  ;;  %v5452_v18 = vpop.f32.mrf.mxu3 }
 0x30b   : > { %v5429_v44 = vpop.f32.mrf.mxu1 }
 0x30c   : > { %6362 = vst [vmem:[#allocation24_spill] sm:$0xff] %v5429_v44 }
 0x30d   : > { %v5434_v47 = vpop.f32.mrf.mxu2 }
 0x30e   : > { %3583 = vmatmul.msk.f32.gmra.mxu1 %vm1429_vm0, %v4253_v45 }
 0x312   : > { %3613 = vmatmul.msk.f32.gmra.mxu2 %vm1429_vm0, %v4262_v51 }
 0x313   : > { %v5442_v30 = vpop.f32.mrf.mxu1 }
 0x314   : > { %6363 = vst [vmem:[#allocation161_spill] sm:$0xff] %v5442_v30 }
 0x315   : > { %v5444_v39 = vpop.f32.mrf.mxu2 }
 0x316   : > { %3584 = vmatmul.msk.f32.gmra.mxu1 %vm1429_vm0, %v4273_v2  ;;  %v5466_v2 = vpop.f32.mrf.mxu3 }
 0x31a   : > { %3614 = vmatmul.msk.f32.gmra.mxu2 %vm1429_vm0, %v4281_v13 }
 0x31b   : > { %v5450_v44 = vpop.f32.mrf.mxu1 }
 0x31c   : > { %6364 = vst [vmem:[#allocation162_spill] sm:$0xff] %v5450_v44 }
 0x31d   : > { %v5454_v45 = vpop.f32.mrf.mxu2 }
 0x31e   : > { %6365 = vst [vmem:[#allocation163_spill] sm:$0xff] %v5454_v45  ;;  %3585 = vmatmul.msk.f32.gmra.mxu1 %vm1429_vm0, %v4291_v19  ;;  %v2965_v19 = vld [vmem:[%s6048_s5] sm:$0xff]  ;;  %v5552_v45 = vpop.f32.mrf.mxu0 }
 0x31f   : > { %3088 = vmatpush.msra.mxu3 %v2965_v19 }
 0x322   : > { %3615 = vmatmul.msk.f32.gmra.mxu2 %vm1429_vm0, %v4300_v27  ;;  %v5479_v27 = vpop.f32.mrf.mxu3 }
 0x323   : > { %v5460_v51 = vpop.f32.mrf.mxu1 }
 0x324   : > { %6366 = vst [vmem:[#allocation164_spill] sm:$0xff] %v5460_v51 }
 0x325   : > { %v5462_v30 = vpop.f32.mrf.mxu2 }
 0x326   : > { %6367 = vst [vmem:[#allocation165_spill] sm:$0xff] %v5462_v30  ;;  %3586 = vmatmul.msk.f32.gmra.mxu1 %vm1429_vm0, %v4311_v37 }
 0x32a   : > { %3616 = vmatmul.msk.f32.gmra.mxu2 %vm1429_vm0, %v4319_v48 }
 0x32b   : > { %v5470_v13 = vpop.f32.mrf.mxu1 }
 0x32c   : > { %6368 = vst [vmem:[#allocation166_spill] sm:$0xff] %v5470_v13  ;;  %v5491_v13 = vpop.f32.mrf.mxu3 }
 0x32d   : > { %v5475_v44 = vpop.f32.mrf.mxu2 }
 0x32e   : > { %6369 = vst [vmem:[#allocation167_spill] sm:$0xff] %v5475_v44  ;;  %3587 = vmatmul.msk.f32.gmra.mxu1 %vm1429_vm0, %v4329_v58 }
 0x332   : > { %3617 = vmatmul.msk.f32.gmra.mxu2 %vm1429_vm0, %v6278_v0 }
 0x333   : > { %v5483_v37 = vpop.f32.mrf.mxu1 }
 0x334   : > { %6370 = vst [vmem:[#allocation168_spill] sm:$0xff] %v5483_v37  ;;  %v5501_v37 = vpop.f32.mrf.mxu3 }
 0x335   : > { %v5485_v48 = vpop.f32.mrf.mxu2 }
 0x336   : > { %6371 = vst [vmem:[#allocation169_spill] sm:$0xff] %v5485_v48  ;;  %3588 = vmatmul.msk.f32.gmra.mxu1 %vm1429_vm0, %v4349_v23 }
 0x33a   : > { %3618 = vmatmul.msk.f32.gmra.mxu2 %vm1429_vm0, %v6285_v63 }
 0x33b   : > { %v5493_v19 = vpop.f32.mrf.mxu1 }
 0x33c   : > { %6372 = vst [vmem:[#allocation170_spill] sm:$0xff] %v5493_v19 }
 0x33d   : > { %v5495_v58 = vpop.f32.mrf.mxu2 }
 0x33e   : > { %6373 = vst [vmem:[#allocation171_spill] sm:$0xff] %v5495_v58  ;;  %3589 = vmatmul.msk.f32.gmra.mxu1 %vm1429_vm0, %v4367_v46  ;;  %v5513_v46 = vpop.f32.mrf.mxu3 }
 0x342   : > { %3619 = vmatmul.msk.f32.gmra.mxu2 %vm1429_vm0, %v6290_v4 }
 0x343   : > { %v2560_v0 = vpop.f32.mrf.mxu1 }
 0x345   : > { %v5503_v51 = vpop.f32.mrf.mxu2 }
 0x346   : > { %6374 = vst [vmem:[#allocation172_spill] sm:$0xff] %v5503_v51  ;;  %3590 = vmatmul.msk.f32.gmra.mxu1 %vm1429_vm0, %v4386_v16  ;;  %v5521_v16 = vpop.f32.mrf.mxu3 }
 0x34a   : > { %3620 = vmatmul.msk.f32.gmra.mxu2 %vm1429_vm0, %v6297_v40 }
 0x34b   : > { %v2563_v23 = vpop.f32.mrf.mxu1 }
 0x34d   : > { %v5509_v63 = vpop.f32.mrf.mxu2 }
 0x34e   : > { %6375 = vst [vmem:[#allocation173_spill] sm:$0xff] %v5509_v63  ;;  %3591 = vmatmul.msk.f32.gmra.mxu1 %vm1429_vm0, %v4408_v55  ;;  %v2335_v55 = vadd.f32 %v5222_v34, %v4853_v57  ;;  %v2448_v63 = vadd.f32 %v5275_v42, %v4993_v1  ;;  %v5540_v42 = vpop.f32.mrf.mxu3  ;;  %v6377_v1 = vld [vmem:[#allocation88_spill] sm:$0xff]  ;;  %v6379_v34 = vld [vmem:[#allocation11_spill] sm:$0xff] }
 0x352   : > { %3621 = vmatmul.msk.f32.gmra.mxu2 %vm1429_vm0, %v6303_v33  ;;  %v2561_v33 = vadd.f32 %v2560_v0, %v5132_v36  ;;  %v2338_v36 = vadd.f32 %v5242_v54, %v6377_v1  ;;  %v6383_v1 = vld [vmem:[#allocation22_spill] sm:$0xff] }
 0x353   : > { %v2566_v4 = vpop.f32.mrf.mxu1 }
 0x355   : > { %v5517_v19 = vpop.f32.mrf.mxu2 }
 0x356   : > { %6376 = vst [vmem:[#allocation174_spill] sm:$0xff] %v5517_v19  ;;  %3592 = vmatmul.msk.f32.gmra.mxu1 %vm1429_vm0, %v4436_v15  ;;  %v2769_v15 = vadd.f32 %v2448_v63, %v2335_v55  ;;  %v6381_v55 = vld [vmem:[#allocation131_spill] sm:$0xff] }
 0x35a   : > { %3622 = vmatmul.msk.f32.gmra.mxu2 %vm1429_vm0, %v6310_v29  ;;  %v5536_v29 = vld [vmem:[%s6047_s4] ss:$0 sm:$0xff] }
 0x35b   : > { %v2569_v40 = vpop.f32.mrf.mxu1 }
 0x35d   : > { %v2673_v51 = vpop.f32.mrf.mxu2 }
 0x35e   : > { %v2674_v19 = vadd.f32 %v2673_v51, %v5059_v61  ;;  %3593 = vmatmul.msk.f32.gmra.mxu1 %vm1429_vm0, %v4459_v43  ;;  %v6378_v61 = vld [vmem:[#allocation118_spill] sm:$0xff] }
 0x35f   : > { %v2451_v43 = vadd.f32 %v5292_v59, %v6378_v61  ;;  %v6385_v61 = vld [vmem:[#allocation12_spill] sm:$0xff] }
 0x360   : > { %v2801_v58 = vadd.f32 %v2674_v19, %v2561_v33 }
 0x362   : > { %v2833_v48 = vadd.f32 %v2801_v58, %v2769_v15  ;;  %3623 = vmatmul.msk.f32.gmra.mxu2 %vm1429_vm0, %v6317_v17  ;;  %v6380_v58 = vld [vmem:[#allocation141_spill] sm:$0xff]  ;;  %v2770_v17 = vadd.f32 %v2451_v43, %v2338_v36  ;;  %v6386_v36 = vld [vmem:[#allocation92_spill] sm:$0xff] }
 0x363   : > { %v2572_v57 = vpop.f32.mrf.mxu1  ;;  %v2564_v0 = vadd.f32 %v2563_v23, %v6380_v58  ;;  %v6382_v15 = vld [vmem:[#allocation21_spill] sm:$0xff]  ;;  %v2341_v43 = vadd.f32 %v5260_v53, %v6386_v36  ;;  %v6387_v58 = vld [vmem:[#allocation15_spill] sm:$0xff] }
 0x364   : > { %v2865_v51 = vadd.f32 %v2833_v48, %v6379_v34  ;;  %v6384_v48 = vld [vmem:[#allocation123_spill] sm:$0xff] }
 0x365   : > { %v2676_v19 = vpop.f32.mrf.mxu2  ;;  %v2454_v23 = vadd.f32 %v5307_v11, %v6384_v48  ;;  %v6391_v53 = vld [vmem:[#allocation127_spill] sm:$0xff]  ;;  %v5574_v48 = vpop.f32.mrf.mxu0 }
 0x366   : > { %v2901_v63 = vadd.f32 %v5536_v29, %v2865_v51  ;;  %v2677_v33 = vadd.f32 %v2676_v19, %v6381_v55  ;;  %3594 = vmatmul.msk.f32.gmra.mxu1 %vm1429_vm0, %v6382_v15  ;;  %v5560_v51 = vpop.f32.mrf.mxu3  ;;  %v6389_v55 = vld [vmem:[#allocation26_spill] sm:$0xff] }
 0x368   : > { %v2933_v44 = vmax.f32 %v2901_v63, 0.0  ;;  %v2802_v30 = vadd.f32 %v2677_v33, %v2564_v0  ;;  %v2567_v0 = vadd.f32 %v2566_v4, %v6387_v58  ;;  %v2771_v33 = vadd.f32 %v2454_v23, %v2341_v43  ;;  %v6393_v58 = vld [vmem:[#allocation96_spill] sm:$0xff] }
 0x369   : > { %v2457_v4 = vadd.f32 %v5328_v56, %v6391_v53  ;;  %v2344_v23 = vadd.f32 %v5279_v14, %v6393_v58 }
 0x36a   : > { %v2834_v54 = vadd.f32 %v2802_v30, %v2770_v17  ;;  %3624 = vmatmul.msk.f32.gmra.mxu2 %vm1429_vm0, %v6383_v1  ;;  %3636 = vmatmul.msk.f32.vlgmr.msra.gmra.mxu3 %vm1429_vm0, %v2933_v44  ;;  %v6388_v30 = vld [vmem:[#allocation134_spill] sm:$0xff] }
 0x36b   : > { %v2575_v59 = vpop.f32.mrf.mxu1  ;;  %v2772_v56 = vadd.f32 %v2457_v4, %v2344_v23  ;;  %v6400_v4 = vld [vmem:[#allocation147_spill] sm:$0xff] }
 0x36c   : > { %v2866_v34 = vadd.f32 %v2834_v54, %v6385_v61  ;;  %v6390_v54 = vld [vmem:[#allocation27_spill] sm:$0xff]  ;;  %v6392_v61 = vld [vmem:[#allocation140_spill] sm:$0xff]  ;;  %v2573_v23 = vadd.f32 %v2572_v57, %v6400_v4  ;;  %v6408_v4 = vld [vmem:[#allocation38_spill] sm:$0xff] }
 0x36d   : > { %v2679_v19 = vpop.f32.mrf.mxu2  ;;  %v5594_v58 = vpop.f32.mrf.mxu0  ;;  %v6403_v57 = vld [vmem:[#allocation135_spill] sm:$0xff] }
 0x36e   : > { %v2680_v63 = vadd.f32 %v2679_v19, %v6388_v30  ;;  %3595 = vmatmul.msk.f32.gmra.mxu1 %vm1429_vm0, %v6389_v55  ;;  %v2902_v44 = vadd.f32 %v5536_v29, %v2866_v34  ;;  %v6394_v34 = vld [vmem:[#allocation145_spill] sm:$0xff] }
 0x36f   : > { %v2570_v43 = vadd.f32 %v2569_v40, %v6394_v34  ;;  %v6397_v40 = vld [vmem:[#allocation130_spill] sm:$0xff]  ;;  %v6401_v34 = vld [vmem:[#allocation23_spill] sm:$0xff] }
 0x370   : > { %v2803_v15 = vadd.f32 %v2680_v63, %v2567_v0  ;;  %v2934_v11 = vmax.f32 %v2902_v44, 0.0  ;;  %v6395_v0 = vld [vmem:[#allocation19_spill] sm:$0xff]  ;;  %v6396_v63 = vld [vmem:[#allocation30_spill] sm:$0xff]  ;;  %v5584_v44 = vpop.f32.mrf.mxu3 }
 0x372   : > { %v2835_v17 = vadd.f32 %v2803_v15, %v2771_v33  ;;  %3625 = vmatmul.msk.f32.gmra.mxu2 %vm1429_vm0, %v6390_v54  ;;  %3637 = vmatmul.msk.f32.gmra.mxu3 %vm1429_vm0, %v2934_v11  ;;  %v6398_v54 = vld [vmem:[#allocation14_spill] sm:$0xff] }
 0x373   : > { %v2578_v1 = vpop.f32.mrf.mxu1 }
 0x374   : > { %v2867_v19 = vadd.f32 %v2835_v17, %v6392_v61  ;;  %v2460_v17 = vadd.f32 %v5350_v35, %v6397_v40 }
 0x375   : > { %v2682_v36 = vpop.f32.mrf.mxu2 }
 0x376   : > { %v2683_v30 = vadd.f32 %v2682_v36, %v6395_v0  ;;  %3596 = vmatmul.msk.f32.gmra.mxu1 %vm1429_vm0, %v6396_v63  ;;  %v2903_v55 = vadd.f32 %v5536_v29, %v2867_v19  ;;  %v6399_v36 = vld [vmem:[#allocation101_spill] sm:$0xff]  ;;  %v6402_v0 = vld [vmem:[#allocation34_spill] sm:$0xff] }
 0x377   : > { %v2347_v19 = vadd.f32 %v5300_v32, %v6399_v36  ;;  %v6407_v36 = vld [vmem:[#allocation28_spill] sm:$0xff] }
 0x378   : > { %v2804_v33 = vadd.f32 %v2683_v30, %v2570_v43  ;;  %v2935_v15 = vmax.f32 %v2903_v55, 0.0  ;;  %v5601_v55 = vpop.f32.mrf.mxu3 }
 0x379   : > { %v2773_v30 = vadd.f32 %v2460_v17, %v2347_v19 }
 0x37a   : > { %v2836_v11 = vadd.f32 %v2804_v33, %v2772_v56  ;;  %3626 = vmatmul.msk.f32.gmra.mxu2 %vm1429_vm0, %v6334_v22  ;;  %3638 = vmatmul.msk.f32.gmra.mxu3 %vm1429_vm0, %v2935_v15  ;;  %v2463_v33 = vadd.f32 %v5368_v10, %v6403_v57  ;;  %v6404_v15 = vld [vmem:[#allocation143_spill] sm:$0xff] }
 0x37b   : > { %v2581_v14 = vpop.f32.mrf.mxu1 }
 0x37c   : > { %v2868_v53 = vadd.f32 %v2836_v11, %v6398_v54  ;;  %v6405_v54 = vld [vmem:[#allocation106_spill] sm:$0xff] }
 0x37d   : > { %v2685_v61 = vpop.f32.mrf.mxu2  ;;  %v2350_v17 = vadd.f32 %v5319_v52, %v6405_v54  ;;  %v6414_v54 = vld [vmem:[#allocation32_spill] sm:$0xff] }
 0x37e   : > { %v2686_v43 = vadd.f32 %v2685_v61, %v6401_v34  ;;  %3597 = vmatmul.msk.f32.gmra.mxu1 %vm1429_vm0, %v6402_v0  ;;  %v2904_v22 = vadd.f32 %v5536_v29, %v2868_v53  ;;  %v6406_v53 = vld [vmem:[#allocation149_spill] sm:$0xff]  ;;  %v5616_v34 = vpop.f32.mrf.mxu0 }
 0x37f   : > { %v2576_v61 = vadd.f32 %v2575_v59, %v6406_v53  ;;  %v6415_v53 = vld [vmem:[#allocation43_spill] sm:$0xff] }
 0x380   : > { %v2805_v63 = vadd.f32 %v2686_v43, %v2573_v23  ;;  %v2936_v35 = vmax.f32 %v2904_v22, 0.0  ;;  %v2774_v23 = vadd.f32 %v2463_v33, %v2350_v17  ;;  %v6409_v22 = vld [vmem:[#allocation40_spill] sm:$0xff]  ;;  %v5621_v52 = vpop.f32.mrf.mxu3  ;;  %v6412_v33 = vld [vmem:[#allocation110_spill] sm:$0xff] }
 0x382   : > { %v2837_v56 = vadd.f32 %v2805_v63, %v2773_v30  ;;  %3627 = vmatmul.msk.f32.gmra.mxu2 %vm1429_vm0, %v6338_v28  ;;  %3639 = vmatmul.msk.f32.gmra.mxu3 %vm1429_vm0, %v2936_v35  ;;  %v6410_v30 = vld [vmem:[#allocation138_spill] sm:$0xff]  ;;  %v6411_v35 = vld [vmem:[#allocation16_spill] sm:$0xff] }
 0x383   : > { %v2584_v32 = vpop.f32.mrf.mxu1  ;;  %v2466_v63 = vadd.f32 %v5380_v49, %v6410_v30 }
 0x384   : > { %v2869_v11 = vadd.f32 %v2837_v56, %v6404_v15  ;;  %v2353_v15 = vadd.f32 %v5339_v41, %v6412_v33  ;;  %v6421_v33 = vld [vmem:[#allocation36_spill] sm:$0xff] }
 0x385   : > { %v2688_v40 = vpop.f32.mrf.mxu2 }
 0x386   : > { %v2689_v19 = vadd.f32 %v2688_v40, %v6407_v36  ;;  %3598 = vmatmul.msk.f32.gmra.mxu1 %vm1429_vm0, %v6408_v4  ;;  %v2905_v28 = vadd.f32 %v5536_v29, %v2869_v11  ;;  %v6413_v11 = vld [vmem:[#allocation31_spill] sm:$0xff]  ;;  %v2775_v36 = vadd.f32 %v2466_v63, %v2353_v15  ;;  %v6419_v63 = vld [vmem:[#allocation25_spill] sm:$0xff] }
 0x387   : > { %v2579_v40 = vadd.f32 %v2578_v1, %v6413_v11  ;;  %v6417_v1 = vld [vmem:[#allocation39_spill] sm:$0xff]  ;;  %v6422_v11 = vld [vmem:[#allocation49_spill] sm:$0xff] }
 0x388   : > { %v2806_v43 = vadd.f32 %v2689_v19, %v2576_v61  ;;  %v2937_v10 = vmax.f32 %v2905_v28, 0.0  ;;  %v5633_v28 = vpop.f32.mrf.mxu0 }
 0x38a   : > { %v2838_v0 = vadd.f32 %v2806_v43, %v2774_v23  ;;  %3628 = vmatmul.msk.f32.gmra.mxu2 %vm1429_vm0, %v6409_v22  ;;  %3640 = vmatmul.msk.f32.gmra.mxu3 %vm1429_vm0, %v2937_v10  ;;  %v6416_v23 = vld [vmem:[#allocation46_spill] sm:$0xff]  ;;  %v2469_v43 = vadd.f32 %v5399_v31, %v6417_v1  ;;  %v5641_v22 = vpop.f32.mrf.mxu3  ;;  %v6426_v1 = vld [vmem:[#allocation29_spill] sm:$0xff] }
 0x38b   : > { %v2587_v59 = vpop.f32.mrf.mxu1  ;;  %v6418_v10 = vld [vmem:[#allocation18_spill] sm:$0xff] }
 0x38c   : > { %v2870_v56 = vadd.f32 %v2838_v0, %v6411_v35  ;;  %v2356_v35 = vadd.f32 %v5354_v6, %v6419_v63  ;;  %v6424_v6 = vld [vmem:[#allocation44_spill] sm:$0xff] }
 0x38d   : > { %v2691_v57 = vpop.f32.mrf.mxu2 }
 0x38e   : > { %v2692_v17 = vadd.f32 %v2691_v57, %v6414_v54  ;;  %3599 = vmatmul.msk.f32.gmra.mxu1 %vm1429_vm0, %v6415_v53  ;;  %v2906_v61 = vadd.f32 %v5536_v29, %v2870_v56  ;;  %v6420_v56 = vld [vmem:[#allocation45_spill] sm:$0xff]  ;;  %v2776_v54 = vadd.f32 %v2469_v43, %v2356_v35  ;;  %v2359_v43 = vadd.f32 %v5415_v21, %v6426_v1  ;;  %v6429_v35 = vld [vmem:[#allocation55_spill] sm:$0xff] }
 0x38f   : > { %v2582_v57 = vadd.f32 %v2581_v14, %v6420_v56  ;;  %v2472_v14 = vadd.f32 %v5552_v45, %v6424_v6 }
 0x390   : > { %v2807_v19 = vadd.f32 %v2692_v17, %v2579_v40  ;;  %v2938_v4 = vmax.f32 %v2906_v61, 0.0  ;;  %v6423_v61 = vld [vmem:[#allocation52_spill] sm:$0xff] }
 0x391   : > { %v2777_v45 = vadd.f32 %v2472_v14, %v2359_v43  ;;  %v6434_v14 = vld [vmem:[#allocation57_spill] sm:$0xff] }
 0x392   : > { %v2839_v49 = vadd.f32 %v2807_v19, %v2775_v36  ;;  %3629 = vmatmul.msk.f32.gmra.mxu2 %vm1429_vm0, %v6416_v23  ;;  %3641 = vmatmul.msk.f32.gmra.mxu3 %vm1429_vm0, %v2938_v4  ;;  %v5655_v19 = vpop.f32.mrf.mxu0  ;;  %v6425_v4 = vld [vmem:[#allocation148_spill] sm:$0xff]  ;;  %v6436_v43 = vld [vmem:[#allocation61_spill] sm:$0xff] }
 0x393   : > { %v2590_v41 = vpop.f32.mrf.mxu1 }
 0x394   : > { %v2871_v0 = vadd.f32 %v2839_v49, %v6418_v10  ;;  %v6427_v10 = vld [vmem:[#allocation51_spill] sm:$0xff] }
 0x395   : > { %v2694_v30 = vpop.f32.mrf.mxu2 }
 0x396   : > { %v2695_v15 = vadd.f32 %v2694_v30, %v6421_v33  ;;  %3600 = vmatmul.msk.f32.gmra.mxu1 %vm1429_vm0, %v6422_v11  ;;  %v2907_v40 = vadd.f32 %v5536_v29, %v2871_v0  ;;  %v2585_v0 = vadd.f32 %v2584_v32, %v6427_v10  ;;  %v6428_v30 = vld [vmem:[#allocation41_spill] sm:$0xff]  ;;  %v6431_v32 = vld [vmem:[#allocation50_spill] sm:$0xff] }
 0x398   : > { %v2808_v17 = vadd.f32 %v2695_v15, %v2582_v57  ;;  %v2939_v31 = vmax.f32 %v2907_v40, 0.0  ;;  %v5665_v57 = vpop.f32.mrf.mxu3  ;;  %v6430_v40 = vld [vmem:[#allocation58_spill] sm:$0xff] }
 0x39a   : > { %v2840_v53 = vadd.f32 %v2808_v17, %v2776_v54  ;;  %3630 = vmatmul.msk.f32.gmra.mxu2 %vm1429_vm0, %v6423_v61  ;;  %3642 = vmatmul.msk.f32.gmra.mxu3 %vm1429_vm0, %v2939_v31  ;;  %v2475_v54 = vadd.f32 %v5574_v48, %v6431_v32  ;;  %v6432_v17 = vld [vmem:[#allocation150_spill] sm:$0xff]  ;;  %v6433_v61 = vld [vmem:[#allocation33_spill] sm:$0xff]  ;;  %v6440_v32 = vld [vmem:[#allocation63_spill] sm:$0xff] }
 0x39b   : > { %v2593_v36 = vpop.f32.mrf.mxu1  ;;  %v2362_v6 = vadd.f32 %v5425_v12, %v6433_v61 }
 0x39c   : > { %v2872_v49 = vadd.f32 %v2840_v53, %v6425_v4  ;;  %v5675_v4 = vpop.f32.mrf.mxu0 }
 0x39d   : > { %v2697_v23 = vpop.f32.mrf.mxu2 }
 0x39e   : > { %v2698_v63 = vadd.f32 %v2697_v23, %v6428_v30  ;;  %3601 = vmatmul.msk.f32.gmra.mxu1 %vm1429_vm0, %v6429_v35  ;;  %v2908_v56 = vadd.f32 %v5536_v29, %v2872_v49  ;;  %v2588_v49 = vadd.f32 %v2587_v59, %v6434_v14  ;;  %v6435_v23 = vld [vmem:[#allocation47_spill] sm:$0xff]  ;;  %v6437_v59 = vld [vmem:[#allocation56_spill] sm:$0xff] }
 0x3a0   : > { %v2809_v33 = vadd.f32 %v2698_v63, %v2585_v0  ;;  %v2940_v15 = vmax.f32 %v2908_v56, 0.0  ;;  %v2778_v0 = vadd.f32 %v2475_v54, %v2362_v6  ;;  %v5682_v63 = vpop.f32.mrf.mxu3  ;;  %v2478_v56 = vadd.f32 %v5594_v58, %v6437_v59 }
 0x3a1   : > { %v2591_v54 = vadd.f32 %v2590_v41, %v6440_v32 }
 0x3a2   : > { %v2841_v11 = vadd.f32 %v2809_v33, %v2777_v45  ;;  %3631 = vmatmul.msk.f32.gmra.mxu2 %vm1429_vm0, %v6430_v40  ;;  %3643 = vmatmul.msk.f32.gmra.mxu3 %vm1429_vm0, %v2940_v15  ;;  %v6438_v45 = vld [vmem:[#allocation151_spill] sm:$0xff] }
 0x3a3   : > { %v2596_v21 = vpop.f32.mrf.mxu1 }
 0x3a4   : > { %v2873_v31 = vadd.f32 %v2841_v11, %v6432_v17  ;;  %v6439_v11 = vld [vmem:[#allocation37_spill] sm:$0xff]  ;;  %v5697_v6 = vpop.f32.mrf.mxu0 }
 0x3a5   : > { %v2700_v53 = vpop.f32.mrf.mxu2  ;;  %v2365_v40 = vadd.f32 %v5440_v24, %v6439_v11  ;;  %v6441_v17 = vld [vmem:[#allocation53_spill] sm:$0xff] }
 0x3a6   : > { %v2701_v1 = vadd.f32 %v2700_v53, %v6435_v23  ;;  %3602 = vmatmul.msk.f32.gmra.mxu1 %vm1429_vm0, %v6436_v43  ;;  %v2909_v10 = vadd.f32 %v5536_v29, %v2873_v31  ;;  %v6442_v53 = vld [vmem:[#allocation67_spill] sm:$0xff]  ;;  %v6443_v23 = vld [vmem:[#allocation62_spill] sm:$0xff]  ;;  %v6444_v43 = vld [vmem:[#allocation152_spill] sm:$0xff] }
 0x3a7   : > { %v2779_v61 = vadd.f32 %v2478_v56, %v2365_v40  ;;  %v6447_v56 = vld [vmem:[#allocation59_spill] sm:$0xff] }
 0x3a8   : > { %v2810_v30 = vadd.f32 %v2701_v1, %v2588_v49  ;;  %v2941_v48 = vmax.f32 %v2909_v10, 0.0  ;;  %v5702_v24 = vpop.f32.mrf.mxu3  ;;  %v2481_v1 = vadd.f32 %v5616_v34, %v6443_v23 }
 0x3aa   : > { %v2842_v35 = vadd.f32 %v2810_v30, %v2778_v0  ;;  %3632 = vmatmul.msk.f32.gmra.mxu2 %vm1429_vm0, %v6354_v50  ;;  %3644 = vmatmul.msk.f32.gmra.mxu3 %vm1429_vm0, %v2941_v48  ;;  %v6445_v30 = vld [vmem:[#allocation42_spill] sm:$0xff] }
 0x3ab   : > { %v2599_v12 = vpop.f32.mrf.mxu1  ;;  %v2368_v48 = vadd.f32 %v5452_v18, %v6445_v30 }
 0x3ac   : > { %v2874_v33 = vadd.f32 %v2842_v35, %v6438_v45  ;;  %v6446_v35 = vld [vmem:[#allocation70_spill] sm:$0xff]  ;;  %v5714_v32 = vpop.f32.mrf.mxu0 }
 0x3ad   : > { %v2703_v15 = vpop.f32.mrf.mxu2  ;;  %v2594_v59 = vadd.f32 %v2593_v36, %v6446_v35  ;;  %v6450_v36 = vld [vmem:[#allocation68_spill] sm:$0xff] }
 0x3ae   : > { %v2704_v31 = vadd.f32 %v2703_v15, %v6441_v17  ;;  %3603 = vmatmul.msk.f32.gmra.mxu1 %vm1429_vm0, %v6442_v53  ;;  %v2910_v50 = vadd.f32 %v5536_v29, %v2874_v33  ;;  %v6448_v33 = vld [vmem:[#allocation72_spill] sm:$0xff]  ;;  %v2780_v15 = vadd.f32 %v2481_v1, %v2368_v48  ;;  %v2484_v17 = vadd.f32 %v5633_v28, %v6450_v36  ;;  %v6454_v1 = vld [vmem:[#allocation65_spill] sm:$0xff]  ;;  %v6461_v36 = vld [vmem:[#allocation35_spill] sm:$0xff] }
 0x3b0   : > { %v2811_v14 = vadd.f32 %v2704_v31, %v2591_v54  ;;  %v2942_v58 = vmax.f32 %v2910_v50, 0.0  ;;  %v6449_v54 = vld [vmem:[#allocation74_spill] sm:$0xff]  ;;  %v5722_v50 = vpop.f32.mrf.mxu3 }
 0x3b1   : > { %v6451_v31 = vld [vmem:[#allocation154_spill] sm:$0xff] }
 0x3b2   : > { %v2843_v49 = vadd.f32 %v2811_v14, %v2779_v61  ;;  %3633 = vmatmul.msk.f32.gmra.mxu2 %vm1429_vm0, %v6358_v38  ;;  %3645 = vmatmul.msk.f32.gmra.mxu3 %vm1429_vm0, %v2942_v58  ;;  %v6452_v14 = vld [vmem:[#allocation48_spill] sm:$0xff] }
 0x3b3   : > { %v2602_v41 = vpop.f32.mrf.mxu1  ;;  %v2371_v58 = vadd.f32 %v5466_v2, %v6452_v14  ;;  %v6457_v2 = vld [vmem:[#allocation73_spill] sm:$0xff] }
 0x3b4   : > { %v2875_v10 = vadd.f32 %v2843_v49, %v6444_v43  ;;  %v6453_v49 = vld [vmem:[#allocation76_spill] sm:$0xff] }
 0x3b5   : > { %v2706_v0 = vpop.f32.mrf.mxu2  ;;  %v2597_v23 = vadd.f32 %v2596_v21, %v6453_v49  ;;  %v2781_v30 = vadd.f32 %v2484_v17, %v2371_v58  ;;  %v2487_v21 = vadd.f32 %v5655_v19, %v6457_v2  ;;  %v6462_v19 = vmov 0.0  }
 0x3b6   : > { %v2707_v45 = vadd.f32 %v2706_v0, %v6447_v56  ;;  %3604 = vmatmul.msk.f32.gmra.mxu1 %vm1429_vm0, %v6448_v33  ;;  %v2911_v38 = vadd.f32 %v5536_v29, %v2875_v10  ;;  %v6455_v10 = vld [vmem:[#allocation77_spill] sm:$0xff]  ;;  %v6458_v33 = vld [vmem:[#allocation156_spill] sm:$0xff] }
 0x3b8   : > { %v2812_v11 = vadd.f32 %v2707_v45, %v2594_v59  ;;  %v2943_v40 = vmax.f32 %v2911_v38, 0.0  ;;  %v6456_v59 = vld [vmem:[#allocation79_spill] sm:$0xff]  ;;  %v2498_v45 = vpop.f32.mrf.mxu0 }
 0x3ba   : > { %v2844_v34 = vadd.f32 %v2812_v11, %v2780_v15  ;;  %3634 = vmatmul.msk.f32.gmra.mxu2 %vm1429_vm0, %v6449_v54  ;;  %3646 = vmatmul.msk.f32.gmra.mxu3 %vm1429_vm0, %v2943_v40  ;;  %v6459_v11 = vld [vmem:[#allocation54_spill] sm:$0xff] }
 0x3bb   : > { %v2605_v18 = vpop.f32.mrf.mxu1  ;;  %v2374_v40 = vadd.f32 %v5479_v27, %v6459_v11 }
 0x3bc   : > { %v2876_v53 = vadd.f32 %v2844_v34, %v6451_v31  ;;  %v6460_v34 = vld [vmem:[#allocation82_spill] sm:$0xff] }
 0x3bd   : > { %v2709_v61 = vpop.f32.mrf.mxu2  ;;  %v2600_v54 = vadd.f32 %v2599_v12, %v6460_v34  ;;  %v6468_v34 = vld [vmem:[#allocation81_spill] sm:$0xff] }
 0x3be   : > { %v2710_v43 = vadd.f32 %v2709_v61, %v6454_v1  ;;  %3605 = vmatmul.msk.f32.gmra.mxu1 %vm1429_vm0, %v6455_v10  ;;  %v2912_v0 = vadd.f32 %v5536_v29, %v2876_v53  ;;  %v5742_v53 = vpop.f32.mrf.mxu3  ;;  %v2782_v61 = vadd.f32 %v2487_v21, %v2374_v40  ;;  %v6463_v1 = vld [vmem:[#allocation78_spill] sm:$0xff] }
 0x3bf   : > { %v2490_v27 = vadd.f32 %v5675_v4, %v6463_v1 }
 0x3c0   : > { %v2813_v48 = vadd.f32 %v2710_v43, %v2597_v23  ;;  %v2944_v28 = vmax.f32 %v2912_v0, 0.0  ;;  %v6464_v43 = vld [vmem:[#allocation158_spill] sm:$0xff]  ;;  %v6465_v0 = vld [vmem:[#allocation60_spill] sm:$0xff] }
 0x3c2   : > { %v2845_v35 = vadd.f32 %v2813_v48, %v2781_v30  ;;  %3635 = vmatmul.msk.f32.gmra.mxu2 %vm1429_vm0, %v6456_v59  ;;  %3647 = vmatmul.msk.f32.gmra.mxu3 %vm1429_vm0, %v2944_v28  ;;  %v2377_v30 = vadd.f32 %v5491_v13, %v6465_v0  ;;  %v2501_v48 = vpop.f32.mrf.mxu0  ;;  %v6466_v28 = vld [vmem:[#allocation85_spill] sm:$0xff]  ;;  %v2493_v13 = vadd.f32 %v5697_v6, %v6468_v34 }
 0x3c3   : > { %v2608_v56 = vpop.f32.mrf.mxu1  ;;  %v6467_v59 = vld [vmem:[#allocation153_spill] sm:$0xff] }
 0x3c4   : > { %v2877_v38 = vadd.f32 %v2845_v35, %v6458_v33  ;;  %v2603_v35 = vadd.f32 %v2602_v41, %v6466_v28  ;;  %v2783_v33 = vadd.f32 %v2490_v27, %v2377_v30  ;;  %v6473_v30 = vld [vmem:[#allocation84_spill] sm:$0xff] }
 0x3c5   : > { %v2712_v15 = vpop.f32.mrf.mxu2  ;;  %v2496_v28 = vadd.f32 %v5714_v32, %v6473_v30  ;;  %v6478_v32 = vld [vmem:[#allocation87_spill] sm:$0xff] }
 0x3c6   : > { %v2713_v17 = vadd.f32 %v2712_v15, %v6461_v36  ;;  %v2913_v31 = vadd.f32 %v5536_v29, %v2877_v38  ;;  %v5754_v11 = vpop.f32.mrf.mxu3 }
 0x3c8   : > { %v2814_v14 = vadd.f32 %v2713_v17, %v2600_v54  ;;  %v2945_v58 = vmax.f32 %v2913_v31, 0.0  ;;  %v6469_v54 = vld [vmem:[#allocation160_spill] sm:$0xff]  ;;  %v6470_v17 = vld [vmem:[#allocation66_spill] sm:$0xff] }
 0x3c9   : > { %v2380_v31 = vadd.f32 %v5501_v37, %v6470_v17  ;;  %v6474_v37 = vld [vmem:[#allocation64_spill] sm:$0xff]  ;;  %v2499_v17 = vadd.f32 %v2498_v45, %v6478_v32  ;;  %v6482_v45 = vld [vmem:[#allocation91_spill] sm:$0xff] }
 0x3ca   : > { %v2846_v49 = vadd.f32 %v2814_v14, %v2782_v61  ;;  %2762 = vmatmul.f32.gmra.mxu2 %v6462_v19  ;;  %3648 = vmatmul.msk.f32.gmra.mxu3 %vm1429_vm0, %v2945_v58  ;;  %v6471_v61 = vld [vmem:[#allocation89_spill] sm:$0xff]  ;;  %v6472_v58 = vld [vmem:[#allocation155_spill] sm:$0xff] }
 0x3cb   : > { %v2611_v23 = vpop.f32.mrf.mxu1  ;;  %v2606_v14 = vadd.f32 %v2605_v18, %v6471_v61  ;;  %v2784_v27 = vadd.f32 %v2493_v13, %v2380_v31  ;;  %v3765_v32 = vld [vmem:[%s4081_s9] sm:$0xff] }
 0x3cc   : > { %v2878_v12 = vadd.f32 %v2846_v49, %v6464_v43 }
 0x3cd   : > { %v2715_v10 = vpop.f32.mrf.mxu2 }
 0x3ce   : > { %v2716_v2 = vadd.f32 %v2715_v10, %v6467_v59  ;;  %v2914_v21 = vadd.f32 %v5536_v29, %v2878_v12  ;;  %v5767_v6 = vpop.f32.mrf.mxu3  ;;  %v6475_v59 = vld [vmem:[#allocation71_spill] sm:$0xff] }
 0x3d0   : > { %v2815_v38 = vadd.f32 %v2716_v2, %v2603_v35  ;;  %v2946_v15 = vmax.f32 %v2914_v21, 0.0  ;;  %v2383_v2 = vadd.f32 %v5513_v46, %v6475_v59  ;;  %v6476_v21 = vld [vmem:[#allocation94_spill] sm:$0xff] }
 0x3d2   : > { %v2847_v40 = vadd.f32 %v2815_v38, %v2783_v33  ;;  %2765 = vmatmul.f32.gmra.mxu2 %v6462_v19  ;;  %3649 = vmatmul.msk.f32.gmra.mxu3 %vm1429_vm0, %v2946_v15  ;;  %v2504_v19 = vpop.f32.mrf.mxu0  ;;  %v2609_v33 = vadd.f32 %v2608_v56, %v6476_v21  ;;  %v6477_v38 = vld [vmem:[#allocation157_spill] sm:$0xff]  ;;  %v2785_v34 = vadd.f32 %v2496_v28, %v2383_v2  ;;  %v6479_v56 = vld [vmem:[#allocation75_spill] sm:$0xff] }
 0x3d3   : > { %v2614_v4 = vpop.f32.mrf.mxu1 }
 0x3d4   : > { %v2879_v41 = vadd.f32 %v2847_v40, %v6469_v54 }
 0x3d5   : > { %v2718_v36 = vpop.f32.mrf.mxu2 }
 0x3d6   : > { %v2719_v49 = vadd.f32 %v2718_v36, %v6472_v58  ;;  %v2915_v1 = vadd.f32 %v5536_v29, %v2879_v41  ;;  %v2386_v58 = vadd.f32 %v5521_v16, %v6479_v56  ;;  %v2502_v16 = vadd.f32 %v2501_v48, %v6482_v45  ;;  %v6487_v56 = vld [vmem:[#allocation83_spill] sm:$0xff] }
 0x3d8   : > { %v2816_v43 = vadd.f32 %v2719_v49, %v2606_v14  ;;  %v2947_v12 = vmax.f32 %v2915_v1, 0.0  ;;  %v5780_v14 = vpop.f32.mrf.mxu3  ;;  %v6480_v49 = vld [vmem:[#allocation99_spill] sm:$0xff] }
 0x3d9   : > { %v2612_v1 = vadd.f32 %v2611_v23, %v6480_v49 }
 0x3da   : > { %v2848_v10 = vadd.f32 %v2816_v43, %v2784_v27  ;;  %3650 = vmatmul.msk.f32.gmra.mxu3 %vm1429_vm0, %v2947_v12  ;;  %v2507_v41 = vpop.f32.mrf.mxu0  ;;  %v6481_v27 = vld [vmem:[#allocation159_spill] sm:$0xff] }
 0x3db   : > { %v2617_v0 = vpop.f32.mrf.mxu1 }
 0x3dc   : > { %v2880_v35 = vadd.f32 %v2848_v10, %v6474_v37  ;;  %v2786_v10 = vadd.f32 %v2499_v17, %v2386_v58  ;;  %v2392_v58 = vadd.f32 %v5560_v51, %v6487_v56  ;;  %v6489_v51 = vld [vmem:[#allocation98_spill] sm:$0xff] }
 0x3dd   : > { %v2721_v18 = vpop.f32.mrf.mxu2 }
 0x3de   : > { %v2722_v15 = vadd.f32 %v2721_v18, %v6477_v38  ;;  %v2916_v40 = vadd.f32 %v5536_v29, %v2880_v35  ;;  %v6483_v18 = vld [vmem:[#allocation80_spill] sm:$0xff] }
 0x3df   : > { %v2389_v59 = vadd.f32 %v5540_v42, %v6483_v18  ;;  %v6486_v42 = vld [vmem:[#allocation95_spill] sm:$0xff] }
 0x3e0   : > { %v2817_v13 = vadd.f32 %v2722_v15, %v2609_v33  ;;  %v2948_v54 = vmax.f32 %v2916_v40, 0.0  ;;  %v6484_v33 = vld [vmem:[#allocation103_spill] sm:$0xff]  ;;  %v6485_v40 = vld [vmem:[#allocation17_spill] sm:$0xff] }
 0x3e1   : > { %v2615_v38 = vadd.f32 %v2614_v4, %v6484_v33  ;;  %v2505_v4 = vadd.f32 %v2504_v19, %v6486_v42  ;;  %v6493_v42 = vld [vmem:[#allocation90_spill] sm:$0xff] }
 0x3e2   : > { %v2849_v36 = vadd.f32 %v2817_v13, %v2785_v34  ;;  %3651 = vmatmul.msk.f32.gmra.mxu3 %vm1429_vm0, %v2948_v54  ;;  %v2510_v35 = vpop.f32.mrf.mxu0 }
 0x3e3   : > { %v2620_v61 = vpop.f32.mrf.mxu1 }
 0x3e4   : > { %v2881_v31 = vadd.f32 %v2849_v36, %v5364_v5  ;;  %v5791_v5 = vld [vmem:[%s6049_s6] ss:$0 sm:$0xff]  ;;  %v2787_v36 = vadd.f32 %v2502_v16, %v2389_v59  ;;  %v3766_v16 = vld [vmem:[%s4081_s9 + $0x8] sm:$0xff]  ;;  %v2508_v59 = vadd.f32 %v2507_v41, %v6489_v51  ;;  %v3767_v41 = vld [vmem:[%s4081_s9 + $0x10] sm:$0xff] }
 0x3e5   : > { %v2724_v46 = vpop.f32.mrf.mxu2 }
 0x3e6   : > { %v2725_v43 = vadd.f32 %v2724_v46, %v6481_v27  ;;  %v2917_v12 = vadd.f32 %v5536_v29, %v2881_v31 }
 0x3e8   : > { %v2818_v30 = vadd.f32 %v2725_v43, %v2612_v1  ;;  %v2949_v28 = vmax.f32 %v2917_v12, 0.0  ;;  %v6488_v43 = vld [vmem:[#allocation107_spill] sm:$0xff] }
 0x3e9   : > { %v2618_v12 = vadd.f32 %v2617_v0, %v6488_v43 }
 0x3ea   : > { %v2850_v37 = vadd.f32 %v2818_v30, %v2786_v10  ;;  %3652 = vmatmul.msk.f32.gmra.mxu3 %vm1429_vm0, %v2949_v28  ;;  %v2513_v27 = vpop.f32.mrf.mxu0 }
 0x3eb   : > { %v2623_v15 = vpop.f32.mrf.mxu1 }
 0x3ec   : > { %v2882_v23 = vadd.f32 %v2850_v37, %v5376_v25  ;;  %v2788_v37 = vadd.f32 %v2505_v4, %v2392_v58  ;;  %v2398_v4 = vadd.f32 %v5601_v55, %v6493_v42  ;;  %v6494_v58 = vld [vmem:[#allocation116_spill] sm:$0xff]  ;;  %v6495_v55 = vld [vmem:[#allocation105_spill] sm:$0xff] }
 0x3ed   : > { %v2727_v2 = vpop.f32.mrf.mxu2  ;;  %v3090_v21 = vpop.f32.mrf.mxu3 }
 0x3ee   : > { %v2728_v34 = vadd.f32 %v2727_v2, %v6485_v40  ;;  %v3091_v13 = vadd.f32 %v5791_v5, %v3090_v21  ;;  %v2918_v54 = vadd.f32 %v5536_v29, %v2882_v23 }
 0x3f0   : > { %v2819_v48 = vadd.f32 %v2728_v34, %v2615_v38  ;;  %v3186_v17 = vadd.f32 %v3765_v32, %v3091_v13  ;;  %v2950_v31 = vmax.f32 %v2918_v54, 0.0  ;;  %v6491_v38 = vld [vmem:[#allocation112_spill] sm:$0xff] }
 0x3f1   : > { %v2621_v40 = vadd.f32 %v2620_v61, %v6491_v38 }
 0x3f2   : > { %v2851_v25 = vadd.f32 %v2819_v48, %v2787_v36  ;;  %3218 = vst [vmem:[%s5804_s11] sm:$0xff] %v3186_v17  ;;  %3653 = vmatmul.msk.f32.gmra.mxu3 %vm1429_vm0, %v2950_v31  ;;  %v2516_v48 = vpop.f32.mrf.mxu0 }
 0x3f3   : > { %v2626_v45 = vpop.f32.mrf.mxu1 }
 0x3f4   : > { %v2883_v46 = vadd.f32 %v2851_v25, %v5391_v26 }
 0x3f5   : > { %v2730_v49 = vpop.f32.mrf.mxu2  ;;  %v3093_v1 = vpop.f32.mrf.mxu3 }
 0x3f6   : > { %v2731_v10 = vadd.f32 %v2730_v49, %v5360_v60  ;;  %v3094_v30 = vadd.f32 %v5791_v5, %v3093_v1  ;;  %v2919_v28 = vadd.f32 %v5536_v29, %v2883_v46  ;;  %v6490_v60 = vld [vmem:[#allocation86_spill] sm:$0xff]  ;;  %v2624_v49 = vadd.f32 %v2623_v15, %v6494_v58  ;;  %v3770_v58 = vld [vmem:[%s4081_s9 + $0x28] sm:$0xff] }
 0x3f7   : > { %v2395_v2 = vadd.f32 %v5584_v44, %v6490_v60  ;;  %v6492_v44 = vld [vmem:[#allocation102_spill] sm:$0xff]  ;;  %v6498_v60 = vld [vmem:[#allocation20_spill] sm:$0xff] }
 0x3f8   : > { %v2820_v19 = vadd.f32 %v2731_v10, %v2618_v12  ;;  %v3187_v26 = vadd.f32 %v3766_v16, %v3094_v30  ;;  %v2951_v23 = vmax.f32 %v2919_v28, 0.0  ;;  %v2511_v61 = vadd.f32 %v2510_v35, %v6492_v44  ;;  %v3768_v28 = vld [vmem:[%s4081_s9 + $0x18] sm:$0xff] }
 0x3f9   : > { %v2789_v36 = vadd.f32 %v2508_v59, %v2395_v2  ;;  %v2514_v16 = vadd.f32 %v2513_v27, %v6495_v55  ;;  %v6497_v59 = vld [vmem:[#allocation120_spill] sm:$0xff]  ;;  %v3769_v27 = vld [vmem:[%s4081_s9 + $0x20] sm:$0xff] }
 0x3fa   : > { %v2852_v18 = vadd.f32 %v2820_v19, %v2788_v37  ;;  %3219 = vst [vmem:[%s5804_s11 + $0x8] sm:$0xff] %v3187_v26  ;;  %3654 = vmatmul.msk.f32.gmra.mxu3 %vm1429_vm0, %v2951_v23  ;;  %v2790_v10 = vadd.f32 %v2511_v61, %v2398_v4  ;;  %v2519_v19 = vpop.f32.mrf.mxu0  ;;  %v6496_v26 = vld [vmem:[#allocation93_spill] sm:$0xff] }
 0x3fb   : > { %v2629_v31 = vpop.f32.mrf.mxu1  ;;  %v2401_v23 = vadd.f32 %v5621_v52, %v6496_v26 }
 0x3fc   : > { %v2884_v0 = vadd.f32 %v2852_v18, %v5403_v9 }
 0x3fd   : > { %v2733_v21 = vpop.f32.mrf.mxu2  ;;  %v3096_v33 = vpop.f32.mrf.mxu3  ;;  %v2791_v38 = vadd.f32 %v2514_v16, %v2401_v23 }
 0x3fe   : > { %v2734_v34 = vadd.f32 %v2733_v21, %v5372_v3  ;;  %v3097_v13 = vadd.f32 %v5791_v5, %v3096_v33  ;;  %v2920_v54 = vadd.f32 %v5536_v29, %v2884_v0  ;;  %v2627_v0 = vadd.f32 %v2626_v45, %v6497_v59 }
 0x400   : > { %v2821_v32 = vadd.f32 %v2734_v34, %v2621_v40  ;;  %v3188_v17 = vadd.f32 %v3767_v41, %v3097_v13  ;;  %v2952_v9 = vmax.f32 %v2920_v54, 0.0 }
 0x402   : > { %v2853_v25 = vadd.f32 %v2821_v32, %v2789_v36  ;;  %3220 = vst [vmem:[%s5804_s11 + $0x10] sm:$0xff] %v3188_v17  ;;  %3655 = vmatmul.msk.f32.gmra.mxu3 %vm1429_vm0, %v2952_v9  ;;  %v2522_v36 = vpop.f32.mrf.mxu0  ;;  %v6500_v32 = vld [vmem:[#allocation97_spill] sm:$0xff] }
 0x403   : > { %v2632_v15 = vpop.f32.mrf.mxu1  ;;  %v2404_v41 = vadd.f32 %v5641_v22, %v6500_v32  ;;  %v6503_v22 = vld [vmem:[#allocation113_spill] sm:$0xff] }
 0x404   : > { %v2885_v3 = vadd.f32 %v2853_v25, %v5411_v8  ;;  %v6501_v25 = vld [vmem:[#allocation124_spill] sm:$0xff] }
 0x405   : > { %v2736_v46 = vpop.f32.mrf.mxu2  ;;  %v3099_v56 = vpop.f32.mrf.mxu3  ;;  %v2630_v44 = vadd.f32 %v2629_v31, %v6501_v25 }
 0x406   : > { %v2737_v1 = vadd.f32 %v2736_v46, %v5384_v7  ;;  %v3100_v43 = vadd.f32 %v5791_v5, %v3099_v56  ;;  %v2921_v12 = vadd.f32 %v5536_v29, %v2885_v3  ;;  %v6502_v3 = vld [vmem:[#allocation69_spill] sm:$0xff] }
 0x408   : > { %v2822_v30 = vadd.f32 %v2737_v1, %v2624_v49  ;;  %v3189_v35 = vadd.f32 %v3768_v28, %v3100_v43  ;;  %v2953_v37 = vmax.f32 %v2921_v12, 0.0  ;;  %v2520_v43 = vadd.f32 %v2519_v19, %v6503_v22  ;;  %v6504_v12 = vld [vmem:[#allocation100_spill] sm:$0xff] }
 0x40a   : > { %v2854_v8 = vadd.f32 %v2822_v30, %v2790_v10  ;;  %3221 = vst [vmem:[%s5804_s11 + $0x18] sm:$0xff] %v3189_v35  ;;  %3656 = vmatmul.msk.f32.gmra.mxu3 %vm1429_vm0, %v2953_v37  ;;  %v2407_v10 = vadd.f32 %v5665_v57, %v6504_v12  ;;  %v2525_v35 = vpop.f32.mrf.mxu0  ;;  %v6505_v37 = vld [vmem:[#allocation128_spill] sm:$0xff]  ;;  %v6506_v57 = vld [vmem:[#allocation115_spill] sm:$0xff] }
 0x40b   : > { %v2635_v61 = vpop.f32.mrf.mxu1 }
 0x40c   : > { %v2886_v7 = vadd.f32 %v2854_v8, %v5421_v20  ;;  %v6499_v20 = vld [vmem:[#allocation109_spill] sm:$0xff]  ;;  %v2633_v8 = vadd.f32 %v2632_v15, %v6505_v37  ;;  %v2793_v26 = vadd.f32 %v2520_v43, %v2407_v10  ;;  %v6507_v15 = vld [vmem:[#allocation163_spill] sm:$0xff] }
 0x40d   : > { %v2739_v18 = vpop.f32.mrf.mxu2  ;;  %v3102_v51 = vpop.f32.mrf.mxu3  ;;  %v2517_v52 = vadd.f32 %v2516_v48, %v6499_v20 }
 0x40e   : > { %v2740_v2 = vadd.f32 %v2739_v18, %v6498_v60  ;;  %v3103_v21 = vadd.f32 %v5791_v5, %v3102_v51  ;;  %v2922_v33 = vadd.f32 %v5536_v29, %v2886_v7  ;;  %v3771_v18 = vld [vmem:[%s4081_s9 + $0x30] sm:$0xff] }
 0x40f   : > { %v2792_v56 = vadd.f32 %v2517_v52, %v2404_v41 }
 0x410   : > { %v2823_v40 = vadd.f32 %v2740_v2, %v2627_v0  ;;  %v3190_v34 = vadd.f32 %v3769_v27, %v3103_v21  ;;  %v2954_v13 = vmax.f32 %v2922_v33, 0.0  ;;  %v2523_v0 = vadd.f32 %v2522_v36, %v6506_v57  ;;  %v6510_v27 = vld [vmem:[#allocation24_spill] sm:$0xff]  ;;  %v3772_v36 = vld [vmem:[%s4081_s9 + $0x38] sm:$0xff] }
 0x412   : > { %v2855_v54 = vadd.f32 %v2823_v40, %v2791_v38  ;;  %3222 = vst [vmem:[%s5804_s11 + $0x20] sm:$0xff] %v3190_v34  ;;  %3657 = vmatmul.msk.f32.gmra.mxu3 %vm1429_vm0, %v2954_v13  ;;  %v6509_v38 = vld [vmem:[#allocation133_spill] sm:$0xff]  ;;  %v2528_v52 = vpop.f32.mrf.mxu0 }
 0x413   : > { %v2638_v23 = vpop.f32.mrf.mxu1  ;;  %v2636_v40 = vadd.f32 %v2635_v61, %v6509_v38 }
 0x414   : > { %v2887_v45 = vadd.f32 %v2855_v54, %v5434_v47 }
 0x415   : > { %v2742_v17 = vpop.f32.mrf.mxu2  ;;  %v3105_v9 = vpop.f32.mrf.mxu3 }
 0x416   : > { %v2743_v42 = vadd.f32 %v2742_v17, %v6502_v3  ;;  %v3106_v4 = vadd.f32 %v5791_v5, %v3105_v9  ;;  %v2923_v46 = vadd.f32 %v5536_v29, %v2887_v45  ;;  %v6513_v3 = vld [vmem:[#allocation108_spill] sm:$0xff] }
 0x418   : > { %v2824_v48 = vadd.f32 %v2743_v42, %v2630_v44  ;;  %v3191_v49 = vadd.f32 %v3770_v58, %v3106_v4  ;;  %v2955_v1 = vmax.f32 %v2923_v46, 0.0  ;;  %v6512_v44 = vld [vmem:[#allocation165_spill] sm:$0xff]  ;;  %v2413_v42 = vadd.f32 %v5702_v24, %v6513_v3  ;;  %v6516_v24 = vld [vmem:[#allocation122_spill] sm:$0xff] }
 0x419   : > { %v6515_v58 = vld [vmem:[#allocation161_spill] sm:$0xff] }
 0x41a   : > { %v2856_v47 = vadd.f32 %v2824_v48, %v2792_v56  ;;  %3223 = vst [vmem:[%s5804_s11 + $0x28] sm:$0xff] %v3191_v49  ;;  %3658 = vmatmul.msk.f32.gmra.mxu3 %vm1429_vm0, %v2955_v1  ;;  %v6514_v56 = vld [vmem:[#allocation137_spill] sm:$0xff] }
 0x41b   : > { %v2641_v17 = vpop.f32.mrf.mxu1  ;;  %v2639_v48 = vadd.f32 %v2638_v23, %v6514_v56 }
 0x41c   : > { %v2888_v31 = vadd.f32 %v2856_v47, %v5444_v39 }
 0x41d   : > { %v2745_v30 = vpop.f32.mrf.mxu2  ;;  %v3108_v28 = vpop.f32.mrf.mxu3 }
 0x41e   : > { %v2746_v55 = vadd.f32 %v2745_v30, %v5419_v62  ;;  %v3109_v16 = vadd.f32 %v5791_v5, %v3108_v28  ;;  %v2924_v7 = vadd.f32 %v5536_v29, %v2888_v31  ;;  %v6508_v62 = vld [vmem:[#allocation104_spill] sm:$0xff]  ;;  %v3773_v31 = vld [vmem:[%s4081_s9 + $0x40] sm:$0xff]  ;;  %v2531_v30 = vpop.f32.mrf.mxu0 }
 0x41f   : > { %v2410_v2 = vadd.f32 %v5682_v63, %v6508_v62  ;;  %v6511_v63 = vld [vmem:[#allocation119_spill] sm:$0xff] }
 0x420   : > { %v2825_v19 = vadd.f32 %v2746_v55, %v2633_v8  ;;  %v3192_v39 = vadd.f32 %v3771_v18, %v3109_v16  ;;  %v2956_v51 = vmax.f32 %v2924_v7, 0.0  ;;  %v2526_v25 = vadd.f32 %v2525_v35, %v6511_v63  ;;  %v6517_v8 = vld [vmem:[#allocation167_spill] sm:$0xff] }
 0x421   : > { %v2794_v20 = vadd.f32 %v2523_v0, %v2410_v2  ;;  %v2529_v35 = vadd.f32 %v2528_v52, %v6516_v24  ;;  %v6518_v16 = vld [vmem:[#allocation111_spill] sm:$0xff]  ;;  %v6524_v52 = vld [vmem:[#allocation13_spill] sm:$0xff] }
 0x422   : > { %v2857_v59 = vadd.f32 %v2825_v19, %v2793_v26  ;;  %3224 = vst [vmem:[%s5804_s11 + $0x30] sm:$0xff] %v3192_v39  ;;  %3659 = vmatmul.msk.f32.gmra.mxu3 %vm1429_vm0, %v2956_v51  ;;  %v2795_v22 = vadd.f32 %v2526_v25, %v2413_v42  ;;  %v2416_v7 = vadd.f32 %v5722_v50, %v6518_v16  ;;  %v6519_v19 = vld [vmem:[#allocation139_spill] sm:$0xff]  ;;  %v6520_v39 = vld [vmem:[#allocation162_spill] sm:$0xff] }
 0x423   : > { %v2644_v37 = vpop.f32.mrf.mxu1  ;;  %v2642_v18 = vadd.f32 %v2641_v17, %v6519_v19  ;;  %v6521_v50 = vld [vmem:[#allocation126_spill] sm:$0xff]  ;;  %v6533_v19 = vld [vmem:[#allocation121_spill] sm:$0xff] }
 0x424   : > { %v2889_v60 = vadd.f32 %v2857_v59, %v6507_v15  ;;  %v2796_v0 = vadd.f32 %v2529_v35, %v2416_v7  ;;  %v3776_v35 = vld [vmem:[%s4081_s9 + $0x58] sm:$0xff] }
 0x425   : > { %v2748_v21 = vpop.f32.mrf.mxu2  ;;  %v3111_v33 = vpop.f32.mrf.mxu3 }
 0x426   : > { %v2749_v34 = vadd.f32 %v2748_v21, %v6510_v27  ;;  %v3112_v13 = vadd.f32 %v5791_v5, %v3111_v33  ;;  %v2925_v54 = vadd.f32 %v5536_v29, %v2889_v60  ;;  %v3774_v60 = vld [vmem:[%s4081_s9 + $0x48] sm:$0xff]  ;;  %v2532_v33 = vadd.f32 %v2531_v30, %v6521_v50  ;;  %v2534_v38 = vpop.f32.mrf.mxu0  ;;  %v3777_v50 = vld [vmem:[%s4081_s9 + $0x60] sm:$0xff] }
 0x428   : > { %v2826_v45 = vadd.f32 %v2749_v34, %v2636_v40  ;;  %v3193_v32 = vadd.f32 %v3772_v36, %v3112_v13  ;;  %v2957_v41 = vmax.f32 %v2925_v54, 0.0  ;;  %v6522_v40 = vld [vmem:[#allocation169_spill] sm:$0xff]  ;;  %v6523_v34 = vld [vmem:[#allocation114_spill] sm:$0xff]  ;;  %v6525_v36 = vld [vmem:[#allocation164_spill] sm:$0xff] }
 0x429   : > { %v2419_v13 = vadd.f32 %v5742_v53, %v6523_v34  ;;  %v6526_v53 = vld [vmem:[#allocation129_spill] sm:$0xff]  ;;  %v6536_v34 = vld [vmem:[#allocation136_spill] sm:$0xff] }
 0x42a   : > { %v2858_v9 = vadd.f32 %v2826_v45, %v2794_v20  ;;  %3225 = vst [vmem:[%s5804_s11 + $0x38] sm:$0xff] %v3193_v32  ;;  %3660 = vmatmul.msk.f32.gmra.mxu3 %vm1429_vm0, %v2957_v41  ;;  %v2645_v45 = vadd.f32 %v2644_v37, %v6524_v52  ;;  %v6538_v52 = vld [vmem:[#allocation125_spill] sm:$0xff] }
 0x42b   : > { %v2797_v63 = vadd.f32 %v2532_v33, %v2419_v13 }
 0x42c   : > { %v2890_v61 = vadd.f32 %v2858_v9, %v6512_v44  ;;  %v2647_v9 = vpop.f32.mrf.mxu1  ;;  %v3775_v44 = vld [vmem:[%s4081_s9 + $0x50] sm:$0xff] }
 0x42d   : > { %v2751_v4 = vpop.f32.mrf.mxu2  ;;  %v3114_v46 = vpop.f32.mrf.mxu3 }
 0x42e   : > { %v2752_v49 = vadd.f32 %v2751_v4, %v6515_v58  ;;  %v3115_v1 = vadd.f32 %v5791_v5, %v3114_v46  ;;  %v2926_v47 = vadd.f32 %v5536_v29, %v2890_v61  ;;  %v2535_v4 = vadd.f32 %v2534_v38, %v6526_v53  ;;  %v6527_v46 = vld [vmem:[#allocation171_spill] sm:$0xff]  ;;  %v2537_v30 = vpop.f32.mrf.mxu0 }
 0x430   : > { %v2827_v43 = vadd.f32 %v2752_v49, %v2639_v48  ;;  %v3194_v12 = vadd.f32 %v3773_v31, %v3115_v1  ;;  %v2958_v10 = vmax.f32 %v2926_v47, 0.0  ;;  %v6528_v48 = vld [vmem:[#allocation117_spill] sm:$0xff]  ;;  %v6529_v47 = vld [vmem:[#allocation142_spill] sm:$0xff] }
 0x431   : > { %v2422_v58 = vadd.f32 %v5754_v11, %v6528_v48  ;;  %v6531_v11 = vld [vmem:[#allocation132_spill] sm:$0xff] }
 0x432   : > { %v2859_v28 = vadd.f32 %v2827_v43, %v2795_v22  ;;  %3226 = vst [vmem:[%s5804_s11 + $0x40] sm:$0xff] %v3194_v12  ;;  %3661 = vmatmul.msk.f32.gmra.mxu3 %vm1429_vm0, %v2958_v10  ;;  %v2648_v22 = vadd.f32 %v2647_v9, %v6529_v47  ;;  %v6530_v43 = vld [vmem:[#allocation166_spill] sm:$0xff]  ;;  %v2538_v7 = vadd.f32 %v2537_v30, %v6531_v11 }
 0x434   : > { %v2891_v55 = vadd.f32 %v2859_v28, %v6517_v8  ;;  %v2798_v28 = vadd.f32 %v2535_v4, %v2422_v58 }
 0x435   : > { %v2754_v26 = vpop.f32.mrf.mxu2  ;;  %v3117_v23 = vpop.f32.mrf.mxu3 }
 0x436   : > { %v2755_v51 = vadd.f32 %v2754_v26, %v6520_v39  ;;  %v3118_v59 = vadd.f32 %v5791_v5, %v3117_v23  ;;  %v2927_v57 = vadd.f32 %v5536_v29, %v2891_v55  ;;  %v2650_v55 = vpop.f32.mrf.mxu1  ;;  %v6532_v26 = vld [vmem:[#allocation172_spill] sm:$0xff] }
 0x438   : > { %v2828_v15 = vadd.f32 %v2755_v51, %v2642_v18  ;;  %v3195_v62 = vadd.f32 %v3774_v60, %v3118_v59  ;;  %v2959_v2 = vmax.f32 %v2927_v57, 0.0  ;;  %v2425_v18 = vadd.f32 %v5767_v6, %v6533_v19  ;;  %v6534_v59 = vld [vmem:[#allocation144_spill] sm:$0xff] }
 0x439   : > { %v2651_v57 = vadd.f32 %v2650_v55, %v6534_v59  ;;  %v3783_v55 = vld [vmem:[%s4081_s9 + $0x88] sm:$0xff] }
 0x43a   : > { %v2860_v21 = vadd.f32 %v2828_v15, %v2796_v0  ;;  %3227 = vst [vmem:[%s5804_s11 + $0x48] sm:$0xff] %v3195_v62  ;;  %3662 = vmatmul.msk.f32.gmra.mxu3 %vm1429_vm0, %v2959_v2  ;;  %v6535_v0 = vld [vmem:[#allocation168_spill] sm:$0xff]  ;;  %v2799_v2 = vadd.f32 %v2538_v7, %v2425_v18 }
 0x43c   : > { %v2892_v27 = vadd.f32 %v2860_v21, %v6522_v40  ;;  %v2540_v40 = vpop.f32.mrf.mxu0 }
 0x43d   : > { %v2757_v54 = vpop.f32.mrf.mxu2  ;;  %v3120_v20 = vpop.f32.mrf.mxu3  ;;  %v2541_v13 = vadd.f32 %v2540_v40, %v6536_v34  ;;  %v3789_v34 = vld [vmem:[%s4081_s9 + $0xb8] sm:$0xff] }
 0x43e   : > { %v2758_v32 = vadd.f32 %v2757_v54, %v6525_v36  ;;  %v3121_v41 = vadd.f32 %v5791_v5, %v3120_v20  ;;  %v2928_v17 = vadd.f32 %v5536_v29, %v2892_v27  ;;  %v2653_v6 = vpop.f32.mrf.mxu1  ;;  %v6537_v54 = vld [vmem:[#allocation173_spill] sm:$0xff] }
 0x440   : > { %v2829_v25 = vadd.f32 %v2758_v32, %v2645_v45  ;;  %v3196_v61 = vadd.f32 %v3775_v44, %v3121_v41  ;;  %v2960_v3 = vmax.f32 %v2928_v17, 0.0  ;;  %v6539_v32 = vld [vmem:[#allocation146_spill] sm:$0xff] }
 0x441   : > { %v2654_v41 = vadd.f32 %v2653_v6, %v6539_v32  ;;  %v6540_v17 = vld [vmem:[#allocation170_spill] sm:$0xff]  ;;  %v3791_v32 = vld [vmem:[%s4081_s9 + $0xc8] sm:$0xff] }
 0x442   : > { %v2861_v42 = vadd.f32 %v2829_v25, %v2797_v63  ;;  %3228 = vst [vmem:[%s5804_s11 + $0x50] sm:$0xff] %v3196_v61  ;;  %3663 = vmatmul.msk.f32.gmra.mxu3 %vm1429_vm0, %v2960_v3  ;;  %v3778_v25 = vld [vmem:[%s6047_s4] ss:$0 sm:$0xff] }
 0x444   : > { %v2893_v56 = vadd.f32 %v2861_v42, %v6527_v46  ;;  %v3779_v42 = vld [vmem:[%s4081_s9 + $0x68] sm:$0xff]  ;;  %v6541_v46 = vld [vmem:[#allocation174_spill] sm:$0xff] }
 0x445   : > { %v2760_v49 = vpop.f32.mrf.mxu2  ;;  %v3123_v1 = vpop.f32.mrf.mxu3 }
 0x446   : > { %v2761_v31 = vadd.f32 %v2760_v49, %v6530_v43  ;;  %v3124_v12 = vadd.f32 %v5791_v5, %v3123_v1  ;;  %v2929_v10 = vadd.f32 %v5536_v29, %v2893_v56  ;;  %v3780_v1 = vld [vmem:[%s4081_s9 + $0x70] sm:$0xff] }
 0x448   : > { %v2830_v24 = vadd.f32 %v2761_v31, %v2648_v22  ;;  %v3197_v37 = vadd.f32 %v3776_v35, %v3124_v12  ;;  %v2961_v8 = vmax.f32 %v2929_v10, 0.0  ;;  %v3781_v12 = vld [vmem:[%s4081_s9 + $0x78] sm:$0xff] }
 0x44a   : > { %v2862_v16 = vadd.f32 %v2830_v24, %v2798_v28  ;;  %3229 = vst [vmem:[%s5804_s11 + $0x58] sm:$0xff] %v3197_v37  ;;  %3664 = vmatmul.msk.f32.gmra.mxu3 %vm1429_vm0, %v2961_v8  ;;  %v3782_v24 = vld [vmem:[%s4081_s9 + $0x80] sm:$0xff] }
 0x44c   : > { %v2894_v23 = vadd.f32 %v2862_v16, %v6532_v26  ;;  %v3784_v26 = vld [vmem:[%s4081_s9 + $0x90] sm:$0xff] }
 0x44d   : > { %v2763_v39 = vpop.f32.mrf.mxu2  ;;  %v3126_v51 = vpop.f32.mrf.mxu3 }
 0x44e   : > { %v2764_v15 = vadd.f32 %v2763_v39, %v6535_v0  ;;  %v3127_v60 = vadd.f32 %v5791_v5, %v3126_v51  ;;  %v2930_v62 = vadd.f32 %v5536_v29, %v2894_v23  ;;  %v2428_v29 = vadd.f32 %v5780_v14, %v6538_v52  ;;  %v3785_v39 = vld [vmem:[%s4081_s9 + $0x98] sm:$0xff]  ;;  %v3786_v0 = vld [vmem:[%s4081_s9 + $0xa0] sm:$0xff] }
 0x44f   : > { %v3790_v52 = vld [vmem:[%s4081_s9 + $0xc0] sm:$0xff] }
 0x450   : > { %v2831_v21 = vadd.f32 %v2764_v15, %v2651_v57  ;;  %v3198_v33 = vadd.f32 %v3777_v50, %v3127_v60  ;;  %v2962_v38 = vmax.f32 %v2930_v62, 0.0  ;;  %v2800_v61 = vadd.f32 %v2541_v13, %v2428_v29 }
 0x452   : > { %v2863_v27 = vadd.f32 %v2831_v21, %v2799_v2  ;;  %3230 = vst [vmem:[%s5804_s11 + $0x60] sm:$0xff] %v3198_v33  ;;  %3665 = vmatmul.msk.f32.gmra.mxu3 %vm1429_vm0, %v2962_v38  ;;  %v3787_v2 = vld [vmem:[%s4081_s9 + $0xa8] sm:$0xff]  ;;  %v3788_v38 = vld [vmem:[%s4081_s9 + $0xb0] sm:$0xff] }
 0x454   : > { %v2895_v20 = vadd.f32 %v2863_v27, %v6537_v54 }
 0x455   : > { %v2766_v45 = vpop.f32.mrf.mxu2  ;;  %v3129_v36 = vpop.f32.mrf.mxu3 }
 0x456   : > { %v2767_v9 = vadd.f32 %v2766_v45, %v6540_v17  ;;  %v3130_v63 = vadd.f32 %v5791_v5, %v3129_v36  ;;  %v2931_v44 = vadd.f32 %v3778_v25, %v2895_v20 }
 0x458   : > { %v2832_v3 = vadd.f32 %v2767_v9, %v2654_v41  ;;  %v3199_v53 = vadd.f32 %v3779_v42, %v3130_v63  ;;  %v2963_v14 = vmax.f32 %v2931_v44, 0.0  ;;  %v3792_v63 = vld [vmem:[%s4081_s9 + $0xd0] sm:$0xff] }
 0x45a   : > { %v2864_v4 = vadd.f32 %v2832_v3, %v2800_v61  ;;  %3231 = vst [vmem:[%s5804_s11 + $0x68] sm:$0xff] %v3199_v53  ;;  %3666 = vmatmul.msk.f32.gmra.mxu3 %vm1429_vm0, %v2963_v14  ;;  %v3793_v3 = vld [vmem:[%s4081_s9 + $0xd8] sm:$0xff] }
 0x45c   : > { %v2896_v56 = vadd.f32 %v2864_v4, %v6541_v46  ;;  %v3794_v4 = vld [vmem:[%s4081_s9 + $0xe0] sm:$0xff] }
 0x45d   : > { %v3132_v48 = vpop.f32.mrf.mxu3 }
 0x45e   : > { %v3133_v58 = vadd.f32 %v5791_v5, %v3132_v48  ;;  %v2932_v49 = vadd.f32 %v3778_v25, %v2896_v56 }
 0x460   : > { %v3200_v47 = vadd.f32 %v3780_v1, %v3133_v58  ;;  %v2964_v22 = vmax.f32 %v2932_v49, 0.0  ;;  %v3795_v58 = vld [vmem:[%s4081_s9 + $0xe8] sm:$0xff] }
 0x462   : > { %3232 = vst [vmem:[%s5804_s11 + $0x70] sm:$0xff] %v3200_v47  ;;  %3667 = vmatmul.msk.f32.gmra.mxu3 %vm1429_vm0, %v2964_v22  ;;  %v3796_v22 = vld [vmem:[%s4081_s9 + $0xf0] sm:$0xff] }
 0x465   : > { %v3135_v43 = vpop.f32.mrf.mxu3 }
 0x466   : > { %v3136_v31 = vadd.f32 %v5791_v5, %v3135_v43 }
 0x468   : > { %v3201_v10 = vadd.f32 %v3781_v12, %v3136_v31 }
 0x46a   : > { %3233 = vst [vmem:[%s5804_s11 + $0x78] sm:$0xff] %v3201_v10  ;;  %v3797_v10 = vld [vmem:[%s4081_s9 + $0xf8] sm:$0xff] }
 0x46d   : > { %v3138_v30 = vpop.f32.mrf.mxu3 }
 0x46e   : > { %v3139_v28 = vadd.f32 %v5791_v5, %v3138_v30 }
 0x470   : > { %v3202_v35 = vadd.f32 %v3782_v24, %v3139_v28 }
 0x472   : > { %3234 = vst [vmem:[%s5804_s11 + $0x80] sm:$0xff] %v3202_v35 }
 0x475   : > { %v3141_v37 = vpop.f32.mrf.mxu3 }
 0x476   : > { %v3142_v8 = vadd.f32 %v5791_v5, %v3141_v37 }
 0x478   : > { %v3203_v16 = vadd.f32 %v3783_v55, %v3142_v8 }
 0x47a   : > { %3235 = vst [vmem:[%s5804_s11 + $0x88] sm:$0xff] %v3203_v16 }
 0x47d   : > { %v3144_v11 = vpop.f32.mrf.mxu3 }
 0x47e   : > { %v3145_v7 = vadd.f32 %v5791_v5, %v3144_v11 }
 0x480   : > { %v3204_v23 = vadd.f32 %v3784_v26, %v3145_v7 }
 0x482   : > { %3236 = vst [vmem:[%s5804_s11 + $0x90] sm:$0xff] %v3204_v23 }
 0x485   : > { %v3147_v19 = vpop.f32.mrf.mxu3 }
 0x486   : > { %v3148_v18 = vadd.f32 %v5791_v5, %v3147_v19 }
 0x488   : > { %v3205_v51 = vadd.f32 %v3785_v39, %v3148_v18 }
 0x48a   : > { %3237 = vst [vmem:[%s5804_s11 + $0x98] sm:$0xff] %v3205_v51 }
 0x48d   : > { %v3150_v59 = vpop.f32.mrf.mxu3 }
 0x48e   : > { %v3151_v57 = vadd.f32 %v5791_v5, %v3150_v59 }
 0x490   : > { %v3206_v15 = vadd.f32 %v3786_v0, %v3151_v57 }
 0x492   : > { %3238 = vst [vmem:[%s5804_s11 + $0xa0] sm:$0xff] %v3206_v15 }
 0x495   : > { %v3153_v60 = vpop.f32.mrf.mxu3 }
 0x496   : > { %v3154_v62 = vadd.f32 %v5791_v5, %v3153_v60 }
 0x498   : > { %v3207_v21 = vadd.f32 %v3787_v2, %v3154_v62 }
 0x49a   : > { %3239 = vst [vmem:[%s5804_s11 + $0xa8] sm:$0xff] %v3207_v21 }
 0x49d   : > { %v3156_v50 = vpop.f32.mrf.mxu3 }
 0x49e   : > { %v3157_v33 = vadd.f32 %v5791_v5, %v3156_v50 }
 0x4a0   : > { %v3208_v40 = vadd.f32 %v3788_v38, %v3157_v33 }
 0x4a2   : > { %3240 = vst [vmem:[%s5804_s11 + $0xb0] sm:$0xff] %v3208_v40 }
 0x4a5   : > { %v3159_v27 = vpop.f32.mrf.mxu3 }
 0x4a6   : > { %v3160_v6 = vadd.f32 %v5791_v5, %v3159_v27 }
 0x4a8   : > { %v3209_v13 = vadd.f32 %v3789_v34, %v3160_v6 }
 0x4aa   : > { %3241 = vst [vmem:[%s5804_s11 + $0xb8] sm:$0xff] %v3209_v13 }
 0x4ad   : > { %v3162_v54 = vpop.f32.mrf.mxu3 }
 0x4ae   : > { %v3163_v20 = vadd.f32 %v5791_v5, %v3162_v54 }
 0x4b0   : > { %v3210_v29 = vadd.f32 %v3790_v52, %v3163_v20 }
 0x4b2   : > { %3242 = vst [vmem:[%s5804_s11 + $0xc0] sm:$0xff] %v3210_v29 }
 0x4b5   : > { %v3165_v45 = vpop.f32.mrf.mxu3 }
 0x4b6   : > { %v3166_v36 = vadd.f32 %v5791_v5, %v3165_v45 }
 0x4b8   : > { %v3211_v41 = vadd.f32 %v3791_v32, %v3166_v36 }
 0x4ba   : > { %3243 = vst [vmem:[%s5804_s11 + $0xc8] sm:$0xff] %v3211_v41 }
 0x4bd   : > { %v3168_v17 = vpop.f32.mrf.mxu3 }
 0x4be   : > { %v3169_v9 = vadd.f32 %v5791_v5, %v3168_v17 }
 0x4c0   : > { %v3212_v25 = vadd.f32 %v3792_v63, %v3169_v9 }
 0x4c2   : > { %3244 = vst [vmem:[%s5804_s11 + $0xd0] sm:$0xff] %v3212_v25 }
 0x4c5   : > { %v3171_v44 = vpop.f32.mrf.mxu3 }
 0x4c6   : > { %v3172_v61 = vadd.f32 %v5791_v5, %v3171_v44 }
 0x4c8   : > { %v3213_v42 = vadd.f32 %v3793_v3, %v3172_v61 }
 0x4ca   : > { %3245 = vst [vmem:[%s5804_s11 + $0xd8] sm:$0xff] %v3213_v42 }
 0x4cd   : > { %v3174_v53 = vpop.f32.mrf.mxu3 }
 0x4ce   : > { %v3175_v14 = vadd.f32 %v5791_v5, %v3174_v53 }
 0x4d0   : > { %v3214_v46 = vadd.f32 %v3794_v4, %v3175_v14 }
 0x4d2   : > { %3246 = vst [vmem:[%s5804_s11 + $0xe0] sm:$0xff] %v3214_v46 }
 0x4d5   : > { %v3177_v56 = vpop.f32.mrf.mxu3 }
 0x4d6   : > { %v3178_v48 = vadd.f32 %v5791_v5, %v3177_v56 }
 0x4d8   : > { %v3215_v49 = vadd.f32 %v3795_v58, %v3178_v48 }
 0x4da   : > { %3247 = vst [vmem:[%s5804_s11 + $0xe8] sm:$0xff] %v3215_v49 }
 0x4dd   : > { %v3180_v1 = vpop.f32.mrf.mxu3 }
 0x4de   : > { %v3181_v47 = vadd.f32 %v5791_v5, %v3180_v1 }
 0x4e0   : > { %v3216_v43 = vadd.f32 %v3796_v22, %v3181_v47 }
 0x4e2   : > { %3248 = vst [vmem:[%s5804_s11 + $0xf0] sm:$0xff] %v3216_v43 }
 0x4e5   : > { %v3183_v31 = vpop.f32.mrf.mxu3 }
 0x4e6   : > { %v3184_v12 = vadd.f32 %v5791_v5, %v3183_v31 }
 0x4e8   : > { %v3217_v30 = vadd.f32 %v3797_v10, %v3184_v12 }
 0x4ea   : > { %3249 = vst [vmem:[%s5804_s11 + $0xf8] sm:$0xff] %v3217_v30 }
 0x4eb   : > { %3885 = shalt.err (!%p3882_p10)
}
 0x4ec   : > { %s3934_s23 = smov 128   ;;  %s3935_s9 = smov 8  }
 0x4ed   : > { %3705 = dma.vmem_to_hbm [thread:$0]  (%p4045_p3), %s3264_s13, 4096, %s3266_s18, %s3251_s19, %s3934_s23, %s3934_s23, %s3935_s9  }
 0x4ee PF: > { %s3280_s11 = sand.u32 1, %s3916_s24   ;;  %p6542_p12 = scmp.ge.s32.totalorder %s3928_s27, 2 }
 0x4ef   : > { %s3281_s17 = scalar_lea.sflag [#allocation4], %s3280_s11 }
 0x4f0   : > { %p3716_p13 = pnand %p6542_p12, %p4011_p6 }
 0x4f2   : > { %p3717_p0 = pneg %p3716_p13 }
 0x4f4   : > { %3911 = dma.done.wait (%p3717_p0), %s3281_s17, 4096  }
 0x4f5   : > { %3913 = vsyncadd (%p3717_p0), %s3281_s17, 4294963200  ;;  %p21_p5 = scmp.ge.s32.totalorder %s4029_s15, 4   ;;  %s6543_s24 = smov %s3920_s25 }
 0x4f6   : > { %s6544_s25 = smov %s3924_s26  ;;  %s6545_s26 = smov %s4041_s20 }
 0x4f7   : > { %s6546_s27 = smov %s4029_s15  ;;  %23 = sbr.rel (!%p21_p5) target bundleno = 8 (0x8), region = 105 }
 0x4fc   :  { %3287 = vsyncpa [#allocation3], 1 }
 0x4fd   :  { %3289 = vsyncpa [#allocation3 + $0x1], 1 }
 0x4fe   :  { %3290 = vsyncpa [#allocation6], 1 }
 0x4ff   :  { %3291 = vsyncpa [#allocation4], 1 }
 0x500   :  { %3293 = vsyncpa [#allocation4 + $0x1], 1 }

</bundles_post_ra>
